<compile_context>
chip_gen: v7x
topology: tpu7x:2x2x1
jax: 0.10.0
libtpu: 0.0.40
codegen_flags: <defaults>
</compile_context>

<pallas_src>
import jax
import jax.numpy as jnp
from jax.experimental import pallas as pl
from jax.experimental.pallas import tpu as pltpu

FEATURE_SIZE = 2048   # backbone.feature_size for xception
NUM_CLASSES = 2
LANE_PAD = 128        # lane-dense classifier output width
TK = 512              # K (reduction) tile: (512, 2048) bf16 = 2 MiB per buffer


def base_model_kernel(x_ref, w_feat_ref, b_feat_ref, w_cls_ref, b_cls_ref,
                      feat_ref, out_ref, acc_ref):
    """feature = relu(x @ W_f + b_f); output = feature @ W_c + b_c.

    Grid axis 0 tiles the D_in (reduction) axis. The [Bp, 2048] f32 accumulator
    lives in VMEM scratch; bias + ReLU + classifier matmul run once on the last
    K step. Both matmuls use the bf16 MXU path with f32 accumulation.
    """
    k = pl.program_id(0)

    @pl.when(k == 0)
    def _():
        acc_ref[...] = jnp.zeros_like(acc_ref)

    acc_ref[...] += jnp.dot(x_ref[...], w_feat_ref[...],
                            preferred_element_type=jnp.float32)

    @pl.when(k == pl.num_programs(0) - 1)
    def _():
        feat = jnp.maximum(acc_ref[...] + b_feat_ref[...], 0.0)   # f32 elementwise
        feat_ref[...] = feat.astype(feat_ref.dtype)
        logits = jnp.dot(feat.astype(jnp.bfloat16), w_cls_ref[...],
                         preferred_element_type=jnp.float32)      # [Bp, 128]
        out_ref[...] = (logits + b_cls_ref[...]).astype(out_ref.dtype)


def base_model_forward(x_nchw, params):
    """Mirrors base_model.forward: returns (feature, output)."""
    w_feat, b_feat, w_cls, b_cls = params
    B = x_nchw.shape[0]
    d_in = w_feat.shape[0]

    x2d = x_nchw.reshape(B, -1).astype(jnp.float32)          # [B, C*H*W], torch .view order

    # Pad batch to a sublane multiple of 8 and D_in to a multiple of TK (zero rows/cols
    # contribute nothing to the matmul).
    Bp = max(8, ((B + 7) // 8) * 8)
    Kp = ((d_in + TK - 1) // TK) * TK
    n_k = Kp // TK

    x_pad = jnp.zeros((Bp, Kp), jnp.bfloat16).at[:B, :d_in].set(x2d.astype(jnp.bfloat16))
    w_feat_p = jnp.zeros((Kp, FEATURE_SIZE), jnp.bfloat16).at[:d_in, :].set(
        w_feat.astype(jnp.bfloat16))
    b_feat_f = b_feat.astype(jnp.float32).reshape(1, FEATURE_SIZE)

    # Lane-dense (128-wide) zero-padded classifier.
    w_cls_p = jnp.zeros((FEATURE_SIZE, LANE_PAD), jnp.bfloat16).at[:, :NUM_CLASSES].set(
        w_cls.astype(jnp.bfloat16))
    b_cls_p = jnp.zeros((1, LANE_PAD), jnp.float32).at[:, :NUM_CLASSES].set(
        b_cls.astype(jnp.float32).reshape(1, NUM_CLASSES))

    feature_p, output_p = pl.pallas_call(
        base_model_kernel,
        out_shape=(
            jax.ShapeDtypeStruct((Bp, FEATURE_SIZE), jnp.float32),
            jax.ShapeDtypeStruct((Bp, LANE_PAD), jnp.float32),
        ),
        grid_spec=pltpu.PrefetchScalarGridSpec(
            num_scalar_prefetch=0,
            grid=(n_k,),
            in_specs=[
                pl.BlockSpec((Bp, TK), lambda k: (0, k)),                # x tile
                pl.BlockSpec((TK, FEATURE_SIZE), lambda k: (k, 0)),      # streamed weight
                pl.BlockSpec((1, FEATURE_SIZE), lambda k: (0, 0)),       # backbone bias
                pl.BlockSpec((FEATURE_SIZE, LANE_PAD), lambda k: (0, 0)),  # classifier W
                pl.BlockSpec((1, LANE_PAD), lambda k: (0, 0)),           # classifier b
            ],
            out_specs=(
                pl.BlockSpec((Bp, FEATURE_SIZE), lambda k: (0, 0)),      # feature (resident)
                pl.BlockSpec((Bp, LANE_PAD), lambda k: (0, 0)),          # padded logits
            ),
            scratch_shapes=[pltpu.VMEM((Bp, FEATURE_SIZE), jnp.float32)],
        ),
        compiler_params=pltpu.CompilerParams(
            dimension_semantics=("arbitrary",),   # K is a reduction axis
            vmem_limit_bytes=32 * 1024 * 1024,
        ),
    )(x_pad, w_feat_p, b_feat_f, w_cls_p, b_cls_p)

    feature = feature_p[:B, :]
    output = output_p[:B, :NUM_CLASSES]
    return feature, output


def init_params(key, d_in):
    """Deterministic synthetic parameters (no checkpoint loading)."""
    k1, k2, k3, k4 = jax.random.split(key, 4)
    # stand-in backbone projection: flatten(C*H*W) -> FEATURE_SIZE
    w_feat = jax.random.normal(k1, (d_in, FEATURE_SIZE), jnp.float32) * 0.02
    b_feat = jax.random.normal(k2, (1, FEATURE_SIZE), jnp.float32) * 0.01
    # classifier: nn.Linear(2048, 2)  (stored transposed: [in, out])
    w_cls = jax.random.normal(k3, (FEATURE_SIZE, NUM_CLASSES), jnp.float32) * 0.02
    b_cls = jax.random.normal(k4, (1, NUM_CLASSES), jnp.float32) * 0.01
    return w_feat, b_feat, w_cls, b_cls


if __name__ == "__main__":
    key = jax.random.PRNGKey(0)
    kx, kp = jax.random.split(key)

    # small xception-style input: NCHW, 3 channels
    B, C, H, W = 2, 3, 16, 16
    x = jax.random.normal(kx, (B, C, H, W), jnp.float32)

    params = init_params(kp, C * H * W)

    feature, output = base_model_forward(x, params)
    jax.block_until_ready((feature, output))

    assert feature.shape == (B, FEATURE_SIZE)
    assert output.shape == (B, NUM_CLASSES)

    # sanity check against a plain-JAX reference with matching bf16 quantization
    w_feat, b_feat, w_cls, b_cls = params
    x2d = x.reshape(B, -1)
    xb = x2d.astype(jnp.bfloat16).astype(jnp.float32)
    wfb = w_feat.astype(jnp.bfloat16).astype(jnp.float32)
    feat_ref = jnp.maximum(
        jax.lax.dot(xb, wfb, precision=jax.lax.Precision.HIGHEST) + b_feat, 0.0)
    wcb = w_cls.astype(jnp.bfloat16).astype(jnp.float32)
    out_ref = jax.lax.dot(feat_ref.astype(jnp.bfloat16).astype(jnp.float32), wcb,
                          precision=jax.lax.Precision.HIGHEST) + b_cls

    assert jnp.allclose(feature, feat_ref, atol=2e-2, rtol=2e-2), \
        float(jnp.max(jnp.abs(feature - feat_ref)))
    assert jnp.allclose(output, out_ref, atol=2e-2, rtol=2e-2), \
        float(jnp.max(jnp.abs(output - out_ref)))

    print("KERNEL_OK")
</pallas_src>

<mosaic_0001>
module attributes {stable_mosaic.version = 11 : i64} {
  func.func @base_model_kernel(%arg0: i32, %arg1: memref<8x512xbf16, #tpu.memory_space<vmem>>, %arg2: memref<512x2048xbf16, #tpu.memory_space<vmem>>, %arg3: memref<1x2048xf32, #tpu.memory_space<vmem>>, %arg4: memref<2048x128xbf16, #tpu.memory_space<vmem>>, %arg5: memref<1x128xf32, #tpu.memory_space<vmem>>, %arg6: memref<8x2048xf32, #tpu.memory_space<vmem>>, %arg7: memref<8x128xf32, #tpu.memory_space<vmem>>, %arg8: memref<8x2048xf32, #tpu.memory_space<vmem>>) attributes {dimension_semantics = [#tpu.dimension_semantics<arbitrary>], iteration_bounds = array<i64: 2>, scalar_prefetch = 0 : i64, scratch_operands = 1 : i64, tpu.core_type = #tpu.core_type<tc>, window_params = [{transform_indices = @transform_0, window_bounds = array<i64: 8, 512>}, {transform_indices = @transform_1, window_bounds = array<i64: 512, 2048>}, {pipeline_mode = #tpu.pipeline_mode<synchronous>, transform_indices = @transform_2, window_bounds = array<i64: 1, 2048>}, {pipeline_mode = #tpu.pipeline_mode<synchronous>, transform_indices = @transform_3, window_bounds = array<i64: 2048, 128>}, {pipeline_mode = #tpu.pipeline_mode<synchronous>, transform_indices = @transform_4, window_bounds = array<i64: 1, 128>}, {pipeline_mode = #tpu.pipeline_mode<synchronous>, transform_indices = @transform_5, window_bounds = array<i64: 8, 2048>}, {pipeline_mode = #tpu.pipeline_mode<synchronous>, transform_indices = @transform_6, window_bounds = array<i64: 8, 128>}]} {
    %c0_i32 = arith.constant 0 : i32
    %0 = arith.cmpi eq, %arg0, %c0_i32 : i32
    %1 = arith.extui %0 : i1 to i32
    %c0_i32_0 = arith.constant 0 : i32
    %2 = arith.cmpi ne, %1, %c0_i32_0 : i32
    scf.if %2 {
      %cst_9 = arith.constant 0.000000e+00 : f32
      %12 = vector.broadcast %cst_9 : f32 to vector<8x2048xf32>
      %c0_10 = arith.constant 0 : index
      %c0_11 = arith.constant 0 : index
      %13 = vector.load %arg8[%c0_10, %c0_11] : memref<8x2048xf32, #tpu.memory_space<vmem>>, vector<8x2048xf32>
      tpu.vector_store %arg8[%c0_10, %c0_11], %12 {strides = array<i32>} : memref<8x2048xf32, #tpu.memory_space<vmem>>, vector<8x2048xf32>,
    } else {
    }
    %c0 = arith.constant 0 : index
    %c0_1 = arith.constant 0 : index
    %3 = vector.load %arg8[%c0, %c0_1] : memref<8x2048xf32, #tpu.memory_space<vmem>>, vector<8x2048xf32>
    %c0_2 = arith.constant 0 : index
    %c0_3 = arith.constant 0 : index
    %4 = vector.load %arg1[%c0_2, %c0_3] : memref<8x512xbf16, #tpu.memory_space<vmem>>, vector<8x512xbf16>
    %c0_4 = arith.constant 0 : index
    %c0_5 = arith.constant 0 : index
    %5 = vector.load %arg2[%c0_4, %c0_5] : memref<512x2048xbf16, #tpu.memory_space<vmem>>, vector<512x2048xbf16>
    %cst = arith.constant dense<0.000000e+00> : vector<8x2048xf32>
    %6 = tpu.matmul %4, %5, %cst {dimension_numbers = #tpu.dot_dimension_numbers<[1], [0], [0], [1], [0, 0, 1, 1], [], []>} : vector<8x512xbf16>, vector<512x2048xbf16>, vector<8x2048xf32> -> vector<8x2048xf32>
    %7 = arith.addf %3, %6 : vector<8x2048xf32>
    %c0_6 = arith.constant 0 : index
    %c0_7 = arith.constant 0 : index
    %8 = vector.load %arg8[%c0_6, %c0_7] : memref<8x2048xf32, #tpu.memory_space<vmem>>, vector<8x2048xf32>
    tpu.vector_store %arg8[%c0_6, %c0_7], %7 {strides = array<i32>} : memref<8x2048xf32, #tpu.memory_space<vmem>>, vector<8x2048xf32>,
    %c1_i32 = arith.constant 1 : i32
    %9 = arith.cmpi eq, %arg0, %c1_i32 : i32
    %10 = arith.extui %9 : i1 to i32
    %c0_i32_8 = arith.constant 0 : i32
    %11 = arith.cmpi ne, %10, %c0_i32_8 : i32
    scf.if %11 {
      %c0_9 = arith.constant 0 : index
      %c0_10 = arith.constant 0 : index
      %12 = vector.load %arg8[%c0_9, %c0_10] : memref<8x2048xf32, #tpu.memory_space<vmem>>, vector<8x2048xf32>
      %c0_11 = arith.constant 0 : index
      %c0_12 = arith.constant 0 : index
      %13 = vector.load %arg3[%c0_11, %c0_12] : memref<1x2048xf32, #tpu.memory_space<vmem>>, vector<1x2048xf32>
      %14 = vector.broadcast %13 : vector<1x2048xf32> to vector<8x2048xf32>
      %15 = arith.addf %12, %14 : vector<8x2048xf32>
      %cst_13 = arith.constant 0.000000e+00 : f32
      %16 = vector.broadcast %cst_13 : f32 to vector<8x2048xf32>
      %17 = arith.maximumf %15, %16 : vector<8x2048xf32>
      %c0_14 = arith.constant 0 : index
      %c0_15 = arith.constant 0 : index
      %18 = vector.load %arg6[%c0_14, %c0_15] : memref<8x2048xf32, #tpu.memory_space<vmem>>, vector<8x2048xf32>
      tpu.vector_store %arg6[%c0_14, %c0_15], %17 {strides = array<i32>} : memref<8x2048xf32, #tpu.memory_space<vmem>>, vector<8x2048xf32>,
      %19 = arith.truncf %17 : vector<8x2048xf32> to vector<8x2048xbf16>
      %c0_16 = arith.constant 0 : index
      %c0_17 = arith.constant 0 : index
      %20 = vector.load %arg4[%c0_16, %c0_17] : memref<2048x128xbf16, #tpu.memory_space<vmem>>, vector<2048x128xbf16>
      %cst_18 = arith.constant dense<0.000000e+00> : vector<8x128xf32>
      %21 = tpu.matmul %19, %20, %cst_18 {dimension_numbers = #tpu.dot_dimension_numbers<[1], [0], [0], [1], [0, 0, 1, 1], [], []>} : vector<8x2048xbf16>, vector<2048x128xbf16>, vector<8x128xf32> -> vector<8x128xf32>
      %c0_19 = arith.constant 0 : index
      %c0_20 = arith.constant 0 : index
      %22 = vector.load %arg5[%c0_19, %c0_20] : memref<1x128xf32, #tpu.memory_space<vmem>>, vector<1x128xf32>
      %23 = vector.broadcast %22 : vector<1x128xf32> to vector<8x128xf32>
      %24 = arith.addf %21, %23 : vector<8x128xf32>
      %c0_21 = arith.constant 0 : index
      %c0_22 = arith.constant 0 : index
      %25 = vector.load %arg7[%c0_21, %c0_22] : memref<8x128xf32, #tpu.memory_space<vmem>>, vector<8x128xf32>
      tpu.vector_store %arg7[%c0_21, %c0_22], %24 {strides = array<i32>} : memref<8x128xf32, #tpu.memory_space<vmem>>, vector<8x128xf32>,
    } else {
    }
    return
  }
  func.func @transform_0(%arg0: i32) -> (i32, i32) {
    %c0_i32 = arith.constant 0 : i32
    %c0_i32_0 = arith.constant 0 : i32
    return %c0_i32, %arg0 : i32, i32
  }
  func.func @transform_1(%arg0: i32) -> (i32, i32) {
    %c0_i32 = arith.constant 0 : i32
    %c0_i32_0 = arith.constant 0 : i32
    return %arg0, %c0_i32 : i32, i32
  }
  func.func @transform_2(%arg0: i32) -> (i32, i32) {
    %c0_i32 = arith.constant 0 : i32
    %c0_i32_0 = arith.constant 0 : i32
    %c0_i32_1 = arith.constant 0 : i32
    return %c0_i32, %c0_i32_0 : i32, i32
  }
  func.func @transform_3(%arg0: i32) -> (i32, i32) {
    %c0_i32 = arith.constant 0 : i32
    %c0_i32_0 = arith.constant 0 : i32
    %c0_i32_1 = arith.constant 0 : i32
    return %c0_i32, %c0_i32_0 : i32, i32
  }
  func.func @transform_4(%arg0: i32) -> (i32, i32) {
    %c0_i32 = arith.constant 0 : i32
    %c0_i32_0 = arith.constant 0 : i32
    %c0_i32_1 = arith.constant 0 : i32
    return %c0_i32, %c0_i32_0 : i32, i32
  }
  func.func @transform_5(%arg0: i32) -> (i32, i32) {
    %c0_i32 = arith.constant 0 : i32
    %c0_i32_0 = arith.constant 0 : i32
    %c0_i32_1 = arith.constant 0 : i32
    return %c0_i32, %c0_i32_0 : i32, i32
  }
  func.func @transform_6(%arg0: i32) -> (i32, i32) {
    %c0_i32 = arith.constant 0 : i32
    %c0_i32_0 = arith.constant 0 : i32
    %c0_i32_1 = arith.constant 0 : i32
    return %c0_i32, %c0_i32_0 : i32, i32
  }
}

</mosaic_0001>

<bundles_post_ra>
// kernel: tpu_custom_call.1
= control target key start
LH: loop header
LB: loop body
LE: loop exit
PB: predicated region body
PF: predicated region fallthrough
CT: control target
= control target key end

     0   :  { %12 = vsyncpa [#allocation4], 0  ;;  %s8099_s0 = inlined_call_operand.hbm [shape: bf16[8,1024], index: 0, kind: input, shape index: {}]   ;;  %s8100_s1 = inlined_call_operand.hbm [shape: bf16[1024,2048], index: 1, kind: input, shape index: {}]   ;;  %s8101_s2 = inlined_call_operand.hbm [shape: f32[1,2048], index: 2, kind: input, shape index: {}]   ;;  %s8102_s3 = inlined_call_operand.hbm [shape: bf16[2048,128], index: 3, kind: input, shape index: {}]   ;;  %s8103_s4 = inlined_call_operand.hbm [shape: f32[1,128], index: 4, kind: input, shape index: {}]   ;;  %s8104_s5 = inlined_call_operand.hbm [shape: f32[8,2048], index: 5, kind: output, shape index: {0}]   ;;  %s8105_s6 = inlined_call_operand.hbm [shape: f32[8,128], index: 6, kind: output, shape index: {1}]  }
   0x1   :  { %14 = vsyncpa [#allocation4 + $0x1], 0 }
   0x2   :  { %15 = vsyncpa [#allocation7], 0 }
   0x3   :  { %17 = vsyncpa [#allocation7 + $0x1], 0 }
   0x4   :  { %18 = vsyncpa [#allocation10], 0 }
   0x5   :  { %19 = vsyncpa [#allocation5], 0 }
   0x6   :  { %20 = vsyncpa [#allocation14], 0  ;;  %s7174_s21 = smov 0   ;;  %s7176_s22 = smov 0  }
   0x7   :  { %s7178_s23 = smov 0   ;;  %s7180_s24 = smov 0  }
   0x8 LB: > { %s7193_s25 = sadd.s32 4294967295, %s7126_s24   ;;  %p46_p0 = scmp.ne.s32.totalorder %s7118_s22, %s7114_s21  ;;  %s7126_s24 = sphi %s7180_s24, %s8124_s24   ;;  %s7122_s23 = sphi %s7178_s23, %s8123_s23   ;;  %s7118_s22 = sphi %s7176_s22, %s8122_s22   ;;  %s7114_s21 = sphi %s7174_s21, %s8121_s21  }
   0x9   : > { %p8106_p1 = scmp.eq.s32.totalorder %s7193_s25, 0  ;;  %p5801_p2 = scmp.ge.s32.totalorder %s7126_s24, 1 }
   0xa   : > { %p188_p3 = scmp.lt.s32.totalorder %s7126_s24, 3  ;;  %s7128_s28 = smov [#allocation8]  }
   0xb   : > { %p7202_p5 = por %p8106_p1, %p46_p0  ;;  %s201_s29 = sshll.u32 %s7128_s28, 4  ;;  %s202_s29 = int_to_ptr.vmem [resolvable:$true] %s201_s29 }
   0xc   : > { %p7206_p6 = pnand %p5801_p2, %p188_p3  ;;  %s7129_s30 = smov [#allocation9]  }
   0xd   : > { %s8109_s26 = scalar_select %p7202_p5, 1, 0 }
   0xe   : > { %s8110_s27 = scalar_select %p7206_p6, 1, 0 }
   0xf   : > { %p6675_p7 = pneg %p7206_p6  ;;  %s211_s7 = sshll.u32 %s7129_s30, 4  ;;  %s7218_s7 = int_to_ptr.vmem [resolvable:$true] %s211_s7 }
  0x10   : > { %s7130_s9 = smov [#allocation11]   ;;  %s6876_s13 = scalar_lea.hbm %s8101_s2, 256 }
  0x11   : > { %p7214_p8 = pnand %p6675_p7, %p8106_p1  ;;  %s7220_s10 = sshll.u32 %s7130_s9, 4  ;;  %s226_s10 = int_to_ptr.vmem [resolvable:$true] %s7220_s10 }
  0x12   : > { %p6877_p9 = scmp.ne.s32.totalorder %s8101_s2, %s6876_s13  ;;  %p6883_p13 = scmp.lt.u32.totalorder %s6876_s13, %s8101_s2 }
  0x13   : > { %p7230_p10 = pneg %p7214_p8 }
  0x15   : > { %p6879_p11 = pnand %p7230_p10, %p6877_p9 }
  0x17   : > { %p6880_p12 = pneg %p6879_p11 }
  0x19   : > { %p6885_p0 = pnand %p6883_p13, %p6880_p12 }
  0x1b   : > { %6888 = shalt.err (!%p6885_p0)
}
  0x1c   : > { %s6889_s19 = scalar_lea.vmem %s202_s29, 256  ;;  %p6897_p4 = scmp.lt.s32.totalorder %s202_s29, %s202_s29 }
  0x1d   : > { %p6890_p2 = scmp.ne.s32.totalorder %s202_s29, %s6889_s19  ;;  %p6898_p1 = scmp.lt.s32.totalorder %s6889_s19, %s6889_s19 }
  0x1f   : > { %p6892_p3 = pnand %p6890_p2, %p7230_p10  ;;  %p6899_p5 = por %p6898_p1, %p6897_p4 }
  0x21   : > { %p6893_p7 = pneg %p6892_p3 }
  0x23   : > { %p6900_p6 = pnand %p6899_p5, %p6893_p7 }
  0x25   : > { %6903 = shalt.err (!%p6900_p6)
}
  0x26   : > { %6678 = dma.hbm_to_vmem [thread:$0]  (!%p7214_p8), %s8101_s2, 256, %s202_s29, [#allocation7]  }
  0x27   : > { %s6904_s9 = scalar_lea.hbm %s8102_s3, 16384 }
  0x28   : > { %p6905_p9 = scmp.ne.s32.totalorder %s8102_s3, %s6904_s9  ;;  %p6911_p4 = scmp.lt.u32.totalorder %s6904_s9, %s8102_s3 }
  0x2a   : > { %p6907_p11 = pnand %p6905_p9, %p7230_p10 }
  0x2c   : > { %p6908_p1 = pneg %p6907_p11 }
  0x2e   : > { %p6913_p5 = pnand %p6911_p4, %p6908_p1 }
  0x30   : > { %6916 = shalt.err (!%p6913_p5)
}
  0x31   : > { %s6917_s29 = scalar_lea.vmem %s7218_s7, 16384  ;;  %p6925_p0 = scmp.lt.s32.totalorder %s7218_s7, %s7218_s7 }
  0x32   : > { %p6918_p6 = scmp.ne.s32.totalorder %s7218_s7, %s6917_s29  ;;  %p6926_p2 = scmp.lt.s32.totalorder %s6917_s29, %s6917_s29 }
  0x34   : > { %p6920_p12 = pnand %p6918_p6, %p7230_p10  ;;  %p6927_p3 = por %p6926_p2, %p6925_p0 }
  0x36   : > { %p6921_p13 = pneg %p6920_p12 }
  0x38   : > { %p6928_p7 = pnand %p6927_p3, %p6921_p13 }
  0x3a   : > { %6931 = shalt.err (!%p6928_p7)
}
  0x3b   : > { %s7131_s15 = smov 64   ;;  %s7132_s17 = smov 4  }
  0x3c   : > { %6681 = dma.hbm_to_vmem [thread:$0]  (!%p7214_p8), %s8102_s3, 16384, %s7218_s7, [#allocation10], %s7131_s15, %s7131_s15, %s7132_s17  }
  0x3d   : > { %s6932_s28 = scalar_lea.hbm %s8103_s4, 16 }
  0x3e   : > { %p6933_p9 = scmp.ne.s32.totalorder %s8103_s4, %s6932_s28  ;;  %p6939_p4 = scmp.lt.u32.totalorder %s6932_s28, %s8103_s4 }
  0x40   : > { %p6935_p11 = pnand %p6933_p9, %p7230_p10 }
  0x42   : > { %p6936_p1 = pneg %p6935_p11 }
  0x44   : > { %p6941_p5 = pnand %p6939_p4, %p6936_p1 }
  0x46   : > { %6944 = shalt.err (!%p6941_p5)
}
  0x47   : > { %s6945_s13 = scalar_lea.vmem %s226_s10, 16  ;;  %s6952_s7 = scalar_lea.vmem %s226_s10, 32 }
  0x48   : > { %p6946_p6 = scmp.ne.s32.totalorder %s226_s10, %s6945_s13  ;;  %p6953_p0 = scmp.lt.s32.totalorder %s226_s10, %s226_s10 }
  0x49   : > { %p6954_p2 = scmp.lt.s32.totalorder %s6952_s7, %s6945_s13 }
  0x4a   : > { %p6948_p12 = pnand %p6946_p6, %p7230_p10 }
  0x4b   : > { %p6955_p3 = por %p6954_p2, %p6953_p0 }
  0x4c   : > { %p6949_p13 = pneg %p6948_p12 }
  0x4e   : > { %p6956_p7 = pnand %p6955_p3, %p6949_p13 }
  0x50   : > { %6959 = shalt.err (!%p6956_p7)
}
  0x51   : > { %6684 = dma.hbm_to_vmem [thread:$0]  (!%p7214_p8), %s8103_s4, 16, %s226_s10, [#allocation10]  }
  0x52   : > { %s7291_s16 = sadd.s32 1, %s7126_s24   ;;  %s33_s18 = sadd.s32 1, %s7122_s23 }
  0x53   : > { %s30_s17 = ssub.s32 %s7126_s24, %s7291_s16  ;;  %p40_p9 = scmp.ne.s32.totalorder %s7122_s23, %s7118_s22 }
  0x54   : > { %p31_p10 = scmp.eq.s32.totalorder %s30_s17, 0  ;;  %p41_p11 = scmp.eq.s32.totalorder %s7126_s24, 0 }
  0x55   : > { %p6695_p1 = scmp.lt.s32.totalorder %s7126_s24, 2  ;;  %s7304_s19 = sand.u32 1, %s7122_s23  }
  0x56   : > { %s7301_s8 = scalar_select %p31_p10, %s7122_s23, %s33_s18  }
  0x57   : > { %p42_p4 = por %p41_p11, %p40_p9  ;;  %s5806_s20 = sshll.u32 %s7304_s19, 4 }
  0x58   : > { %s6472_s10 = sshll.u32 %s7126_s24, 8  ;;  %s240_s9 = scalar_lea.vmem [#allocation3], %s5806_s20 }
  0x59   : > { %s7311_s30 = scalar_lea.hbm %s8099_s0, %s6472_s10  ;;  %s248_s11 = sshll.u32 %s240_s9, 4  ;;  %s7313_s11 = int_to_ptr.vmem [resolvable:$true] %s248_s11 }
  0x5a   : > { %p7315_p8 = pnand %p6695_p1, %p42_p4  ;;  %s5809_s13 = sshll.u32 %s7304_s19, 12 }
  0x5b   : > { %s255_s7 = sand.u32 1, %s7126_s24   ;;  %s237_s14 = scalar_lea.sflag [#allocation4], %s7304_s19 }
  0x5c   : > { %s6960_s29 = scalar_lea.hbm %s7311_s30, 256  ;;  %p6962_p6 = pneg %p7315_p8 }
  0x5d   : > { %p6961_p5 = scmp.ne.s32.totalorder %s7311_s30, %s6960_s29  ;;  %s6965_s20 = scalar_lea.hbm %s8099_s0, 512 }
  0x5e   : > { %p6966_p0 = scmp.lt.u32.totalorder %s7311_s30, %s8099_s0  ;;  %p6967_p2 = scmp.lt.u32.totalorder %s6965_s20, %s6960_s29 }
  0x5f   : > { %p6963_p12 = pnand %p6962_p6, %p6961_p5  ;;  %p6969_p7 = scmp.lt.u32.totalorder %s6960_s29, %s7311_s30 }
  0x60   : > { %p6968_p3 = por %p6967_p2, %p6966_p0 }
  0x61   : > { %p6964_p13 = pneg %p6963_p12 }
  0x62   : > { %p6970_p10 = por %p6969_p7, %p6968_p3 }
  0x64   : > { %p6971_p9 = pnand %p6970_p10, %p6964_p13 }
  0x66   : > { %6974 = shalt.err (!%p6971_p9)
}
  0x67   : > { %s6975_s28 = scalar_lea.vmem %s7313_s11, 256  ;;  %s7133_s9 = smov [#allocation3]  }
  0x68   : > { %p6976_p11 = scmp.ne.s32.totalorder %s7313_s11, %s6975_s28  ;;  %s6980_s17 = sshll.u32 %s7133_s9, 4  ;;  %s6981_s17 = int_to_ptr.vmem [resolvable:$false] %s6980_s17 }
  0x69   : > { %s6982_s18 = scalar_lea.vmem %s6981_s17, 512  ;;  %p6983_p5 = scmp.lt.s32.totalorder %s7313_s11, %s6981_s17 }
  0x6a   : > { %p6978_p1 = pnand %p6976_p11, %p6962_p6  ;;  %p6984_p12 = scmp.lt.s32.totalorder %s6982_s18, %s6975_s28 }
  0x6c   : > { %p6979_p4 = pneg %p6978_p1  ;;  %p6985_p0 = por %p6984_p12, %p6983_p5 }
  0x6e   : > { %p6986_p2 = pnand %p6985_p0, %p6979_p4 }
  0x70   : > { %6989 = shalt.err (!%p6986_p2)
}
  0x71   : > { %6688 = dma.hbm_to_vmem [thread:$0]  (!%p7315_p8), %s7311_s30, 256, %s7313_s11, %s237_s14  }
  0x72   : > { %s259_s29 = scalar_lea.vmem [#allocation6], %s5809_s13  ;;  %s6474_s10 = sshll.u32 %s7126_s24, 16 }
  0x73   : > { %s267_s20 = sshll.u32 %s259_s29, 4  ;;  %s7355_s9 = scalar_lea.hbm %s8100_s1, %s6474_s10  ;;  %s7349_s20 = int_to_ptr.vmem [resolvable:$true] %s267_s20 }
  0x74   : > { %s7359_s17 = scalar_lea.sflag [#allocation7], %s255_s7  ;;  %s6990_s18 = scalar_lea.hbm %s7355_s9, 65536 }
  0x75   : > { %p6991_p13 = scmp.ne.s32.totalorder %s7355_s9, %s6990_s18  ;;  %s6995_s11 = scalar_lea.hbm %s8100_s1, 131072 }
  0x76   : > { %p6996_p10 = scmp.lt.u32.totalorder %s7355_s9, %s8100_s1  ;;  %p6997_p9 = scmp.lt.u32.totalorder %s6995_s11, %s6990_s18 }
  0x77   : > { %p6993_p3 = pnand %p6991_p13, %p6962_p6  ;;  %p6999_p1 = scmp.lt.u32.totalorder %s6990_s18, %s7355_s9 }
  0x78   : > { %p6998_p11 = por %p6997_p9, %p6996_p10 }
  0x79   : > { %p6994_p7 = pneg %p6993_p3 }
  0x7a   : > { %p7000_p4 = por %p6999_p1, %p6998_p11 }
  0x7c   : > { %p7001_p5 = pnand %p7000_p4, %p6994_p7 }
  0x7e   : > { %7004 = shalt.err (!%p7001_p5)
}
  0x7f   : > { %s7005_s24 = scalar_lea.vmem %s7349_s20, 65536  ;;  %s7134_s7 = smov [#allocation6]  }
  0x80   : > { %p7006_p12 = scmp.ne.s32.totalorder %s7349_s20, %s7005_s24  ;;  %s7010_s29 = sshll.u32 %s7134_s7, 4  ;;  %s7011_s29 = int_to_ptr.vmem [resolvable:$false] %s7010_s29 }
  0x81   : > { %s7012_s10 = scalar_lea.vmem %s7011_s29, 131072  ;;  %p7013_p13 = scmp.lt.s32.totalorder %s7349_s20, %s7011_s29 }
  0x82   : > { %p7008_p0 = pnand %p7006_p12, %p6962_p6  ;;  %p7014_p3 = scmp.lt.s32.totalorder %s7012_s10, %s7005_s24 }
  0x84   : > { %p7009_p2 = pneg %p7008_p0  ;;  %p7015_p10 = por %p7014_p3, %p7013_p13 }
  0x86   : > { %p7016_p9 = pnand %p7015_p10, %p7009_p2 }
  0x88   : > { %7019 = shalt.err (!%p7016_p9)
}
  0x89   : > { %s7135_s21 = smov 1024   ;;  %p8114_p6 = scmp.ne.s32.totalorder %s8110_s27, 0 }
  0x8a   : > { %6691 = dma.hbm_to_vmem [thread:$0]  (!%p7315_p8), %s7355_s9, 65536, %s7349_s20, %s7359_s17, %s7135_s21, %s7135_s21, %s7131_s15  }
  0x8b   : > { %279 = sbr.rel (%p8114_p6) target bundleno = 1268 (0x4f4), region = 40  ;;  %s281_s28 = sand.u32 (!%p8114_p6), 1, %s7118_s22  }
  0x8c   : > { %s5814_s18 = sshll.u32 (!%p8114_p6), %s281_s28, 4  ;;  %s282_s19 = scalar_lea.sflag (!%p8114_p6), [#allocation4], %s281_s28 }
  0x8d   : > { %s7389_s30 = scalar_lea.vmem (!%p8114_p6), [#allocation3], %s5814_s18  ;;  %p8115_p7 = scmp.ne.s32.totalorder (!%p8114_p6), %s8109_s26, 0 }
  0x92   : > { %7089 = dma.done.wait (%p8115_p7), %s282_s19, 256  }
  0x93   : > { %7091 = vsyncadd (%p8115_p7), %s282_s19, 4294967040  ;;  %s290_s12 = sand.u32 1, %s7193_s25   ;;  %s5815_s11 = sshll.u32 %s281_s28, 12 }
  0x94   : > { %s291_s15 = scalar_lea.sflag [#allocation7], %s290_s12  ;;  %s7396_s20 = scalar_lea.vmem [#allocation6], %s5815_s11 }
  0x95   : > { %7093 = dma.done.wait (%p8115_p7), %s291_s15, 65536  }
  0x96   : > { %7095 = vsyncadd (%p8115_p7), %s291_s15, 4294901760  ;;  %p8116_p8 = scmp.eq.s32.totalorder %s7193_s25, 0 }
  0x98   : > { %7097 = dma.done.wait (%p8116_p8), [#allocation7], 256   ;;  %p8117_p11 = pmov %p8116_p8 }
  0x99   : > { %p8118_p1 = pmov %p8116_p8 }
  0x9a   : > { %7099 = vsyncadd (%p8117_p11), [#allocation7], 4294967040 }
  0x9b   : > { %7101 = dma.done.wait (%p8118_p1), [#allocation10], 16400   ;;  %p8119_p4 = pmov %p8118_p1 }
  0x9c   : > { %p8120_p5 = scmp.ne.s32.totalorder %s7193_s25, 0 }
  0x9d   : > { %7103 = vsyncadd (%p8119_p4), [#allocation10], 4294950896  ;;  %v7136_v0 = vmov (!%p8120_p5), 0.0  }
  0x9e   : > { %341 = sbr.rel (%p8120_p5) target bundleno = 166 (0xa6), region = 64  ;;  %342 = vst [vmem:[#allocation2] sm:$0xff] (!%p8120_p5), %v7136_v0  ;;  %343 = vst [vmem:[#allocation2 + $0x8] sm:$0xff] (!%p8120_p5), %v7136_v0 }
  0x9f   : > { %344 = vst [vmem:[#allocation2 + $0x10] sm:$0xff] (!%p8120_p5), %v7136_v0  ;;  %345 = vst [vmem:[#allocation2 + $0x18] sm:$0xff] (!%p8120_p5), %v7136_v0 }
  0xa0   : > { %346 = vst [vmem:[#allocation2 + $0x20] sm:$0xff] (!%p8120_p5), %v7136_v0  ;;  %347 = vst [vmem:[#allocation2 + $0x28] sm:$0xff] (!%p8120_p5), %v7136_v0 }
  0xa1   : > { %348 = vst [vmem:[#allocation2 + $0x30] sm:$0xff] (!%p8120_p5), %v7136_v0  ;;  %349 = vst [vmem:[#allocation2 + $0x38] sm:$0xff] (!%p8120_p5), %v7136_v0 }
  0xa2   : > { %350 = vst [vmem:[#allocation2 + $0x40] sm:$0xff] (!%p8120_p5), %v7136_v0  ;;  %351 = vst [vmem:[#allocation2 + $0x48] sm:$0xff] (!%p8120_p5), %v7136_v0 }
  0xa3   : > { %352 = vst [vmem:[#allocation2 + $0x50] sm:$0xff] (!%p8120_p5), %v7136_v0  ;;  %353 = vst [vmem:[#allocation2 + $0x58] sm:$0xff] (!%p8120_p5), %v7136_v0 }
  0xa4   : > { %354 = vst [vmem:[#allocation2 + $0x60] sm:$0xff] (!%p8120_p5), %v7136_v0  ;;  %355 = vst [vmem:[#allocation2 + $0x68] sm:$0xff] (!%p8120_p5), %v7136_v0 }
  0xa5   : > { %356 = vst [vmem:[#allocation2 + $0x70] sm:$0xff] %v7136_v0  ;;  %357 = vst [vmem:[#allocation2 + $0x78] sm:$0xff] %v7136_v0 }
  0xa6 PF: > { %v376_v1 = vld [vmem:[%s7396_s20] sm:$0xff]  ;;  %v7444_v55 = vld [vmem:[%s7389_s30 + $0x8] sm:$0xff]  ;;  %p6336_p12 = scmp.ne.s32.totalorder %s7193_s25, 1 }
  0xa7   : > { %v384_v2 = vld [vmem:[%s7396_s20 + $0x40] sm:$0xff]  ;;  %v7454_v60 = vcombine.high %v7444_v55, %v7444_v55 }
  0xa8   : > { %v632_v3 = vld [vmem:[%s7396_s20 + $0x800] sm:$0xff]  ;;  %v5825_v4 = vcombine.high %v376_v1, %v384_v2  ;;  %v5824_v6 = vcombine.low %v376_v1, %v384_v2 }
  0xa9   : > { %v640_v5 = vld [vmem:[%s7396_s20 + $0x840] sm:$0xff]  ;;  %3535 = vmatprep.mubr.bf16.mxu1 %v7454_v60 }
  0xaa   : > { %v392_v7 = vld [vmem:[%s7396_s20 + $0x80] sm:$0xff]  ;;  %v6081_v9 = vcombine.high %v632_v3, %v640_v5  ;;  %v6080_v10 = vcombine.low %v632_v3, %v640_v5  ;;  %3462 = vmatprep.subr.bf16.mxu0 %v5825_v4 }
  0xab   : > { %v400_v8 = vld [vmem:[%s7396_s20 + $0xc0] sm:$0xff]  ;;  %3463 = vmatpush1.bf16.msra.mxu0 %v5824_v6 }
  0xac   : > { %v5841_v11 = vcombine.high %v392_v7, %v400_v8  ;;  %v648_v12 = vld [vmem:[%s7396_s20 + $0x880] sm:$0xff]  ;;  %3503 = vmatprep.subr.bf16.mxu1 %v6081_v9  ;;  %v5840_v19 = vcombine.low %v392_v7, %v400_v8 }
  0xad   : > { %v656_v13 = vld [vmem:[%s7396_s20 + $0x8c0] sm:$0xff]  ;;  %3504 = vmatpush1.bf16.msra.mxu1 %v6080_v10 }
  0xae   : > { %v408_v14 = vld [vmem:[%s7396_s20 + $0x100] sm:$0xff]  ;;  %v6097_v15 = vcombine.high %v648_v12, %v656_v13  ;;  %3464 = vmatprep.subr.bf16.mxu0 %v5841_v11  ;;  %v6096_v20 = vcombine.low %v648_v12, %v656_v13 }
  0xaf   : > { %v416_v16 = vld [vmem:[%s7396_s20 + $0x140] sm:$0xff]  ;;  %3465 = vmatpush1.bf16.msra.mxu0 %v5840_v19 }
  0xb0   : > { %v664_v17 = vld [vmem:[%s7396_s20 + $0x900] sm:$0xff]  ;;  %v5857_v21 = vcombine.high %v408_v14, %v416_v16  ;;  %3505 = vmatprep.subr.bf16.mxu1 %v6097_v15  ;;  %v5856_v27 = vcombine.low %v408_v14, %v416_v16 }
  0xb1   : > { %v672_v18 = vld [vmem:[%s7396_s20 + $0x940] sm:$0xff]  ;;  %3506 = vmatpush1.bf16.msra.mxu1 %v6096_v20 }
  0xb2   : > { %v6113_v22 = vcombine.high %v664_v17, %v672_v18  ;;  %v424_v23 = vld [vmem:[%s7396_s20 + $0x180] sm:$0xff]  ;;  %3466 = vmatprep.subr.bf16.mxu0 %v5857_v21  ;;  %v6112_v28 = vcombine.low %v664_v17, %v672_v18 }
  0xb3   : > { %v432_v24 = vld [vmem:[%s7396_s20 + $0x1c0] sm:$0xff]  ;;  %3467 = vmatpush1.bf16.msra.mxu0 %v5856_v27 }
  0xb4   : > { %v680_v25 = vld [vmem:[%s7396_s20 + $0x980] sm:$0xff]  ;;  %v5873_v29 = vcombine.high %v424_v23, %v432_v24  ;;  %3507 = vmatprep.subr.bf16.mxu1 %v6113_v22  ;;  %v5872_v35 = vcombine.low %v424_v23, %v432_v24 }
  0xb5   : > { %v688_v26 = vld [vmem:[%s7396_s20 + $0x9c0] sm:$0xff]  ;;  %3508 = vmatpush1.bf16.msra.mxu1 %v6112_v28 }
  0xb6   : > { %v6129_v30 = vcombine.high %v680_v25, %v688_v26  ;;  %v440_v31 = vld [vmem:[%s7396_s20 + $0x200] sm:$0xff]  ;;  %3468 = vmatprep.subr.bf16.mxu0 %v5873_v29  ;;  %v6128_v36 = vcombine.low %v680_v25, %v688_v26 }
  0xb7   : > { %v448_v32 = vld [vmem:[%s7396_s20 + $0x240] sm:$0xff]  ;;  %3469 = vmatpush1.bf16.msra.mxu0 %v5872_v35 }
  0xb8   : > { %v696_v33 = vld [vmem:[%s7396_s20 + $0xa00] sm:$0xff]  ;;  %v5889_v37 = vcombine.high %v440_v31, %v448_v32  ;;  %3509 = vmatprep.subr.bf16.mxu1 %v6129_v30  ;;  %v5888_v43 = vcombine.low %v440_v31, %v448_v32 }
  0xb9   : > { %v704_v34 = vld [vmem:[%s7396_s20 + $0xa40] sm:$0xff]  ;;  %3510 = vmatpush1.bf16.msra.mxu1 %v6128_v36 }
  0xba   : > { %v6145_v38 = vcombine.high %v696_v33, %v704_v34  ;;  %v456_v39 = vld [vmem:[%s7396_s20 + $0x280] sm:$0xff]  ;;  %3470 = vmatprep.subr.bf16.mxu0 %v5889_v37  ;;  %v6144_v44 = vcombine.low %v696_v33, %v704_v34 }
  0xbb   : > { %v464_v40 = vld [vmem:[%s7396_s20 + $0x2c0] sm:$0xff]  ;;  %3471 = vmatpush1.bf16.msra.mxu0 %v5888_v43 }
  0xbc   : > { %v712_v41 = vld [vmem:[%s7396_s20 + $0xa80] sm:$0xff]  ;;  %v5905_v45 = vcombine.high %v456_v39, %v464_v40  ;;  %3511 = vmatprep.subr.bf16.mxu1 %v6145_v38  ;;  %v5904_v51 = vcombine.low %v456_v39, %v464_v40 }
  0xbd   : > { %v720_v42 = vld [vmem:[%s7396_s20 + $0xac0] sm:$0xff]  ;;  %3512 = vmatpush1.bf16.msra.mxu1 %v6144_v44 }
  0xbe   : > { %v6161_v46 = vcombine.high %v712_v41, %v720_v42  ;;  %v472_v47 = vld [vmem:[%s7396_s20 + $0x300] sm:$0xff]  ;;  %3472 = vmatprep.subr.bf16.mxu0 %v5905_v45  ;;  %v6160_v52 = vcombine.low %v712_v41, %v720_v42 }
  0xbf   : > { %v480_v48 = vld [vmem:[%s7396_s20 + $0x340] sm:$0xff]  ;;  %3473 = vmatpush1.bf16.msra.mxu0 %v5904_v51 }
  0xc0   : > { %v728_v49 = vld [vmem:[%s7396_s20 + $0xb00] sm:$0xff]  ;;  %v5921_v53 = vcombine.high %v472_v47, %v480_v48  ;;  %3513 = vmatprep.subr.bf16.mxu1 %v6161_v46  ;;  %v5920_v63 = vcombine.low %v472_v47, %v480_v48 }
  0xc1   : > { %v736_v50 = vld [vmem:[%s7396_s20 + $0xb40] sm:$0xff]  ;;  %3514 = vmatpush1.bf16.msra.mxu1 %v6160_v52 }
  0xc2   : > { %v7441_v54 = vld [vmem:[%s7389_s30] sm:$0xff]  ;;  %v6177_v56 = vcombine.high %v728_v49, %v736_v50  ;;  %3474 = vmatprep.subr.bf16.mxu0 %v5921_v53  ;;  %v6176_v0 = vcombine.low %v728_v49, %v736_v50 }
  0xc3   : > { %v488_v57 = vld [vmem:[%s7396_s20 + $0x380] sm:$0xff]  ;;  %v7450_v59 = vcombine.high %v7441_v54, %v7441_v54  ;;  %3475 = vmatpush1.bf16.msra.mxu0 %v5920_v63 }
  0xc4   : > { %v496_v58 = vld [vmem:[%s7396_s20 + $0x3c0] sm:$0xff]  ;;  %3515 = vmatprep.subr.bf16.mxu1 %v6177_v56 }
  0xc5   : > { %v744_v61 = vld [vmem:[%s7396_s20 + $0xb80] sm:$0xff]  ;;  %3494 = vmatprep.mubr.bf16.mxu0 %v7450_v59  ;;  %v5937_v1 = vcombine.high %v488_v57, %v496_v58  ;;  %v5936_v7 = vcombine.low %v488_v57, %v496_v58  ;;  %3516 = vmatpush1.bf16.msra.mxu1 %v6176_v0 }
  0xc6   : > { %v752_v62 = vld [vmem:[%s7396_s20 + $0xbc0] sm:$0xff] }
  0xc7   : > { %v6193_v2 = vcombine.high %v744_v61, %v752_v62  ;;  %v504_v3 = vld [vmem:[%s7396_s20 + $0x400] sm:$0xff]  ;;  %3476 = vmatprep.subr.bf16.mxu0 %v5937_v1  ;;  %v6192_v8 = vcombine.low %v744_v61, %v752_v62 }
  0xc8   : > { %v512_v4 = vld [vmem:[%s7396_s20 + $0x440] sm:$0xff]  ;;  %3477 = vmatpush1.bf16.msra.mxu0 %v5936_v7  ;;  %v377_v7 = vld [vmem:[%s7396_s20 + $0x8] sm:$0xff] }
  0xc9   : > { %v760_v5 = vld [vmem:[%s7396_s20 + $0xc00] sm:$0xff]  ;;  %v5953_v9 = vcombine.high %v504_v3, %v512_v4  ;;  %3517 = vmatprep.subr.bf16.mxu1 %v6193_v2  ;;  %v5952_v15 = vcombine.low %v504_v3, %v512_v4 }
  0xca   : > { %v768_v6 = vld [vmem:[%s7396_s20 + $0xc40] sm:$0xff]  ;;  %3518 = vmatpush1.bf16.msra.mxu1 %v6192_v8  ;;  %v385_v8 = vld [vmem:[%s7396_s20 + $0x48] sm:$0xff] }
  0xcb   : > { %v6209_v10 = vcombine.high %v760_v5, %v768_v6  ;;  %v520_v11 = vld [vmem:[%s7396_s20 + $0x480] sm:$0xff]  ;;  %3478 = vmatprep.subr.bf16.mxu0 %v5953_v9  ;;  %v6208_v16 = vcombine.low %v760_v5, %v768_v6  ;;  %v633_v9 = vld [vmem:[%s7396_s20 + $0x808] sm:$0xff] }
  0xcc   : > { %v528_v12 = vld [vmem:[%s7396_s20 + $0x4c0] sm:$0xff]  ;;  %3479 = vmatpush1.bf16.msra.mxu0 %v5952_v15  ;;  %v393_v15 = vld [vmem:[%s7396_s20 + $0x88] sm:$0xff] }
  0xcd   : > { %v776_v13 = vld [vmem:[%s7396_s20 + $0xc80] sm:$0xff]  ;;  %v5969_v17 = vcombine.high %v520_v11, %v528_v12  ;;  %3519 = vmatprep.subr.bf16.mxu1 %v6209_v10  ;;  %v5968_v23 = vcombine.low %v520_v11, %v528_v12  ;;  %v641_v10 = vld [vmem:[%s7396_s20 + $0x848] sm:$0xff] }
  0xce   : > { %v784_v14 = vld [vmem:[%s7396_s20 + $0xcc0] sm:$0xff]  ;;  %3520 = vmatpush1.bf16.msra.mxu1 %v6208_v16  ;;  %v401_v16 = vld [vmem:[%s7396_s20 + $0xc8] sm:$0xff] }
  0xcf   : > { %v6225_v18 = vcombine.high %v776_v13, %v784_v14  ;;  %v536_v19 = vld [vmem:[%s7396_s20 + $0x500] sm:$0xff]  ;;  %3480 = vmatprep.subr.bf16.mxu0 %v5969_v17  ;;  %v6224_v24 = vcombine.low %v776_v13, %v784_v14  ;;  %v5827_v13 = vcombine.high %v377_v7, %v385_v8  ;;  %v6083_v14 = vcombine.high %v633_v9, %v641_v10 }
  0xd0   : > { %v544_v20 = vld [vmem:[%s7396_s20 + $0x540] sm:$0xff]  ;;  %3481 = vmatpush1.bf16.msra.mxu0 %v5968_v23  ;;  %v7500_v17 = vcombine.low %v7441_v54, %v7441_v54  ;;  %v5843_v23 = vcombine.high %v393_v15, %v401_v16  ;;  %v417_v54 = vld [vmem:[%s7396_s20 + $0x148] sm:$0xff] }
  0xd1   : > { %v792_v21 = vld [vmem:[%s7396_s20 + $0xd00] sm:$0xff]  ;;  %v5985_v25 = vcombine.high %v536_v19, %v544_v20  ;;  %3521 = vmatprep.subr.bf16.mxu1 %v6225_v18  ;;  %v5984_v31 = vcombine.low %v536_v19, %v544_v20  ;;  %v649_v18 = vld [vmem:[%s7396_s20 + $0x888] sm:$0xff]  ;;  %v7506_v20 = vcombine.low %v7444_v55, %v7444_v55  ;;  %v5842_v55 = vcombine.low %v393_v15, %v401_v16 }
  0xd2   : > { %v800_v22 = vld [vmem:[%s7396_s20 + $0xd40] sm:$0xff]  ;;  %3522 = vmatpush1.bf16.msra.mxu1 %v6224_v24  ;;  %v657_v19 = vld [vmem:[%s7396_s20 + $0x8c8] sm:$0xff] }
  0xd3   : > { %v6241_v26 = vcombine.high %v792_v21, %v800_v22  ;;  %v552_v27 = vld [vmem:[%s7396_s20 + $0x580] sm:$0xff]  ;;  %3482 = vmatprep.subr.bf16.mxu0 %v5985_v25  ;;  %v6240_v32 = vcombine.low %v792_v21, %v800_v22  ;;  %v5826_v21 = vcombine.low %v377_v7, %v385_v8  ;;  %v6082_v22 = vcombine.low %v633_v9, %v641_v10  ;;  %v409_v25 = vld [vmem:[%s7396_s20 + $0x108] sm:$0xff] }
  0xd4   : > { %v560_v28 = vld [vmem:[%s7396_s20 + $0x5c0] sm:$0xff]  ;;  %3483 = vmatpush1.bf16.msra.mxu0 %v5984_v31  ;;  %v6099_v24 = vcombine.high %v649_v18, %v657_v19  ;;  %v425_v31 = vld [vmem:[%s7396_s20 + $0x188] sm:$0xff] }
  0xd5   : > { %v808_v29 = vld [vmem:[%s7396_s20 + $0xd80] sm:$0xff]  ;;  %v6001_v33 = vcombine.high %v552_v27, %v560_v28  ;;  %3523 = vmatprep.subr.bf16.mxu1 %v6241_v26  ;;  %v6000_v39 = vcombine.low %v552_v27, %v560_v28  ;;  %v665_v26 = vld [vmem:[%s7396_s20 + $0x908] sm:$0xff]  ;;  %v6098_v28 = vcombine.low %v649_v18, %v657_v19 }
  0xd6   : > { %v816_v30 = vld [vmem:[%s7396_s20 + $0xdc0] sm:$0xff]  ;;  %3524 = vmatpush1.bf16.msra.mxu1 %v6240_v32  ;;  %v673_v27 = vld [vmem:[%s7396_s20 + $0x948] sm:$0xff] }
  0xd7   : > { %v6257_v34 = vcombine.high %v808_v29, %v816_v30  ;;  %v568_v35 = vld [vmem:[%s7396_s20 + $0x600] sm:$0xff]  ;;  %3484 = vmatprep.subr.bf16.mxu0 %v6001_v33  ;;  %v6256_v40 = vcombine.low %v808_v29, %v816_v30  ;;  %v5859_v29 = vcombine.high %v409_v25, %v417_v54  ;;  %v6115_v30 = vcombine.high %v665_v26, %v673_v27  ;;  %v433_v32 = vld [vmem:[%s7396_s20 + $0x1c8] sm:$0xff] }
  0xd8   : > { %v576_v36 = vld [vmem:[%s7396_s20 + $0x640] sm:$0xff]  ;;  %3485 = vmatpush1.bf16.msra.mxu0 %v6000_v39  ;;  %v681_v33 = vld [vmem:[%s7396_s20 + $0x988] sm:$0xff] }
  0xd9   : > { %v824_v37 = vld [vmem:[%s7396_s20 + $0xe00] sm:$0xff]  ;;  %v6017_v41 = vcombine.high %v568_v35, %v576_v36  ;;  %3525 = vmatprep.subr.bf16.mxu1 %v6257_v34  ;;  %v6016_v47 = vcombine.low %v568_v35, %v576_v36  ;;  %v689_v34 = vld [vmem:[%s7396_s20 + $0x9c8] sm:$0xff]  ;;  %v5858_v35 = vcombine.low %v409_v25, %v417_v54  ;;  %v6114_v36 = vcombine.low %v665_v26, %v673_v27 }
  0xda   : > { %v832_v38 = vld [vmem:[%s7396_s20 + $0xe40] sm:$0xff]  ;;  %3526 = vmatpush1.bf16.msra.mxu1 %v6256_v40  ;;  %v441_v39 = vld [vmem:[%s7396_s20 + $0x208] sm:$0xff] }
  0xdb   : > { %v6273_v42 = vcombine.high %v824_v37, %v832_v38  ;;  %v584_v43 = vld [vmem:[%s7396_s20 + $0x680] sm:$0xff]  ;;  %3486 = vmatprep.subr.bf16.mxu0 %v6017_v41  ;;  %v6272_v48 = vcombine.low %v824_v37, %v832_v38  ;;  %v5875_v37 = vcombine.high %v425_v31, %v433_v32  ;;  %v6131_v38 = vcombine.high %v681_v33, %v689_v34  ;;  %v449_v40 = vld [vmem:[%s7396_s20 + $0x248] sm:$0xff] }
  0xdc   : > { %v592_v44 = vld [vmem:[%s7396_s20 + $0x6c0] sm:$0xff]  ;;  %3487 = vmatpush1.bf16.msra.mxu0 %v6016_v47  ;;  %v697_v41 = vld [vmem:[%s7396_s20 + $0xa08] sm:$0xff] }
  0xdd   : > { %v840_v45 = vld [vmem:[%s7396_s20 + $0xe80] sm:$0xff]  ;;  %v6033_v49 = vcombine.high %v584_v43, %v592_v44  ;;  %3527 = vmatprep.subr.bf16.mxu1 %v6273_v42  ;;  %v6032_v57 = vcombine.low %v584_v43, %v592_v44  ;;  %v705_v42 = vld [vmem:[%s7396_s20 + $0xa48] sm:$0xff]  ;;  %v5874_v43 = vcombine.low %v425_v31, %v433_v32  ;;  %v6130_v44 = vcombine.low %v681_v33, %v689_v34 }
  0xde   : > { %v848_v46 = vld [vmem:[%s7396_s20 + $0xec0] sm:$0xff]  ;;  %3528 = vmatpush1.bf16.msra.mxu1 %v6272_v48  ;;  %v457_v47 = vld [vmem:[%s7396_s20 + $0x288] sm:$0xff] }
  0xdf   : > { %v6289_v50 = vcombine.high %v840_v45, %v848_v46  ;;  %v600_v51 = vld [vmem:[%s7396_s20 + $0x700] sm:$0xff]  ;;  %3488 = vmatprep.subr.bf16.mxu0 %v6033_v49  ;;  %v6288_v58 = vcombine.low %v840_v45, %v848_v46  ;;  %v5891_v45 = vcombine.high %v441_v39, %v449_v40  ;;  %v6147_v46 = vcombine.high %v697_v41, %v705_v42  ;;  %v465_v48 = vld [vmem:[%s7396_s20 + $0x2c8] sm:$0xff] }
  0xe0   : > { %v608_v52 = vld [vmem:[%s7396_s20 + $0x740] sm:$0xff]  ;;  %3489 = vmatpush1.bf16.msra.mxu0 %v6032_v57  ;;  %v713_v49 = vld [vmem:[%s7396_s20 + $0xa88] sm:$0xff] }
  0xe1   : > { %v856_v53 = vld [vmem:[%s7396_s20 + $0xf00] sm:$0xff]  ;;  %v6049_v61 = vcombine.high %v600_v51, %v608_v52  ;;  %3529 = vmatprep.subr.bf16.mxu1 %v6289_v50  ;;  %v6048_v3 = vcombine.low %v600_v51, %v608_v52  ;;  %v721_v50 = vld [vmem:[%s7396_s20 + $0xac8] sm:$0xff]  ;;  %v5890_v51 = vcombine.low %v441_v39, %v449_v40  ;;  %v6146_v52 = vcombine.low %v697_v41, %v705_v42 }
  0xe2   : > { %v864_v56 = vld [vmem:[%s7396_s20 + $0xf40] sm:$0xff]  ;;  %3530 = vmatpush1.bf16.msra.mxu1 %v6288_v58  ;;  %v473_v57 = vld [vmem:[%s7396_s20 + $0x308] sm:$0xff] }
  0xe3   : > { %v6305_v62 = vcombine.high %v856_v53, %v864_v56  ;;  %v616_v63 = vld [vmem:[%s7396_s20 + $0x780] sm:$0xff]  ;;  %3490 = vmatprep.subr.bf16.mxu0 %v6049_v61  ;;  %v6304_v4 = vcombine.low %v856_v53, %v864_v56  ;;  %v5907_v53 = vcombine.high %v457_v47, %v465_v48  ;;  %v6163_v56 = vcombine.high %v713_v49, %v721_v50  ;;  %v481_v58 = vld [vmem:[%s7396_s20 + $0x348] sm:$0xff] }
  0xe4   : > { %v624_v0 = vld [vmem:[%s7396_s20 + $0x7c0] sm:$0xff]  ;;  %3491 = vmatpush1.bf16.msra.mxu0 %v6048_v3  ;;  %v729_v61 = vld [vmem:[%s7396_s20 + $0xb08] sm:$0xff]  ;;  %v5922_v7 = vcombine.low %v473_v57, %v481_v58 }
  0xe5   : > { %v872_v1 = vld [vmem:[%s7396_s20 + $0xf80] sm:$0xff]  ;;  %v6065_v5 = vcombine.high %v616_v63, %v624_v0  ;;  %3531 = vmatprep.subr.bf16.mxu1 %v6305_v62  ;;  %v6064_v11 = vcombine.low %v616_v63, %v624_v0  ;;  %v737_v62 = vld [vmem:[%s7396_s20 + $0xb48] sm:$0xff]  ;;  %v5906_v63 = vcombine.low %v457_v47, %v465_v48  ;;  %v6162_v0 = vcombine.low %v713_v49, %v721_v50 }
  0xe6   : > { %v880_v2 = vld [vmem:[%s7396_s20 + $0xfc0] sm:$0xff]  ;;  %3532 = vmatpush1.bf16.msra.mxu1 %v6304_v4  ;;  %v489_v3 = vld [vmem:[%s7396_s20 + $0x388] sm:$0xff]  ;;  %v6178_v8 = vcombine.low %v729_v61, %v737_v62 }
  0xe7   : > { %v6321_v6 = vcombine.high %v872_v1, %v880_v2  ;;  %3492 = vmatprep.subr.bf16.mxu0 %v6065_v5  ;;  %v6320_v12 = vcombine.low %v872_v1, %v880_v2  ;;  %v5923_v1 = vcombine.high %v473_v57, %v481_v58  ;;  %v6179_v2 = vcombine.high %v729_v61, %v737_v62  ;;  %v497_v4 = vld [vmem:[%s7396_s20 + $0x3c8] sm:$0xff] }
  0xe8   : > { %3493 = vmatpush1.bf16.msra.mxu0 %v6064_v11  ;;  %v745_v5 = vld [vmem:[%s7396_s20 + $0xb88] sm:$0xff]  ;;  %v5939_v9 = vcombine.high %v489_v3, %v497_v4  ;;  %v5938_v15 = vcombine.low %v489_v3, %v497_v4 }
  0xe9   : > { %3533 = vmatprep.subr.bf16.mxu1 %v6321_v6  ;;  %3544 = vmatprep.subr.bf16.mxu0 %v5827_v13  ;;  %v753_v6 = vld [vmem:[%s7396_s20 + $0xbc8] sm:$0xff] }
  0xea   : > { %3534 = vmatpush1.bf16.msra.mxu1 %v6320_v12  ;;  %v6195_v10 = vcombine.high %v745_v5, %v753_v6  ;;  %v505_v11 = vld [vmem:[%s7396_s20 + $0x408] sm:$0xff]  ;;  %v6194_v16 = vcombine.low %v745_v5, %v753_v6 }
  0xeb   : > { %3585 = vmatprep.subr.bf16.mxu1 %v6083_v14  ;;  %3495 = vmatmul.mubr.bf16.vlgmr.msra.gmra.mrb[0].mxu0 %v7500_v17  ;;  %v513_v12 = vld [vmem:[%s7396_s20 + $0x448] sm:$0xff] }
  0xec   : > { %3545 = vmatpush1.bf16.msra.mxu0 %v5826_v21  ;;  %3576 = vmatprep.mubr.bf16.mxu0 %v7450_v59  ;;  %v761_v13 = vld [vmem:[%s7396_s20 + $0xc08] sm:$0xff]  ;;  %v5955_v18 = vcombine.high %v505_v11, %v513_v12  ;;  %v5954_v25 = vcombine.low %v505_v11, %v513_v12 }
  0xed   : > { %3536 = vmatmul.mubr.bf16.vlgmr.msra.gmra.mrb[0].mxu1 %v7506_v20  ;;  %3546 = vmatprep.subr.bf16.mxu0 %v5843_v23  ;;  %v769_v14 = vld [vmem:[%s7396_s20 + $0xc48] sm:$0xff] }
  0xee   : > { %3586 = vmatpush1.bf16.msra.mxu1 %v6082_v22  ;;  %3617 = vmatprep.mubr.bf16.mxu1 %v7454_v60  ;;  %v6211_v19 = vcombine.high %v761_v13, %v769_v14  ;;  %v521_v21 = vld [vmem:[%s7396_s20 + $0x488] sm:$0xff]  ;;  %v6210_v54 = vcombine.low %v761_v13, %v769_v14 }
  0xef   : > { %3587 = vmatprep.subr.bf16.mxu1 %v6099_v24  ;;  %v529_v22 = vld [vmem:[%s7396_s20 + $0x4c8] sm:$0xff] }
  0xf0   : > { %3547 = vmatpush1.bf16.msra.mxu0 %v5842_v55  ;;  %v777_v23 = vld [vmem:[%s7396_s20 + $0xc88] sm:$0xff]  ;;  %v5971_v26 = vcombine.high %v521_v21, %v529_v22  ;;  %v5970_v31 = vcombine.low %v521_v21, %v529_v22 }
  0xf1   : > { %3548 = vmatprep.subr.bf16.mxu0 %v5859_v29  ;;  %v785_v24 = vld [vmem:[%s7396_s20 + $0xcc8] sm:$0xff] }
  0xf2   : > { %3588 = vmatpush1.bf16.msra.mxu1 %v6098_v28  ;;  %v6227_v27 = vcombine.high %v777_v23, %v785_v24  ;;  %v537_v55 = vld [vmem:[%s7396_s20 + $0x508] sm:$0xff]  ;;  %v6226_v32 = vcombine.low %v777_v23, %v785_v24 }
  0xf3   : > { %3589 = vmatprep.subr.bf16.mxu1 %v6115_v30  ;;  %v545_v28 = vld [vmem:[%s7396_s20 + $0x548] sm:$0xff] }
  0xf4   : > { %3549 = vmatpush1.bf16.msra.mxu0 %v5858_v35  ;;  %v793_v29 = vld [vmem:[%s7396_s20 + $0xd08] sm:$0xff]  ;;  %v5987_v33 = vcombine.high %v537_v55, %v545_v28  ;;  %v5986_v39 = vcombine.low %v537_v55, %v545_v28 }
  0xf5   : > { %3550 = vmatprep.subr.bf16.mxu0 %v5875_v37  ;;  %v801_v30 = vld [vmem:[%s7396_s20 + $0xd48] sm:$0xff] }
  0xf6   : > { %3590 = vmatpush1.bf16.msra.mxu1 %v6114_v36  ;;  %v6243_v34 = vcombine.high %v793_v29, %v801_v30  ;;  %v553_v35 = vld [vmem:[%s7396_s20 + $0x588] sm:$0xff]  ;;  %v6242_v40 = vcombine.low %v793_v29, %v801_v30 }
  0xf7   : > { %3591 = vmatprep.subr.bf16.mxu1 %v6131_v38  ;;  %v561_v36 = vld [vmem:[%s7396_s20 + $0x5c8] sm:$0xff] }
  0xf8   : > { %3551 = vmatpush1.bf16.msra.mxu0 %v5874_v43  ;;  %v809_v37 = vld [vmem:[%s7396_s20 + $0xd88] sm:$0xff]  ;;  %v6003_v41 = vcombine.high %v553_v35, %v561_v36  ;;  %v6002_v47 = vcombine.low %v553_v35, %v561_v36 }
  0xf9   : > { %3552 = vmatprep.subr.bf16.mxu0 %v5891_v45  ;;  %v817_v38 = vld [vmem:[%s7396_s20 + $0xdc8] sm:$0xff] }
  0xfa   : > { %3592 = vmatpush1.bf16.msra.mxu1 %v6130_v44  ;;  %v6259_v42 = vcombine.high %v809_v37, %v817_v38  ;;  %v569_v43 = vld [vmem:[%s7396_s20 + $0x608] sm:$0xff]  ;;  %v6258_v48 = vcombine.low %v809_v37, %v817_v38 }
  0xfb   : > { %3593 = vmatprep.subr.bf16.mxu1 %v6147_v46  ;;  %v577_v44 = vld [vmem:[%s7396_s20 + $0x648] sm:$0xff] }
  0xfc   : > { %3553 = vmatpush1.bf16.msra.mxu0 %v5890_v51  ;;  %v825_v45 = vld [vmem:[%s7396_s20 + $0xe08] sm:$0xff]  ;;  %v6019_v49 = vcombine.high %v569_v43, %v577_v44  ;;  %v6018_v57 = vcombine.low %v569_v43, %v577_v44 }
  0xfd   : > { %3554 = vmatprep.subr.bf16.mxu0 %v5907_v53  ;;  %v833_v46 = vld [vmem:[%s7396_s20 + $0xe48] sm:$0xff] }
  0xfe   : > { %3594 = vmatpush1.bf16.msra.mxu1 %v6146_v52  ;;  %v6275_v50 = vcombine.high %v825_v45, %v833_v46  ;;  %v585_v51 = vld [vmem:[%s7396_s20 + $0x688] sm:$0xff]  ;;  %v6274_v58 = vcombine.low %v825_v45, %v833_v46 }
  0xff   : > { %3595 = vmatprep.subr.bf16.mxu1 %v6163_v56  ;;  %v593_v52 = vld [vmem:[%s7396_s20 + $0x6c8] sm:$0xff] }
 0x100   : > { %3555 = vmatpush1.bf16.msra.mxu0 %v5906_v63  ;;  %v841_v53 = vld [vmem:[%s7396_s20 + $0xe88] sm:$0xff]  ;;  %v6035_v61 = vcombine.high %v585_v51, %v593_v52  ;;  %v6034_v3 = vcombine.low %v585_v51, %v593_v52 }
 0x101   : > { %3556 = vmatprep.subr.bf16.mxu0 %v5923_v1  ;;  %v849_v56 = vld [vmem:[%s7396_s20 + $0xec8] sm:$0xff] }
 0x102   : > { %3596 = vmatpush1.bf16.msra.mxu1 %v6162_v0  ;;  %v6291_v62 = vcombine.high %v841_v53, %v849_v56  ;;  %v601_v63 = vld [vmem:[%s7396_s20 + $0x708] sm:$0xff]  ;;  %v6290_v4 = vcombine.low %v841_v53, %v849_v56 }
 0x103   : > { %3597 = vmatprep.subr.bf16.mxu1 %v6179_v2  ;;  %v609_v0 = vld [vmem:[%s7396_s20 + $0x748] sm:$0xff] }
 0x104   : > { %3557 = vmatpush1.bf16.msra.mxu0 %v5922_v7  ;;  %v857_v1 = vld [vmem:[%s7396_s20 + $0xf08] sm:$0xff]  ;;  %v6051_v5 = vcombine.high %v601_v63, %v609_v0  ;;  %v6050_v11 = vcombine.low %v601_v63, %v609_v0 }
 0x105   : > { %3558 = vmatprep.subr.bf16.mxu0 %v5939_v9  ;;  %v865_v2 = vld [vmem:[%s7396_s20 + $0xf48] sm:$0xff] }
 0x106   : > { %3598 = vmatpush1.bf16.msra.mxu1 %v6178_v8  ;;  %v6307_v6 = vcombine.high %v857_v1, %v865_v2  ;;  %v617_v7 = vld [vmem:[%s7396_s20 + $0x788] sm:$0xff]  ;;  %v6306_v12 = vcombine.low %v857_v1, %v865_v2 }
 0x107   : > { %3599 = vmatprep.subr.bf16.mxu1 %v6195_v10  ;;  %v625_v8 = vld [vmem:[%s7396_s20 + $0x7c8] sm:$0xff] }
 0x108   : > { %3559 = vmatpush1.bf16.msra.mxu0 %v5938_v15  ;;  %v873_v9 = vld [vmem:[%s7396_s20 + $0xf88] sm:$0xff]  ;;  %v6067_v13 = vcombine.high %v617_v7, %v625_v8  ;;  %v378_v15 = vld [vmem:[%s7396_s20 + $0x10] sm:$0xff]  ;;  %v6066_v21 = vcombine.low %v617_v7, %v625_v8 }
 0x109   : > { %3560 = vmatprep.subr.bf16.mxu0 %v5955_v18  ;;  %v881_v10 = vld [vmem:[%s7396_s20 + $0xfc8] sm:$0xff]  ;;  %v634_v18 = vld [vmem:[%s7396_s20 + $0x810] sm:$0xff] }
 0x10a   : > { %3600 = vmatpush1.bf16.msra.mxu1 %v6194_v16  ;;  %v6323_v14 = vcombine.high %v873_v9, %v881_v10  ;;  %v386_v16 = vld [vmem:[%s7396_s20 + $0x50] sm:$0xff]  ;;  %v6322_v22 = vcombine.low %v873_v9, %v881_v10 }
 0x10b   : > { %3601 = vmatprep.subr.bf16.mxu1 %v6211_v19  ;;  %v642_v19 = vld [vmem:[%s7396_s20 + $0x850] sm:$0xff]  ;;  %v5829_v23 = vcombine.high %v378_v15, %v386_v16  ;;  %v5828_v55 = vcombine.low %v378_v15, %v386_v16 }
 0x10c   : > { %3561 = vmatpush1.bf16.msra.mxu0 %v5954_v25  ;;  %v6085_v24 = vcombine.high %v634_v18, %v642_v19  ;;  %v394_v25 = vld [vmem:[%s7396_s20 + $0x90] sm:$0xff]  ;;  %v6084_v28 = vcombine.low %v634_v18, %v642_v19 }
 0x10d   : > { %3562 = vmatprep.subr.bf16.mxu0 %v5971_v26  ;;  %v650_v26 = vld [vmem:[%s7396_s20 + $0x890] sm:$0xff] }
 0x10e   : > { %3602 = vmatpush1.bf16.msra.mxu1 %v6210_v54  ;;  %v402_v54 = vld [vmem:[%s7396_s20 + $0xd0] sm:$0xff] }
 0x10f   : > { %3603 = vmatprep.subr.bf16.mxu1 %v6227_v27  ;;  %v658_v27 = vld [vmem:[%s7396_s20 + $0x8d0] sm:$0xff]  ;;  %v5845_v29 = vcombine.high %v394_v25, %v402_v54  ;;  %v5844_v35 = vcombine.low %v394_v25, %v402_v54 }
 0x110   : > { %3563 = vmatpush1.bf16.msra.mxu0 %v5970_v31  ;;  %v6101_v30 = vcombine.high %v650_v26, %v658_v27  ;;  %v410_v31 = vld [vmem:[%s7396_s20 + $0x110] sm:$0xff]  ;;  %v6100_v36 = vcombine.low %v650_v26, %v658_v27 }
 0x111   : > { %3564 = vmatprep.subr.bf16.mxu0 %v5987_v33  ;;  %v666_v33 = vld [vmem:[%s7396_s20 + $0x910] sm:$0xff] }
 0x112   : > { %3604 = vmatpush1.bf16.msra.mxu1 %v6226_v32  ;;  %v418_v32 = vld [vmem:[%s7396_s20 + $0x150] sm:$0xff] }
 0x113   : > { %3605 = vmatprep.subr.bf16.mxu1 %v6243_v34  ;;  %v674_v34 = vld [vmem:[%s7396_s20 + $0x950] sm:$0xff]  ;;  %v5861_v37 = vcombine.high %v410_v31, %v418_v32  ;;  %v5860_v43 = vcombine.low %v410_v31, %v418_v32 }
 0x114   : > { %3565 = vmatpush1.bf16.msra.mxu0 %v5986_v39  ;;  %v6117_v38 = vcombine.high %v666_v33, %v674_v34  ;;  %v426_v39 = vld [vmem:[%s7396_s20 + $0x190] sm:$0xff]  ;;  %v6116_v44 = vcombine.low %v666_v33, %v674_v34 }
 0x115   : > { %3566 = vmatprep.subr.bf16.mxu0 %v6003_v41  ;;  %v682_v41 = vld [vmem:[%s7396_s20 + $0x990] sm:$0xff] }
 0x116   : > { %3606 = vmatpush1.bf16.msra.mxu1 %v6242_v40  ;;  %v434_v40 = vld [vmem:[%s7396_s20 + $0x1d0] sm:$0xff] }
 0x117   : > { %3607 = vmatprep.subr.bf16.mxu1 %v6259_v42  ;;  %v690_v42 = vld [vmem:[%s7396_s20 + $0x9d0] sm:$0xff]  ;;  %v5877_v45 = vcombine.high %v426_v39, %v434_v40  ;;  %v5876_v51 = vcombine.low %v426_v39, %v434_v40 }
 0x118   : > { %3567 = vmatpush1.bf16.msra.mxu0 %v6002_v47  ;;  %v6133_v46 = vcombine.high %v682_v41, %v690_v42  ;;  %v442_v47 = vld [vmem:[%s7396_s20 + $0x210] sm:$0xff]  ;;  %v6132_v52 = vcombine.low %v682_v41, %v690_v42 }
 0x119   : > { %3568 = vmatprep.subr.bf16.mxu0 %v6019_v49  ;;  %v698_v49 = vld [vmem:[%s7396_s20 + $0xa10] sm:$0xff] }
 0x11a   : > { %3608 = vmatpush1.bf16.msra.mxu1 %v6258_v48  ;;  %v450_v48 = vld [vmem:[%s7396_s20 + $0x250] sm:$0xff] }
 0x11b   : > { %3609 = vmatprep.subr.bf16.mxu1 %v6275_v50  ;;  %v706_v50 = vld [vmem:[%s7396_s20 + $0xa50] sm:$0xff]  ;;  %v5893_v53 = vcombine.high %v442_v47, %v450_v48  ;;  %v5892_v63 = vcombine.low %v442_v47, %v450_v48 }
 0x11c   : > { %3569 = vmatpush1.bf16.msra.mxu0 %v6018_v57  ;;  %v6149_v56 = vcombine.high %v698_v49, %v706_v50  ;;  %v458_v57 = vld [vmem:[%s7396_s20 + $0x290] sm:$0xff]  ;;  %v6148_v0 = vcombine.low %v698_v49, %v706_v50 }
 0x11d   : > { %3570 = vmatprep.subr.bf16.mxu0 %v6035_v61  ;;  %v714_v61 = vld [vmem:[%s7396_s20 + $0xa90] sm:$0xff] }
 0x11e   : > { %3610 = vmatpush1.bf16.msra.mxu1 %v6274_v58  ;;  %v466_v58 = vld [vmem:[%s7396_s20 + $0x2d0] sm:$0xff] }
 0x11f   : > { %3611 = vmatprep.subr.bf16.mxu1 %v6291_v62  ;;  %v722_v62 = vld [vmem:[%s7396_s20 + $0xad0] sm:$0xff]  ;;  %v5909_v1 = vcombine.high %v458_v57, %v466_v58  ;;  %v5908_v7 = vcombine.low %v458_v57, %v466_v58 }
 0x120   : > { %3571 = vmatpush1.bf16.msra.mxu0 %v6034_v3  ;;  %v6165_v2 = vcombine.high %v714_v61, %v722_v62  ;;  %v474_v3 = vld [vmem:[%s7396_s20 + $0x310] sm:$0xff]  ;;  %v6164_v8 = vcombine.low %v714_v61, %v722_v62 }
 0x121   : > { %3572 = vmatprep.subr.bf16.mxu0 %v6051_v5  ;;  %v730_v5 = vld [vmem:[%s7396_s20 + $0xb10] sm:$0xff] }
 0x122   : > { %3612 = vmatpush1.bf16.msra.mxu1 %v6290_v4  ;;  %v482_v4 = vld [vmem:[%s7396_s20 + $0x350] sm:$0xff] }
 0x123   : > { %3613 = vmatprep.subr.bf16.mxu1 %v6307_v6  ;;  %v738_v6 = vld [vmem:[%s7396_s20 + $0xb50] sm:$0xff]  ;;  %v5925_v9 = vcombine.high %v474_v3, %v482_v4  ;;  %v5924_v15 = vcombine.low %v474_v3, %v482_v4 }
 0x124   : > { %3573 = vmatpush1.bf16.msra.mxu0 %v6050_v11  ;;  %v6181_v10 = vcombine.high %v730_v5, %v738_v6  ;;  %v490_v11 = vld [vmem:[%s7396_s20 + $0x390] sm:$0xff]  ;;  %v6180_v16 = vcombine.low %v730_v5, %v738_v6 }
 0x125   : > { %3574 = vmatprep.subr.bf16.mxu0 %v6067_v13  ;;  %v746_v13 = vld [vmem:[%s7396_s20 + $0xb90] sm:$0xff] }
 0x126   : > { %3614 = vmatpush1.bf16.msra.mxu1 %v6306_v12  ;;  %v498_v12 = vld [vmem:[%s7396_s20 + $0x3d0] sm:$0xff] }
 0x127   : > { %3615 = vmatprep.subr.bf16.mxu1 %v6323_v14  ;;  %v754_v14 = vld [vmem:[%s7396_s20 + $0xbd0] sm:$0xff]  ;;  %v5941_v18 = vcombine.high %v490_v11, %v498_v12  ;;  %v5940_v25 = vcombine.low %v490_v11, %v498_v12 }
 0x128   : > { %3575 = vmatpush1.bf16.msra.mxu0 %v6066_v21  ;;  %v6197_v19 = vcombine.high %v746_v13, %v754_v14  ;;  %v506_v21 = vld [vmem:[%s7396_s20 + $0x410] sm:$0xff]  ;;  %v6196_v54 = vcombine.low %v746_v13, %v754_v14 }
 0x129   : > { %3626 = vmatprep.subr.bf16.mxu0 %v5829_v23  ;;  %v762_v23 = vld [vmem:[%s7396_s20 + $0xc10] sm:$0xff] }
 0x12a   : > { %3616 = vmatpush1.bf16.msra.mxu1 %v6322_v22  ;;  %v514_v22 = vld [vmem:[%s7396_s20 + $0x450] sm:$0xff] }
 0x12b   : > { %3667 = vmatprep.subr.bf16.mxu1 %v6085_v24  ;;  %3577 = vmatmul.mubr.bf16.vlgmr.msra.gmra.mrb[4].mxu0 %v7500_v17  ;;  %v770_v24 = vld [vmem:[%s7396_s20 + $0xc50] sm:$0xff]  ;;  %v5957_v26 = vcombine.high %v506_v21, %v514_v22  ;;  %v5956_v31 = vcombine.low %v506_v21, %v514_v22 }
 0x12c   : > { %3627 = vmatpush1.bf16.msra.mxu0 %v5828_v55  ;;  %3658 = vmatprep.mubr.bf16.mxu0 %v7450_v59  ;;  %v6213_v27 = vcombine.high %v762_v23, %v770_v24  ;;  %v522_v55 = vld [vmem:[%s7396_s20 + $0x490] sm:$0xff]  ;;  %v6212_v32 = vcombine.low %v762_v23, %v770_v24 }
 0x12d   : > { %3618 = vmatmul.mubr.bf16.vlgmr.msra.gmra.mrb[4].mxu1 %v7506_v20  ;;  %3628 = vmatprep.subr.bf16.mxu0 %v5845_v29  ;;  %v778_v29 = vld [vmem:[%s7396_s20 + $0xc90] sm:$0xff] }
 0x12e   : > { %3668 = vmatpush1.bf16.msra.mxu1 %v6084_v28  ;;  %3699 = vmatprep.mubr.bf16.mxu1 %v7454_v60  ;;  %v530_v28 = vld [vmem:[%s7396_s20 + $0x4d0] sm:$0xff] }
 0x12f   : > { %3669 = vmatprep.subr.bf16.mxu1 %v6101_v30  ;;  %v786_v30 = vld [vmem:[%s7396_s20 + $0xcd0] sm:$0xff]  ;;  %v5973_v33 = vcombine.high %v522_v55, %v530_v28  ;;  %v5972_v39 = vcombine.low %v522_v55, %v530_v28 }
 0x130   : > { %3629 = vmatpush1.bf16.msra.mxu0 %v5844_v35  ;;  %v6229_v34 = vcombine.high %v778_v29, %v786_v30  ;;  %v538_v35 = vld [vmem:[%s7396_s20 + $0x510] sm:$0xff]  ;;  %v6228_v40 = vcombine.low %v778_v29, %v786_v30 }
 0x131   : > { %3630 = vmatprep.subr.bf16.mxu0 %v5861_v37  ;;  %v794_v37 = vld [vmem:[%s7396_s20 + $0xd10] sm:$0xff] }
 0x132   : > { %3670 = vmatpush1.bf16.msra.mxu1 %v6100_v36  ;;  %v546_v36 = vld [vmem:[%s7396_s20 + $0x550] sm:$0xff] }
 0x133   : > { %3671 = vmatprep.subr.bf16.mxu1 %v6117_v38  ;;  %v802_v38 = vld [vmem:[%s7396_s20 + $0xd50] sm:$0xff]  ;;  %v5989_v41 = vcombine.high %v538_v35, %v546_v36  ;;  %v5988_v47 = vcombine.low %v538_v35, %v546_v36 }
 0x134   : > { %3631 = vmatpush1.bf16.msra.mxu0 %v5860_v43  ;;  %v6245_v42 = vcombine.high %v794_v37, %v802_v38  ;;  %v554_v43 = vld [vmem:[%s7396_s20 + $0x590] sm:$0xff]  ;;  %v6244_v48 = vcombine.low %v794_v37, %v802_v38 }
 0x135   : > { %3632 = vmatprep.subr.bf16.mxu0 %v5877_v45  ;;  %v810_v45 = vld [vmem:[%s7396_s20 + $0xd90] sm:$0xff] }
 0x136   : > { %3672 = vmatpush1.bf16.msra.mxu1 %v6116_v44  ;;  %v562_v44 = vld [vmem:[%s7396_s20 + $0x5d0] sm:$0xff] }
 0x137   : > { %3673 = vmatprep.subr.bf16.mxu1 %v6133_v46  ;;  %v818_v46 = vld [vmem:[%s7396_s20 + $0xdd0] sm:$0xff]  ;;  %v6005_v49 = vcombine.high %v554_v43, %v562_v44  ;;  %v6004_v57 = vcombine.low %v554_v43, %v562_v44 }
 0x138   : > { %3633 = vmatpush1.bf16.msra.mxu0 %v5876_v51  ;;  %v6261_v50 = vcombine.high %v810_v45, %v818_v46  ;;  %v570_v51 = vld [vmem:[%s7396_s20 + $0x610] sm:$0xff]  ;;  %v6260_v58 = vcombine.low %v810_v45, %v818_v46 }
 0x139   : > { %3634 = vmatprep.subr.bf16.mxu0 %v5893_v53  ;;  %v826_v53 = vld [vmem:[%s7396_s20 + $0xe10] sm:$0xff] }
 0x13a   : > { %3674 = vmatpush1.bf16.msra.mxu1 %v6132_v52  ;;  %v578_v52 = vld [vmem:[%s7396_s20 + $0x650] sm:$0xff] }
 0x13b   : > { %3675 = vmatprep.subr.bf16.mxu1 %v6149_v56  ;;  %v834_v56 = vld [vmem:[%s7396_s20 + $0xe50] sm:$0xff]  ;;  %v6021_v61 = vcombine.high %v570_v51, %v578_v52  ;;  %v6020_v3 = vcombine.low %v570_v51, %v578_v52 }
 0x13c   : > { %3635 = vmatpush1.bf16.msra.mxu0 %v5892_v63  ;;  %v6277_v62 = vcombine.high %v826_v53, %v834_v56  ;;  %v586_v63 = vld [vmem:[%s7396_s20 + $0x690] sm:$0xff]  ;;  %v6276_v4 = vcombine.low %v826_v53, %v834_v56 }
 0x13d   : > { %3636 = vmatprep.subr.bf16.mxu0 %v5909_v1  ;;  %v842_v1 = vld [vmem:[%s7396_s20 + $0xe90] sm:$0xff] }
 0x13e   : > { %3676 = vmatpush1.bf16.msra.mxu1 %v6148_v0  ;;  %v594_v0 = vld [vmem:[%s7396_s20 + $0x6d0] sm:$0xff] }
 0x13f   : > { %3677 = vmatprep.subr.bf16.mxu1 %v6165_v2  ;;  %v850_v2 = vld [vmem:[%s7396_s20 + $0xed0] sm:$0xff]  ;;  %v6037_v5 = vcombine.high %v586_v63, %v594_v0  ;;  %v6036_v11 = vcombine.low %v586_v63, %v594_v0 }
 0x140   : > { %3637 = vmatpush1.bf16.msra.mxu0 %v5908_v7  ;;  %v6293_v6 = vcombine.high %v842_v1, %v850_v2  ;;  %v602_v7 = vld [vmem:[%s7396_s20 + $0x710] sm:$0xff]  ;;  %v6292_v12 = vcombine.low %v842_v1, %v850_v2 }
 0x141   : > { %3638 = vmatprep.subr.bf16.mxu0 %v5925_v9  ;;  %v858_v9 = vld [vmem:[%s7396_s20 + $0xf10] sm:$0xff] }
 0x142   : > { %3678 = vmatpush1.bf16.msra.mxu1 %v6164_v8  ;;  %v610_v8 = vld [vmem:[%s7396_s20 + $0x750] sm:$0xff] }
 0x143   : > { %3679 = vmatprep.subr.bf16.mxu1 %v6181_v10  ;;  %v866_v10 = vld [vmem:[%s7396_s20 + $0xf50] sm:$0xff]  ;;  %v6053_v13 = vcombine.high %v602_v7, %v610_v8  ;;  %v6052_v21 = vcombine.low %v602_v7, %v610_v8 }
 0x144   : > { %3639 = vmatpush1.bf16.msra.mxu0 %v5924_v15  ;;  %v6309_v14 = vcombine.high %v858_v9, %v866_v10  ;;  %v618_v15 = vld [vmem:[%s7396_s20 + $0x790] sm:$0xff]  ;;  %v6308_v22 = vcombine.low %v858_v9, %v866_v10 }
 0x145   : > { %3640 = vmatprep.subr.bf16.mxu0 %v5941_v18  ;;  %v874_v18 = vld [vmem:[%s7396_s20 + $0xf90] sm:$0xff] }
 0x146   : > { %3680 = vmatpush1.bf16.msra.mxu1 %v6180_v16  ;;  %v626_v16 = vld [vmem:[%s7396_s20 + $0x7d0] sm:$0xff] }
 0x147   : > { %3681 = vmatprep.subr.bf16.mxu1 %v6197_v19  ;;  %v882_v19 = vld [vmem:[%s7396_s20 + $0xfd0] sm:$0xff]  ;;  %v6069_v23 = vcombine.high %v618_v15, %v626_v16  ;;  %v6068_v55 = vcombine.low %v618_v15, %v626_v16 }
 0x148   : > { %3641 = vmatpush1.bf16.msra.mxu0 %v5940_v25  ;;  %v6325_v24 = vcombine.high %v874_v18, %v882_v19  ;;  %v379_v25 = vld [vmem:[%s7396_s20 + $0x18] sm:$0xff]  ;;  %v6324_v28 = vcombine.low %v874_v18, %v882_v19 }
 0x149   : > { %3642 = vmatprep.subr.bf16.mxu0 %v5957_v26  ;;  %v635_v26 = vld [vmem:[%s7396_s20 + $0x818] sm:$0xff] }
 0x14a   : > { %3682 = vmatpush1.bf16.msra.mxu1 %v6196_v54  ;;  %v387_v54 = vld [vmem:[%s7396_s20 + $0x58] sm:$0xff] }
 0x14b   : > { %3683 = vmatprep.subr.bf16.mxu1 %v6213_v27  ;;  %v643_v27 = vld [vmem:[%s7396_s20 + $0x858] sm:$0xff]  ;;  %v5831_v29 = vcombine.high %v379_v25, %v387_v54  ;;  %v5830_v35 = vcombine.low %v379_v25, %v387_v54 }
 0x14c   : > { %3643 = vmatpush1.bf16.msra.mxu0 %v5956_v31  ;;  %v6087_v30 = vcombine.high %v635_v26, %v643_v27  ;;  %v395_v31 = vld [vmem:[%s7396_s20 + $0x98] sm:$0xff]  ;;  %v6086_v36 = vcombine.low %v635_v26, %v643_v27 }
 0x14d   : > { %3644 = vmatprep.subr.bf16.mxu0 %v5973_v33  ;;  %v651_v33 = vld [vmem:[%s7396_s20 + $0x898] sm:$0xff] }
 0x14e   : > { %3684 = vmatpush1.bf16.msra.mxu1 %v6212_v32  ;;  %v403_v32 = vld [vmem:[%s7396_s20 + $0xd8] sm:$0xff] }
 0x14f   : > { %3685 = vmatprep.subr.bf16.mxu1 %v6229_v34  ;;  %v659_v34 = vld [vmem:[%s7396_s20 + $0x8d8] sm:$0xff]  ;;  %v5847_v37 = vcombine.high %v395_v31, %v403_v32  ;;  %v5846_v43 = vcombine.low %v395_v31, %v403_v32 }
 0x150   : > { %3645 = vmatpush1.bf16.msra.mxu0 %v5972_v39  ;;  %v6103_v38 = vcombine.high %v651_v33, %v659_v34  ;;  %v411_v39 = vld [vmem:[%s7396_s20 + $0x118] sm:$0xff]  ;;  %v6102_v44 = vcombine.low %v651_v33, %v659_v34 }
 0x151   : > { %3646 = vmatprep.subr.bf16.mxu0 %v5989_v41  ;;  %v667_v41 = vld [vmem:[%s7396_s20 + $0x918] sm:$0xff] }
 0x152   : > { %3686 = vmatpush1.bf16.msra.mxu1 %v6228_v40  ;;  %v419_v40 = vld [vmem:[%s7396_s20 + $0x158] sm:$0xff] }
 0x153   : > { %3687 = vmatprep.subr.bf16.mxu1 %v6245_v42  ;;  %v675_v42 = vld [vmem:[%s7396_s20 + $0x958] sm:$0xff]  ;;  %v5863_v45 = vcombine.high %v411_v39, %v419_v40  ;;  %v5862_v51 = vcombine.low %v411_v39, %v419_v40 }
 0x154   : > { %3647 = vmatpush1.bf16.msra.mxu0 %v5988_v47  ;;  %v6119_v46 = vcombine.high %v667_v41, %v675_v42  ;;  %v427_v47 = vld [vmem:[%s7396_s20 + $0x198] sm:$0xff]  ;;  %v6118_v52 = vcombine.low %v667_v41, %v675_v42 }
 0x155   : > { %3648 = vmatprep.subr.bf16.mxu0 %v6005_v49  ;;  %v683_v49 = vld [vmem:[%s7396_s20 + $0x998] sm:$0xff] }
 0x156   : > { %3688 = vmatpush1.bf16.msra.mxu1 %v6244_v48  ;;  %v435_v48 = vld [vmem:[%s7396_s20 + $0x1d8] sm:$0xff] }
 0x157   : > { %3689 = vmatprep.subr.bf16.mxu1 %v6261_v50  ;;  %v691_v50 = vld [vmem:[%s7396_s20 + $0x9d8] sm:$0xff]  ;;  %v5879_v53 = vcombine.high %v427_v47, %v435_v48  ;;  %v5878_v63 = vcombine.low %v427_v47, %v435_v48 }
 0x158   : > { %3649 = vmatpush1.bf16.msra.mxu0 %v6004_v57  ;;  %v6135_v56 = vcombine.high %v683_v49, %v691_v50  ;;  %v443_v57 = vld [vmem:[%s7396_s20 + $0x218] sm:$0xff]  ;;  %v6134_v0 = vcombine.low %v683_v49, %v691_v50 }
 0x159   : > { %3650 = vmatprep.subr.bf16.mxu0 %v6021_v61  ;;  %v699_v61 = vld [vmem:[%s7396_s20 + $0xa18] sm:$0xff] }
 0x15a   : > { %3690 = vmatpush1.bf16.msra.mxu1 %v6260_v58  ;;  %v451_v58 = vld [vmem:[%s7396_s20 + $0x258] sm:$0xff] }
 0x15b   : > { %3691 = vmatprep.subr.bf16.mxu1 %v6277_v62  ;;  %v707_v62 = vld [vmem:[%s7396_s20 + $0xa58] sm:$0xff]  ;;  %v5895_v1 = vcombine.high %v443_v57, %v451_v58  ;;  %v5894_v7 = vcombine.low %v443_v57, %v451_v58 }
 0x15c   : > { %3651 = vmatpush1.bf16.msra.mxu0 %v6020_v3  ;;  %v6151_v2 = vcombine.high %v699_v61, %v707_v62  ;;  %v459_v3 = vld [vmem:[%s7396_s20 + $0x298] sm:$0xff]  ;;  %v6150_v8 = vcombine.low %v699_v61, %v707_v62 }
 0x15d   : > { %3652 = vmatprep.subr.bf16.mxu0 %v6037_v5  ;;  %v715_v5 = vld [vmem:[%s7396_s20 + $0xa98] sm:$0xff] }
 0x15e   : > { %3692 = vmatpush1.bf16.msra.mxu1 %v6276_v4  ;;  %v467_v4 = vld [vmem:[%s7396_s20 + $0x2d8] sm:$0xff] }
 0x15f   : > { %3693 = vmatprep.subr.bf16.mxu1 %v6293_v6  ;;  %v723_v6 = vld [vmem:[%s7396_s20 + $0xad8] sm:$0xff]  ;;  %v5911_v9 = vcombine.high %v459_v3, %v467_v4  ;;  %v5910_v15 = vcombine.low %v459_v3, %v467_v4 }
 0x160   : > { %3653 = vmatpush1.bf16.msra.mxu0 %v6036_v11  ;;  %v6167_v10 = vcombine.high %v715_v5, %v723_v6  ;;  %v475_v11 = vld [vmem:[%s7396_s20 + $0x318] sm:$0xff]  ;;  %v6166_v16 = vcombine.low %v715_v5, %v723_v6 }
 0x161   : > { %3654 = vmatprep.subr.bf16.mxu0 %v6053_v13  ;;  %v731_v13 = vld [vmem:[%s7396_s20 + $0xb18] sm:$0xff] }
 0x162   : > { %3694 = vmatpush1.bf16.msra.mxu1 %v6292_v12  ;;  %v483_v12 = vld [vmem:[%s7396_s20 + $0x358] sm:$0xff] }
 0x163   : > { %3695 = vmatprep.subr.bf16.mxu1 %v6309_v14  ;;  %v739_v14 = vld [vmem:[%s7396_s20 + $0xb58] sm:$0xff]  ;;  %v5927_v18 = vcombine.high %v475_v11, %v483_v12  ;;  %v5926_v25 = vcombine.low %v475_v11, %v483_v12 }
 0x164   : > { %3655 = vmatpush1.bf16.msra.mxu0 %v6052_v21  ;;  %v6183_v19 = vcombine.high %v731_v13, %v739_v14  ;;  %v491_v21 = vld [vmem:[%s7396_s20 + $0x398] sm:$0xff]  ;;  %v6182_v54 = vcombine.low %v731_v13, %v739_v14 }
 0x165   : > { %3656 = vmatprep.subr.bf16.mxu0 %v6069_v23  ;;  %v747_v23 = vld [vmem:[%s7396_s20 + $0xb98] sm:$0xff] }
 0x166   : > { %3696 = vmatpush1.bf16.msra.mxu1 %v6308_v22  ;;  %v499_v22 = vld [vmem:[%s7396_s20 + $0x3d8] sm:$0xff] }
 0x167   : > { %3697 = vmatprep.subr.bf16.mxu1 %v6325_v24  ;;  %v755_v24 = vld [vmem:[%s7396_s20 + $0xbd8] sm:$0xff]  ;;  %v5943_v26 = vcombine.high %v491_v21, %v499_v22  ;;  %v5942_v31 = vcombine.low %v491_v21, %v499_v22 }
 0x168   : > { %3657 = vmatpush1.bf16.msra.mxu0 %v6068_v55  ;;  %v6199_v27 = vcombine.high %v747_v23, %v755_v24  ;;  %v507_v55 = vld [vmem:[%s7396_s20 + $0x418] sm:$0xff]  ;;  %v6198_v32 = vcombine.low %v747_v23, %v755_v24 }
 0x169   : > { %3708 = vmatprep.subr.bf16.mxu0 %v5831_v29  ;;  %v763_v29 = vld [vmem:[%s7396_s20 + $0xc18] sm:$0xff] }
 0x16a   : > { %3698 = vmatpush1.bf16.msra.mxu1 %v6324_v28  ;;  %v515_v28 = vld [vmem:[%s7396_s20 + $0x458] sm:$0xff] }
 0x16b   : > { %3749 = vmatprep.subr.bf16.mxu1 %v6087_v30  ;;  %3659 = vmatmul.mubr.bf16.vlgmr.msra.gmra.mrb[8].mxu0 %v7500_v17  ;;  %v771_v30 = vld [vmem:[%s7396_s20 + $0xc58] sm:$0xff]  ;;  %v5959_v33 = vcombine.high %v507_v55, %v515_v28  ;;  %v5958_v39 = vcombine.low %v507_v55, %v515_v28 }
 0x16c   : > { %3709 = vmatpush1.bf16.msra.mxu0 %v5830_v35  ;;  %3740 = vmatprep.mubr.bf16.mxu0 %v7450_v59  ;;  %v6215_v34 = vcombine.high %v763_v29, %v771_v30  ;;  %v523_v35 = vld [vmem:[%s7396_s20 + $0x498] sm:$0xff]  ;;  %v6214_v40 = vcombine.low %v763_v29, %v771_v30 }
 0x16d   : > { %3700 = vmatmul.mubr.bf16.vlgmr.msra.gmra.mrb[8].mxu1 %v7506_v20  ;;  %3710 = vmatprep.subr.bf16.mxu0 %v5847_v37  ;;  %v779_v37 = vld [vmem:[%s7396_s20 + $0xc98] sm:$0xff] }
 0x16e   : > { %3750 = vmatpush1.bf16.msra.mxu1 %v6086_v36  ;;  %3781 = vmatprep.mubr.bf16.mxu1 %v7454_v60  ;;  %v531_v36 = vld [vmem:[%s7396_s20 + $0x4d8] sm:$0xff] }
 0x16f   : > { %3751 = vmatprep.subr.bf16.mxu1 %v6103_v38  ;;  %v787_v38 = vld [vmem:[%s7396_s20 + $0xcd8] sm:$0xff]  ;;  %v5975_v41 = vcombine.high %v523_v35, %v531_v36  ;;  %v5974_v47 = vcombine.low %v523_v35, %v531_v36 }
 0x170   : > { %3711 = vmatpush1.bf16.msra.mxu0 %v5846_v43  ;;  %v6231_v42 = vcombine.high %v779_v37, %v787_v38  ;;  %v539_v43 = vld [vmem:[%s7396_s20 + $0x518] sm:$0xff]  ;;  %v6230_v48 = vcombine.low %v779_v37, %v787_v38 }
 0x171   : > { %3712 = vmatprep.subr.bf16.mxu0 %v5863_v45  ;;  %v795_v45 = vld [vmem:[%s7396_s20 + $0xd18] sm:$0xff] }
 0x172   : > { %3752 = vmatpush1.bf16.msra.mxu1 %v6102_v44  ;;  %v547_v44 = vld [vmem:[%s7396_s20 + $0x558] sm:$0xff] }
 0x173   : > { %3753 = vmatprep.subr.bf16.mxu1 %v6119_v46  ;;  %v803_v46 = vld [vmem:[%s7396_s20 + $0xd58] sm:$0xff]  ;;  %v5991_v49 = vcombine.high %v539_v43, %v547_v44  ;;  %v5990_v57 = vcombine.low %v539_v43, %v547_v44 }
 0x174   : > { %3713 = vmatpush1.bf16.msra.mxu0 %v5862_v51  ;;  %v6247_v50 = vcombine.high %v795_v45, %v803_v46  ;;  %v555_v51 = vld [vmem:[%s7396_s20 + $0x598] sm:$0xff]  ;;  %v6246_v58 = vcombine.low %v795_v45, %v803_v46 }
 0x175   : > { %3714 = vmatprep.subr.bf16.mxu0 %v5879_v53  ;;  %v811_v53 = vld [vmem:[%s7396_s20 + $0xd98] sm:$0xff] }
 0x176   : > { %3754 = vmatpush1.bf16.msra.mxu1 %v6118_v52  ;;  %v563_v52 = vld [vmem:[%s7396_s20 + $0x5d8] sm:$0xff] }
 0x177   : > { %3755 = vmatprep.subr.bf16.mxu1 %v6135_v56  ;;  %v819_v56 = vld [vmem:[%s7396_s20 + $0xdd8] sm:$0xff]  ;;  %v6007_v61 = vcombine.high %v555_v51, %v563_v52  ;;  %v6006_v3 = vcombine.low %v555_v51, %v563_v52 }
 0x178   : > { %3715 = vmatpush1.bf16.msra.mxu0 %v5878_v63  ;;  %v6263_v62 = vcombine.high %v811_v53, %v819_v56  ;;  %v571_v63 = vld [vmem:[%s7396_s20 + $0x618] sm:$0xff]  ;;  %v6262_v4 = vcombine.low %v811_v53, %v819_v56 }
 0x179   : > { %3716 = vmatprep.subr.bf16.mxu0 %v5895_v1  ;;  %v827_v1 = vld [vmem:[%s7396_s20 + $0xe18] sm:$0xff] }
 0x17a   : > { %3756 = vmatpush1.bf16.msra.mxu1 %v6134_v0  ;;  %v579_v0 = vld [vmem:[%s7396_s20 + $0x658] sm:$0xff] }
 0x17b   : > { %3757 = vmatprep.subr.bf16.mxu1 %v6151_v2  ;;  %v835_v2 = vld [vmem:[%s7396_s20 + $0xe58] sm:$0xff]  ;;  %v6023_v5 = vcombine.high %v571_v63, %v579_v0  ;;  %v6022_v11 = vcombine.low %v571_v63, %v579_v0 }
 0x17c   : > { %3717 = vmatpush1.bf16.msra.mxu0 %v5894_v7  ;;  %v6279_v6 = vcombine.high %v827_v1, %v835_v2  ;;  %v587_v7 = vld [vmem:[%s7396_s20 + $0x698] sm:$0xff]  ;;  %v6278_v12 = vcombine.low %v827_v1, %v835_v2 }
 0x17d   : > { %3718 = vmatprep.subr.bf16.mxu0 %v5911_v9  ;;  %v843_v9 = vld [vmem:[%s7396_s20 + $0xe98] sm:$0xff] }
 0x17e   : > { %3758 = vmatpush1.bf16.msra.mxu1 %v6150_v8  ;;  %v595_v8 = vld [vmem:[%s7396_s20 + $0x6d8] sm:$0xff] }
 0x17f   : > { %3759 = vmatprep.subr.bf16.mxu1 %v6167_v10  ;;  %v851_v10 = vld [vmem:[%s7396_s20 + $0xed8] sm:$0xff]  ;;  %v6039_v13 = vcombine.high %v587_v7, %v595_v8  ;;  %v6038_v21 = vcombine.low %v587_v7, %v595_v8 }
 0x180   : > { %3719 = vmatpush1.bf16.msra.mxu0 %v5910_v15  ;;  %v6295_v14 = vcombine.high %v843_v9, %v851_v10  ;;  %v603_v15 = vld [vmem:[%s7396_s20 + $0x718] sm:$0xff]  ;;  %v6294_v22 = vcombine.low %v843_v9, %v851_v10 }
 0x181   : > { %3720 = vmatprep.subr.bf16.mxu0 %v5927_v18  ;;  %v859_v18 = vld [vmem:[%s7396_s20 + $0xf18] sm:$0xff] }
 0x182   : > { %3760 = vmatpush1.bf16.msra.mxu1 %v6166_v16  ;;  %v611_v16 = vld [vmem:[%s7396_s20 + $0x758] sm:$0xff] }
 0x183   : > { %3761 = vmatprep.subr.bf16.mxu1 %v6183_v19  ;;  %v867_v19 = vld [vmem:[%s7396_s20 + $0xf58] sm:$0xff]  ;;  %v6055_v23 = vcombine.high %v603_v15, %v611_v16  ;;  %v6054_v55 = vcombine.low %v603_v15, %v611_v16 }
 0x184   : > { %3721 = vmatpush1.bf16.msra.mxu0 %v5926_v25  ;;  %v6311_v24 = vcombine.high %v859_v18, %v867_v19  ;;  %v619_v25 = vld [vmem:[%s7396_s20 + $0x798] sm:$0xff]  ;;  %v6310_v28 = vcombine.low %v859_v18, %v867_v19 }
 0x185   : > { %3722 = vmatprep.subr.bf16.mxu0 %v5943_v26  ;;  %v875_v26 = vld [vmem:[%s7396_s20 + $0xf98] sm:$0xff] }
 0x186   : > { %3762 = vmatpush1.bf16.msra.mxu1 %v6182_v54  ;;  %v627_v54 = vld [vmem:[%s7396_s20 + $0x7d8] sm:$0xff] }
 0x187   : > { %3763 = vmatprep.subr.bf16.mxu1 %v6199_v27  ;;  %v883_v27 = vld [vmem:[%s7396_s20 + $0xfd8] sm:$0xff]  ;;  %v6071_v29 = vcombine.high %v619_v25, %v627_v54  ;;  %v6070_v35 = vcombine.low %v619_v25, %v627_v54 }
 0x188   : > { %3723 = vmatpush1.bf16.msra.mxu0 %v5942_v31  ;;  %v6327_v30 = vcombine.high %v875_v26, %v883_v27  ;;  %v380_v31 = vld [vmem:[%s7396_s20 + $0x20] sm:$0xff]  ;;  %v6326_v36 = vcombine.low %v875_v26, %v883_v27 }
 0x189   : > { %3724 = vmatprep.subr.bf16.mxu0 %v5959_v33  ;;  %v636_v33 = vld [vmem:[%s7396_s20 + $0x820] sm:$0xff] }
 0x18a   : > { %3764 = vmatpush1.bf16.msra.mxu1 %v6198_v32  ;;  %v388_v32 = vld [vmem:[%s7396_s20 + $0x60] sm:$0xff] }
 0x18b   : > { %3765 = vmatprep.subr.bf16.mxu1 %v6215_v34  ;;  %v644_v34 = vld [vmem:[%s7396_s20 + $0x860] sm:$0xff]  ;;  %v5833_v37 = vcombine.high %v380_v31, %v388_v32  ;;  %v5832_v43 = vcombine.low %v380_v31, %v388_v32 }
 0x18c   : > { %3725 = vmatpush1.bf16.msra.mxu0 %v5958_v39  ;;  %v6089_v38 = vcombine.high %v636_v33, %v644_v34  ;;  %v396_v39 = vld [vmem:[%s7396_s20 + $0xa0] sm:$0xff]  ;;  %v6088_v44 = vcombine.low %v636_v33, %v644_v34 }
 0x18d   : > { %3726 = vmatprep.subr.bf16.mxu0 %v5975_v41  ;;  %v652_v41 = vld [vmem:[%s7396_s20 + $0x8a0] sm:$0xff] }
 0x18e   : > { %3766 = vmatpush1.bf16.msra.mxu1 %v6214_v40  ;;  %v404_v40 = vld [vmem:[%s7396_s20 + $0xe0] sm:$0xff] }
 0x18f   : > { %3767 = vmatprep.subr.bf16.mxu1 %v6231_v42  ;;  %v660_v42 = vld [vmem:[%s7396_s20 + $0x8e0] sm:$0xff]  ;;  %v5849_v45 = vcombine.high %v396_v39, %v404_v40  ;;  %v5848_v51 = vcombine.low %v396_v39, %v404_v40 }
 0x190   : > { %3727 = vmatpush1.bf16.msra.mxu0 %v5974_v47  ;;  %v6105_v46 = vcombine.high %v652_v41, %v660_v42  ;;  %v412_v47 = vld [vmem:[%s7396_s20 + $0x120] sm:$0xff]  ;;  %v6104_v52 = vcombine.low %v652_v41, %v660_v42 }
 0x191   : > { %3728 = vmatprep.subr.bf16.mxu0 %v5991_v49  ;;  %v668_v49 = vld [vmem:[%s7396_s20 + $0x920] sm:$0xff] }
 0x192   : > { %3768 = vmatpush1.bf16.msra.mxu1 %v6230_v48  ;;  %v420_v48 = vld [vmem:[%s7396_s20 + $0x160] sm:$0xff] }
 0x193   : > { %3769 = vmatprep.subr.bf16.mxu1 %v6247_v50  ;;  %v676_v50 = vld [vmem:[%s7396_s20 + $0x960] sm:$0xff]  ;;  %v5865_v53 = vcombine.high %v412_v47, %v420_v48  ;;  %v5864_v63 = vcombine.low %v412_v47, %v420_v48 }
 0x194   : > { %3729 = vmatpush1.bf16.msra.mxu0 %v5990_v57  ;;  %v6121_v56 = vcombine.high %v668_v49, %v676_v50  ;;  %v428_v57 = vld [vmem:[%s7396_s20 + $0x1a0] sm:$0xff]  ;;  %v6120_v0 = vcombine.low %v668_v49, %v676_v50 }
 0x195   : > { %3730 = vmatprep.subr.bf16.mxu0 %v6007_v61  ;;  %v684_v61 = vld [vmem:[%s7396_s20 + $0x9a0] sm:$0xff] }
 0x196   : > { %3770 = vmatpush1.bf16.msra.mxu1 %v6246_v58  ;;  %v436_v58 = vld [vmem:[%s7396_s20 + $0x1e0] sm:$0xff] }
 0x197   : > { %3771 = vmatprep.subr.bf16.mxu1 %v6263_v62  ;;  %v692_v62 = vld [vmem:[%s7396_s20 + $0x9e0] sm:$0xff]  ;;  %v5881_v1 = vcombine.high %v428_v57, %v436_v58  ;;  %v5880_v7 = vcombine.low %v428_v57, %v436_v58 }
 0x198   : > { %3731 = vmatpush1.bf16.msra.mxu0 %v6006_v3  ;;  %v6137_v2 = vcombine.high %v684_v61, %v692_v62  ;;  %v444_v3 = vld [vmem:[%s7396_s20 + $0x220] sm:$0xff]  ;;  %v6136_v8 = vcombine.low %v684_v61, %v692_v62 }
 0x199   : > { %3732 = vmatprep.subr.bf16.mxu0 %v6023_v5  ;;  %v700_v5 = vld [vmem:[%s7396_s20 + $0xa20] sm:$0xff] }
 0x19a   : > { %3772 = vmatpush1.bf16.msra.mxu1 %v6262_v4  ;;  %v452_v4 = vld [vmem:[%s7396_s20 + $0x260] sm:$0xff] }
 0x19b   : > { %3773 = vmatprep.subr.bf16.mxu1 %v6279_v6  ;;  %v708_v6 = vld [vmem:[%s7396_s20 + $0xa60] sm:$0xff]  ;;  %v5897_v9 = vcombine.high %v444_v3, %v452_v4  ;;  %v5896_v15 = vcombine.low %v444_v3, %v452_v4 }
 0x19c   : > { %3733 = vmatpush1.bf16.msra.mxu0 %v6022_v11  ;;  %v6153_v10 = vcombine.high %v700_v5, %v708_v6  ;;  %v460_v11 = vld [vmem:[%s7396_s20 + $0x2a0] sm:$0xff]  ;;  %v6152_v16 = vcombine.low %v700_v5, %v708_v6 }
 0x19d   : > { %3734 = vmatprep.subr.bf16.mxu0 %v6039_v13  ;;  %v716_v13 = vld [vmem:[%s7396_s20 + $0xaa0] sm:$0xff] }
 0x19e   : > { %3774 = vmatpush1.bf16.msra.mxu1 %v6278_v12  ;;  %v468_v12 = vld [vmem:[%s7396_s20 + $0x2e0] sm:$0xff] }
 0x19f   : > { %3775 = vmatprep.subr.bf16.mxu1 %v6295_v14  ;;  %v724_v14 = vld [vmem:[%s7396_s20 + $0xae0] sm:$0xff]  ;;  %v5913_v18 = vcombine.high %v460_v11, %v468_v12  ;;  %v5912_v25 = vcombine.low %v460_v11, %v468_v12 }
 0x1a0   : > { %3735 = vmatpush1.bf16.msra.mxu0 %v6038_v21  ;;  %v6169_v19 = vcombine.high %v716_v13, %v724_v14  ;;  %v476_v21 = vld [vmem:[%s7396_s20 + $0x320] sm:$0xff]  ;;  %v6168_v54 = vcombine.low %v716_v13, %v724_v14 }
 0x1a1   : > { %3736 = vmatprep.subr.bf16.mxu0 %v6055_v23  ;;  %v732_v23 = vld [vmem:[%s7396_s20 + $0xb20] sm:$0xff] }
 0x1a2   : > { %3776 = vmatpush1.bf16.msra.mxu1 %v6294_v22  ;;  %v484_v22 = vld [vmem:[%s7396_s20 + $0x360] sm:$0xff] }
 0x1a3   : > { %3777 = vmatprep.subr.bf16.mxu1 %v6311_v24  ;;  %v740_v24 = vld [vmem:[%s7396_s20 + $0xb60] sm:$0xff]  ;;  %v5929_v26 = vcombine.high %v476_v21, %v484_v22  ;;  %v5928_v39 = vcombine.low %v476_v21, %v484_v22 }
 0x1a4   : > { %3737 = vmatpush1.bf16.msra.mxu0 %v6054_v55  ;;  %v6185_v55 = vcombine.high %v732_v23, %v740_v24  ;;  %v748_v33 = vld [vmem:[%s7396_s20 + $0xba0] sm:$0xff] }
 0x1a5   : > { %3738 = vmatprep.subr.bf16.mxu0 %v6071_v29  ;;  %v500_v29 = vld [vmem:[%s7396_s20 + $0x3e0] sm:$0xff] }
 0x1a6   : > { %3778 = vmatpush1.bf16.msra.mxu1 %v6310_v28  ;;  %v492_v28 = vld [vmem:[%s7396_s20 + $0x3a0] sm:$0xff] }
 0x1a7   : > { %3779 = vmatprep.subr.bf16.mxu1 %v6327_v30  ;;  %v358_v30 = vld [vmem:[#allocation2] sm:$0xff] }
 0x1a8   : > { %3739 = vmatpush1.bf16.msra.mxu0 %v6070_v35  ;;  %v756_v34 = vld [vmem:[%s7396_s20 + $0xbe0] sm:$0xff] }
 0x1a9   : > { %3790 = vmatprep.subr.bf16.mxu0 %v5833_v37  ;;  %v6201_v47 = vcombine.high %v748_v33, %v756_v34  ;;  %v508_v48 = vld [vmem:[%s7396_s20 + $0x420] sm:$0xff] }
 0x1aa   : > { %3780 = vmatpush1.bf16.msra.mxu1 %v6326_v36  ;;  %v359_v36 = vld [vmem:[#allocation2 + $0x8] sm:$0xff]  ;;  %v516_v49 = vld [vmem:[%s7396_s20 + $0x460] sm:$0xff] }
 0x1ab   : > { %3831 = vmatprep.subr.bf16.mxu1 %v6089_v38  ;;  %3741 = vmatmul.mubr.bf16.vlgmr.msra.gmra.mrb[12].mxu0 %v7500_v17  ;;  %v5961_v57 = vcombine.high %v508_v48, %v516_v49  ;;  %v524_v61 = vld [vmem:[%s7396_s20 + $0x4a0] sm:$0xff] }
 0x1ac   : > { %3791 = vmatpush1.bf16.msra.mxu0 %v5832_v43  ;;  %3822 = vmatprep.mubr.bf16.mxu0 %v7450_v59  ;;  %v6184_v43 = vcombine.low %v732_v23, %v740_v24  ;;  %v532_v62 = vld [vmem:[%s7396_s20 + $0x4e0] sm:$0xff] }
 0x1ad   : > { %3782 = vmatmul.mubr.bf16.vlgmr.msra.gmra.mrb[12].mxu1 %v7506_v20  ;;  %3792 = vmatprep.subr.bf16.mxu0 %v5849_v45  ;;  %v5977_v3 = vcombine.high %v524_v61, %v532_v62  ;;  %v540_v5 = vld [vmem:[%s7396_s20 + $0x520] sm:$0xff] }
 0x1ae   : > { %3832 = vmatpush1.bf16.msra.mxu1 %v6088_v44  ;;  %3863 = vmatprep.mubr.bf16.mxu1 %v7454_v60  ;;  %v5945_v44 = vcombine.high %v492_v28, %v500_v29  ;;  %v548_v6 = vld [vmem:[%s7396_s20 + $0x560] sm:$0xff] }
 0x1af   : > { %3833 = vmatprep.subr.bf16.mxu1 %v6105_v46  ;;  %v5993_v11 = vcombine.high %v540_v5, %v548_v6  ;;  %v556_v13 = vld [vmem:[%s7396_s20 + $0x5a0] sm:$0xff] }
 0x1b0   : > { %3793 = vmatpush1.bf16.msra.mxu0 %v5848_v51  ;;  %v764_v51 = vld [vmem:[%s7396_s20 + $0xc20] sm:$0xff] }
 0x1b1   : > { %3794 = vmatprep.subr.bf16.mxu0 %v5865_v53  ;;  %v5944_v53 = vcombine.low %v492_v28, %v500_v29  ;;  %v564_v14 = vld [vmem:[%s7396_s20 + $0x5e0] sm:$0xff] }
 0x1b2   : > { %3834 = vmatpush1.bf16.msra.mxu1 %v6104_v52  ;;  %v772_v52 = vld [vmem:[%s7396_s20 + $0xc60] sm:$0xff]  ;;  %v6009_v21 = vcombine.high %v556_v13, %v564_v14 }
 0x1b3   : > { %3835 = vmatprep.subr.bf16.mxu1 %v6121_v56  ;;  %v6200_v56 = vcombine.low %v748_v33, %v756_v34  ;;  %v6217_v58 = vcombine.high %v764_v51, %v772_v52  ;;  %v572_v23 = vld [vmem:[%s7396_s20 + $0x620] sm:$0xff] }
 0x1b4   : > { %3795 = vmatpush1.bf16.msra.mxu0 %v5864_v63  ;;  %v780_v63 = vld [vmem:[%s7396_s20 + $0xca0] sm:$0xff] }
 0x1b5   : > { %3796 = vmatprep.subr.bf16.mxu0 %v5881_v1  ;;  %v5960_v1 = vcombine.low %v508_v48, %v516_v49  ;;  %v580_v24 = vld [vmem:[%s7396_s20 + $0x660] sm:$0xff] }
 0x1b6   : > { %3836 = vmatpush1.bf16.msra.mxu1 %v6120_v0  ;;  %v788_v0 = vld [vmem:[%s7396_s20 + $0xce0] sm:$0xff]  ;;  %v6024_v33 = vcombine.low %v572_v23, %v580_v24 }
 0x1b7   : > { %3837 = vmatprep.subr.bf16.mxu1 %v6137_v2  ;;  %v6216_v2 = vcombine.low %v764_v51, %v772_v52  ;;  %v6233_v4 = vcombine.high %v780_v63, %v788_v0  ;;  %v588_v29 = vld [vmem:[%s7396_s20 + $0x6a0] sm:$0xff] }
 0x1b8   : > { %3797 = vmatpush1.bf16.msra.mxu0 %v5880_v7  ;;  %v796_v7 = vld [vmem:[%s7396_s20 + $0xd20] sm:$0xff] }
 0x1b9   : > { %3798 = vmatprep.subr.bf16.mxu0 %v5897_v9  ;;  %v5976_v9 = vcombine.low %v524_v61, %v532_v62  ;;  %v884_v48 = vld [vmem:[%s7396_s20 + $0xfe0] sm:$0xff] }
 0x1ba   : > { %3838 = vmatpush1.bf16.msra.mxu1 %v6136_v8  ;;  %v804_v8 = vld [vmem:[%s7396_s20 + $0xd60] sm:$0xff] }
 0x1bb   : > { %3839 = vmatprep.subr.bf16.mxu1 %v6153_v10  ;;  %v6232_v10 = vcombine.low %v780_v63, %v788_v0  ;;  %v6249_v12 = vcombine.high %v796_v7, %v804_v8 }
 0x1bc   : > { %3799 = vmatpush1.bf16.msra.mxu0 %v5896_v15  ;;  %v812_v15 = vld [vmem:[%s7396_s20 + $0xda0] sm:$0xff] }
 0x1bd   : > { %3800 = vmatprep.subr.bf16.mxu0 %v5913_v18  ;;  %v5992_v18 = vcombine.low %v540_v5, %v548_v6 }
 0x1be   : > { %3840 = vmatpush1.bf16.msra.mxu1 %v6152_v16  ;;  %v3496_v27 = vpop.f32.mrb[0].mxu0  ;;  %v820_v16 = vld [vmem:[%s7396_s20 + $0xde0] sm:$0xff] }
 0x1bf   : > { %3841 = vmatprep.subr.bf16.mxu1 %v6169_v19  ;;  %v3498_v32 = vpop.f32.mrb[1].mxu0  ;;  %v6248_v19 = vcombine.low %v796_v7, %v804_v8  ;;  %v6265_v22 = vcombine.high %v812_v15, %v820_v16 }
 0x1c0   : > { %v3537_v31 = vpop.f32.mrb[0].mxu1  ;;  %v3500_v38 = vpop.f32.mrb[2].mxu0  ;;  %3801 = vmatpush1.bf16.msra.mxu0 %v5912_v25  ;;  %v828_v25 = vld [vmem:[%s7396_s20 + $0xe20] sm:$0xff] }
 0x1c1   : > { %v3538_v35 = vadd.f32 %v3537_v31, %v3496_v27  ;;  %v3539_v37 = vpop.f32.mrb[1].mxu1  ;;  %v3501_v42 = vpop.f32.mrb[3].mxu0  ;;  %3802 = vmatprep.subr.bf16.mxu0 %v5929_v26  ;;  %v6008_v26 = vcombine.low %v556_v13, %v564_v14  ;;  %v6264_v27 = vcombine.low %v812_v15, %v820_v16  ;;  %v844_v31 = vld [vmem:[%s7396_s20 + $0xea0] sm:$0xff] }
 0x1c2   : > { %v3540_v40 = vadd.f32 %v3539_v37, %v3498_v32  ;;  %v3541_v41 = vpop.f32.mrb[2].mxu1  ;;  %3842 = vmatpush1.bf16.msra.mxu1 %v6168_v54  ;;  %v836_v54 = vld [vmem:[%s7396_s20 + $0xe60] sm:$0xff] }
 0x1c3   : > { %v4118_v45 = vadd.f32 %v3538_v35, %v358_v30  ;;  %v3542_v46 = vpop.f32.mrb[3].mxu1  ;;  %3843 = vmatprep.subr.bf16.mxu1 %v6185_v55  ;;  %v6025_v55 = vcombine.high %v572_v23, %v580_v24  ;;  %v6281_v28 = vcombine.high %v828_v25, %v836_v54  ;;  %v596_v30 = vld [vmem:[%s7396_s20 + $0x6e0] sm:$0xff]  ;;  %v6280_v34 = vcombine.low %v828_v25, %v836_v54 }
 0x1c4   : > { %v4119_v50 = vadd.f32 %v3540_v40, %v359_v36  ;;  %3803 = vmatpush1.bf16.msra.mxu0 %v5928_v39  ;;  %v852_v32 = vld [vmem:[%s7396_s20 + $0xee0] sm:$0xff]  ;;  %v6041_v35 = vcombine.high %v588_v29, %v596_v30  ;;  %v6040_v41 = vcombine.low %v588_v29, %v596_v30 }
 0x1c5   : > { %4134 = vst [vmem:[#allocation2] sm:$0xff] %v4118_v45  ;;  %3804 = vmatprep.subr.bf16.mxu0 %v5945_v44  ;;  %v6297_v36 = vcombine.high %v844_v31, %v852_v32  ;;  %v604_v37 = vld [vmem:[%s7396_s20 + $0x720] sm:$0xff]  ;;  %v6296_v42 = vcombine.low %v844_v31, %v852_v32 }
 0x1c6   : > { %4135 = vst [vmem:[#allocation2 + $0x8] sm:$0xff] %v4119_v50  ;;  %3844 = vmatpush1.bf16.msra.mxu1 %v6184_v43  ;;  %v612_v38 = vld [vmem:[%s7396_s20 + $0x760] sm:$0xff] }
 0x1c7   : > { %3845 = vmatprep.subr.bf16.mxu1 %v6201_v47  ;;  %v860_v39 = vld [vmem:[%s7396_s20 + $0xf20] sm:$0xff]  ;;  %v6057_v43 = vcombine.high %v604_v37, %v612_v38  ;;  %v6056_v49 = vcombine.low %v604_v37, %v612_v38 }
 0x1c8   : > { %3805 = vmatpush1.bf16.msra.mxu0 %v5944_v53  ;;  %v868_v40 = vld [vmem:[%s7396_s20 + $0xf60] sm:$0xff]  ;;  %v381_v53 = vld [vmem:[%s7396_s20 + $0x28] sm:$0xff] }
 0x1c9   : > { %3806 = vmatprep.subr.bf16.mxu0 %v5961_v57  ;;  %v6313_v44 = vcombine.high %v860_v39, %v868_v40  ;;  %v620_v45 = vld [vmem:[%s7396_s20 + $0x7a0] sm:$0xff]  ;;  %v6312_v50 = vcombine.low %v860_v39, %v868_v40  ;;  %v637_v57 = vld [vmem:[%s7396_s20 + $0x828] sm:$0xff] }
 0x1ca   : > { %3846 = vmatpush1.bf16.msra.mxu1 %v6200_v56  ;;  %v628_v46 = vld [vmem:[%s7396_s20 + $0x7e0] sm:$0xff]  ;;  %v389_v56 = vld [vmem:[%s7396_s20 + $0x68] sm:$0xff] }
 0x1cb   : > { %3847 = vmatprep.subr.bf16.mxu1 %v6217_v58  ;;  %v876_v47 = vld [vmem:[%s7396_s20 + $0xfa0] sm:$0xff]  ;;  %v6073_v51 = vcombine.high %v620_v45, %v628_v46  ;;  %v645_v58 = vld [vmem:[%s7396_s20 + $0x868] sm:$0xff]  ;;  %v6072_v61 = vcombine.low %v620_v45, %v628_v46  ;;  %v5835_v63 = vcombine.high %v381_v53, %v389_v56  ;;  %v5834_v5 = vcombine.low %v381_v53, %v389_v56 }
 0x1cc   : > { %3807 = vmatpush1.bf16.msra.mxu0 %v5960_v1  ;;  %v6329_v52 = vcombine.high %v876_v47, %v884_v48  ;;  %v6328_v62 = vcombine.low %v876_v47, %v884_v48  ;;  %v6091_v0 = vcombine.high %v637_v57, %v645_v58  ;;  %v397_v1 = vld [vmem:[%s7396_s20 + $0xa8] sm:$0xff]  ;;  %v6090_v6 = vcombine.low %v637_v57, %v645_v58 }
 0x1cd   : > { %3808 = vmatprep.subr.bf16.mxu0 %v5977_v3  ;;  %v653_v3 = vld [vmem:[%s7396_s20 + $0x8a8] sm:$0xff] }
 0x1ce   : > { %3848 = vmatpush1.bf16.msra.mxu1 %v6216_v2  ;;  %v405_v2 = vld [vmem:[%s7396_s20 + $0xe8] sm:$0xff] }
 0x1cf   : > { %3849 = vmatprep.subr.bf16.mxu1 %v6233_v4  ;;  %v661_v4 = vld [vmem:[%s7396_s20 + $0x8e8] sm:$0xff]  ;;  %v5851_v7 = vcombine.high %v397_v1, %v405_v2  ;;  %v5850_v13 = vcombine.low %v397_v1, %v405_v2 }
 0x1d0   : > { %3809 = vmatpush1.bf16.msra.mxu0 %v5976_v9  ;;  %v6107_v8 = vcombine.high %v653_v3, %v661_v4  ;;  %v413_v9 = vld [vmem:[%s7396_s20 + $0x128] sm:$0xff]  ;;  %v6106_v14 = vcombine.low %v653_v3, %v661_v4 }
 0x1d1   : > { %3810 = vmatprep.subr.bf16.mxu0 %v5993_v11  ;;  %v669_v11 = vld [vmem:[%s7396_s20 + $0x928] sm:$0xff] }
 0x1d2   : > { %3850 = vmatpush1.bf16.msra.mxu1 %v6232_v10  ;;  %v421_v10 = vld [vmem:[%s7396_s20 + $0x168] sm:$0xff] }
 0x1d3   : > { %3851 = vmatprep.subr.bf16.mxu1 %v6249_v12  ;;  %v677_v12 = vld [vmem:[%s7396_s20 + $0x968] sm:$0xff]  ;;  %v5867_v15 = vcombine.high %v413_v9, %v421_v10  ;;  %v5866_v23 = vcombine.low %v413_v9, %v421_v10 }
 0x1d4   : > { %3811 = vmatpush1.bf16.msra.mxu0 %v5992_v18  ;;  %v6123_v16 = vcombine.high %v669_v11, %v677_v12  ;;  %v429_v18 = vld [vmem:[%s7396_s20 + $0x1a8] sm:$0xff]  ;;  %v6122_v24 = vcombine.low %v669_v11, %v677_v12 }
 0x1d5   : > { %3812 = vmatprep.subr.bf16.mxu0 %v6009_v21  ;;  %v685_v21 = vld [vmem:[%s7396_s20 + $0x9a8] sm:$0xff] }
 0x1d6   : > { %3852 = vmatpush1.bf16.msra.mxu1 %v6248_v19  ;;  %v437_v19 = vld [vmem:[%s7396_s20 + $0x1e8] sm:$0xff] }
 0x1d7   : > { %3853 = vmatprep.subr.bf16.mxu1 %v6265_v22  ;;  %v693_v22 = vld [vmem:[%s7396_s20 + $0x9e8] sm:$0xff]  ;;  %v5883_v25 = vcombine.high %v429_v18, %v437_v19  ;;  %v5882_v29 = vcombine.low %v429_v18, %v437_v19 }
 0x1d8   : > { %3813 = vmatpush1.bf16.msra.mxu0 %v6008_v26  ;;  %v6139_v54 = vcombine.high %v685_v21, %v693_v22  ;;  %v445_v26 = vld [vmem:[%s7396_s20 + $0x228] sm:$0xff]  ;;  %v6138_v30 = vcombine.low %v685_v21, %v693_v22 }
 0x1d9   : > { %3814 = vmatprep.subr.bf16.mxu0 %v6025_v55  ;;  %v701_v55 = vld [vmem:[%s7396_s20 + $0xa28] sm:$0xff] }
 0x1da   : > { %3854 = vmatpush1.bf16.msra.mxu1 %v6264_v27  ;;  %v453_v27 = vld [vmem:[%s7396_s20 + $0x268] sm:$0xff] }
 0x1db   : > { %3855 = vmatprep.subr.bf16.mxu1 %v6281_v28  ;;  %v709_v28 = vld [vmem:[%s7396_s20 + $0xa68] sm:$0xff]  ;;  %v5899_v31 = vcombine.high %v445_v26, %v453_v27  ;;  %v5898_v37 = vcombine.low %v445_v26, %v453_v27 }
 0x1dc   : > { %3815 = vmatpush1.bf16.msra.mxu0 %v6024_v33  ;;  %v6155_v32 = vcombine.high %v701_v55, %v709_v28  ;;  %v461_v33 = vld [vmem:[%s7396_s20 + $0x2a8] sm:$0xff]  ;;  %v6154_v38 = vcombine.low %v701_v55, %v709_v28 }
 0x1dd   : > { %3816 = vmatprep.subr.bf16.mxu0 %v6041_v35  ;;  %v717_v35 = vld [vmem:[%s7396_s20 + $0xaa8] sm:$0xff] }
 0x1de   : > { %3856 = vmatpush1.bf16.msra.mxu1 %v6280_v34  ;;  %v469_v34 = vld [vmem:[%s7396_s20 + $0x2e8] sm:$0xff] }
 0x1df   : > { %3857 = vmatprep.subr.bf16.mxu1 %v6297_v36  ;;  %v725_v36 = vld [vmem:[%s7396_s20 + $0xae8] sm:$0xff]  ;;  %v5915_v39 = vcombine.high %v461_v33, %v469_v34  ;;  %v5914_v45 = vcombine.low %v461_v33, %v469_v34 }
 0x1e0   : > { %3817 = vmatpush1.bf16.msra.mxu0 %v6040_v41  ;;  %v6171_v40 = vcombine.high %v717_v35, %v725_v36  ;;  %v477_v41 = vld [vmem:[%s7396_s20 + $0x328] sm:$0xff]  ;;  %v6170_v46 = vcombine.low %v717_v35, %v725_v36 }
 0x1e1   : > { %3818 = vmatprep.subr.bf16.mxu0 %v6057_v43  ;;  %v733_v43 = vld [vmem:[%s7396_s20 + $0xb28] sm:$0xff] }
 0x1e2   : > { %3858 = vmatpush1.bf16.msra.mxu1 %v6296_v42  ;;  %v485_v42 = vld [vmem:[%s7396_s20 + $0x368] sm:$0xff] }
 0x1e3   : > { %3859 = vmatprep.subr.bf16.mxu1 %v6313_v44  ;;  %v741_v44 = vld [vmem:[%s7396_s20 + $0xb68] sm:$0xff]  ;;  %v5931_v47 = vcombine.high %v477_v41, %v485_v42  ;;  %v5930_v1 = vcombine.low %v477_v41, %v485_v42 }
 0x1e4   : > { %3819 = vmatpush1.bf16.msra.mxu0 %v6056_v49  ;;  %v6187_v49 = vcombine.high %v733_v43, %v741_v44  ;;  %v749_v57 = vld [vmem:[%s7396_s20 + $0xba8] sm:$0xff] }
 0x1e5   : > { %3820 = vmatprep.subr.bf16.mxu0 %v6073_v51  ;;  %v501_v51 = vld [vmem:[%s7396_s20 + $0x3e8] sm:$0xff] }
 0x1e6   : > { %3860 = vmatpush1.bf16.msra.mxu1 %v6312_v50  ;;  %v493_v50 = vld [vmem:[%s7396_s20 + $0x3a8] sm:$0xff] }
 0x1e7   : > { %3861 = vmatprep.subr.bf16.mxu1 %v6329_v52  ;;  %v360_v52 = vld [vmem:[#allocation2 + $0x10] sm:$0xff]  ;;  %v757_v58 = vld [vmem:[%s7396_s20 + $0xbe8] sm:$0xff] }
 0x1e8   : > { %3821 = vmatpush1.bf16.msra.mxu0 %v6072_v61  ;;  %v6203_v9 = vcombine.high %v749_v57, %v757_v58  ;;  %v509_v10 = vld [vmem:[%s7396_s20 + $0x428] sm:$0xff] }
 0x1e9   : > { %3872 = vmatprep.subr.bf16.mxu0 %v5835_v63  ;;  %v517_v11 = vld [vmem:[%s7396_s20 + $0x468] sm:$0xff] }
 0x1ea   : > { %3862 = vmatpush1.bf16.msra.mxu1 %v6328_v62  ;;  %v361_v62 = vld [vmem:[#allocation2 + $0x18] sm:$0xff]  ;;  %v5963_v18 = vcombine.high %v509_v10, %v517_v11  ;;  %v525_v21 = vld [vmem:[%s7396_s20 + $0x4a8] sm:$0xff] }
 0x1eb   : > { %3913 = vmatprep.subr.bf16.mxu1 %v6091_v0  ;;  %3823 = vmatmul.mubr.bf16.vlgmr.msra.gmra.mrb[16].mxu0 %v7500_v17  ;;  %v533_v22 = vld [vmem:[%s7396_s20 + $0x4e8] sm:$0xff] }
 0x1ec   : > { %3873 = vmatpush1.bf16.msra.mxu0 %v5834_v5  ;;  %3904 = vmatprep.mubr.bf16.mxu0 %v7450_v59  ;;  %v6186_v5 = vcombine.low %v733_v43, %v741_v44  ;;  %v5979_v26 = vcombine.high %v525_v21, %v533_v22  ;;  %v541_v55 = vld [vmem:[%s7396_s20 + $0x528] sm:$0xff] }
 0x1ed   : > { %3864 = vmatmul.mubr.bf16.vlgmr.msra.gmra.mrb[16].mxu1 %v7506_v20  ;;  %3874 = vmatprep.subr.bf16.mxu0 %v5851_v7  ;;  %v549_v28 = vld [vmem:[%s7396_s20 + $0x568] sm:$0xff] }
 0x1ee   : > { %3914 = vmatpush1.bf16.msra.mxu1 %v6090_v6  ;;  %3945 = vmatprep.mubr.bf16.mxu1 %v7454_v60  ;;  %v5947_v6 = vcombine.high %v493_v50, %v501_v51  ;;  %v5995_v33 = vcombine.high %v541_v55, %v549_v28  ;;  %v557_v35 = vld [vmem:[%s7396_s20 + $0x5a8] sm:$0xff] }
 0x1ef   : > { %3915 = vmatprep.subr.bf16.mxu1 %v6107_v8  ;;  %v565_v36 = vld [vmem:[%s7396_s20 + $0x5e8] sm:$0xff] }
 0x1f0   : > { %3875 = vmatpush1.bf16.msra.mxu0 %v5850_v13  ;;  %v765_v13 = vld [vmem:[%s7396_s20 + $0xc28] sm:$0xff]  ;;  %v6011_v41 = vcombine.high %v557_v35, %v565_v36 }
 0x1f1   : > { %3876 = vmatprep.subr.bf16.mxu0 %v5867_v15  ;;  %v5946_v15 = vcombine.low %v493_v50, %v501_v51  ;;  %v573_v43 = vld [vmem:[%s7396_s20 + $0x628] sm:$0xff] }
 0x1f2   : > { %3916 = vmatpush1.bf16.msra.mxu1 %v6106_v14  ;;  %v773_v14 = vld [vmem:[%s7396_s20 + $0xc68] sm:$0xff] }
 0x1f3   : > { %3917 = vmatprep.subr.bf16.mxu1 %v6123_v16  ;;  %v6202_v16 = vcombine.low %v749_v57, %v757_v58  ;;  %v6219_v19 = vcombine.high %v765_v13, %v773_v14  ;;  %v581_v44 = vld [vmem:[%s7396_s20 + $0x668] sm:$0xff] }
 0x1f4   : > { %3877 = vmatpush1.bf16.msra.mxu0 %v5866_v23  ;;  %v781_v23 = vld [vmem:[%s7396_s20 + $0xca8] sm:$0xff]  ;;  %v6026_v57 = vcombine.low %v573_v43, %v581_v44 }
 0x1f5   : > { %3878 = vmatprep.subr.bf16.mxu0 %v5883_v25  ;;  %v5962_v25 = vcombine.low %v509_v10, %v517_v11  ;;  %v589_v51 = vld [vmem:[%s7396_s20 + $0x6a8] sm:$0xff] }
 0x1f6   : > { %3918 = vmatpush1.bf16.msra.mxu1 %v6122_v24  ;;  %v789_v24 = vld [vmem:[%s7396_s20 + $0xce8] sm:$0xff] }
 0x1f7   : > { %3919 = vmatprep.subr.bf16.mxu1 %v6139_v54  ;;  %v6218_v54 = vcombine.low %v765_v13, %v773_v14  ;;  %v6235_v27 = vcombine.high %v781_v23, %v789_v24  ;;  %v885_v10 = vld [vmem:[%s7396_s20 + $0xfe8] sm:$0xff] }
 0x1f8   : > { %3879 = vmatpush1.bf16.msra.mxu0 %v5882_v29  ;;  %v797_v29 = vld [vmem:[%s7396_s20 + $0xd28] sm:$0xff] }
 0x1f9   : > { %3880 = vmatprep.subr.bf16.mxu0 %v5899_v31  ;;  %v5978_v31 = vcombine.low %v525_v21, %v533_v22 }
 0x1fa   : > { %3920 = vmatpush1.bf16.msra.mxu1 %v6138_v30  ;;  %v805_v30 = vld [vmem:[%s7396_s20 + $0xd68] sm:$0xff] }
 0x1fb   : > { %3921 = vmatprep.subr.bf16.mxu1 %v6155_v32  ;;  %v6234_v32 = vcombine.low %v781_v23, %v789_v24  ;;  %v6251_v34 = vcombine.high %v797_v29, %v805_v30 }
 0x1fc   : > { %3881 = vmatpush1.bf16.msra.mxu0 %v5898_v37  ;;  %v813_v37 = vld [vmem:[%s7396_s20 + $0xda8] sm:$0xff] }
 0x1fd   : > { %3882 = vmatprep.subr.bf16.mxu0 %v5915_v39  ;;  %v5994_v39 = vcombine.low %v541_v55, %v549_v28 }
 0x1fe   : > { %3922 = vmatpush1.bf16.msra.mxu1 %v6154_v38  ;;  %v3578_v48 = vpop.f32.mrb[4].mxu0  ;;  %v821_v38 = vld [vmem:[%s7396_s20 + $0xde8] sm:$0xff] }
 0x1ff   : > { %3923 = vmatprep.subr.bf16.mxu1 %v6171_v40  ;;  %v3580_v56 = vpop.f32.mrb[5].mxu0  ;;  %v6250_v40 = vcombine.low %v797_v29, %v805_v30  ;;  %v6267_v42 = vcombine.high %v813_v37, %v821_v38 }
 0x200   : > { %v3619_v53 = vpop.f32.mrb[4].mxu1  ;;  %v3582_v0 = vpop.f32.mrb[6].mxu0  ;;  %3883 = vmatpush1.bf16.msra.mxu0 %v5914_v45  ;;  %v829_v45 = vld [vmem:[%s7396_s20 + $0xe28] sm:$0xff] }
 0x201   : > { %v3620_v61 = vadd.f32 %v3619_v53, %v3578_v48  ;;  %v3621_v63 = vpop.f32.mrb[5].mxu1  ;;  %v3583_v4 = vpop.f32.mrb[7].mxu0  ;;  %3884 = vmatprep.subr.bf16.mxu0 %v5931_v47  ;;  %v6010_v47 = vcombine.low %v557_v35, %v565_v36  ;;  %v6266_v48 = vcombine.low %v813_v37, %v821_v38  ;;  %v845_v53 = vld [vmem:[%s7396_s20 + $0xea8] sm:$0xff] }
 0x202   : > { %v3622_v2 = vadd.f32 %v3621_v63, %v3580_v56  ;;  %v3623_v3 = vpop.f32.mrb[6].mxu1  ;;  %3924 = vmatpush1.bf16.msra.mxu1 %v6170_v46  ;;  %v837_v46 = vld [vmem:[%s7396_s20 + $0xe68] sm:$0xff] }
 0x203   : > { %v4120_v7 = vadd.f32 %v3620_v61, %v360_v52  ;;  %v3624_v8 = vpop.f32.mrb[7].mxu1  ;;  %3925 = vmatprep.subr.bf16.mxu1 %v6187_v49  ;;  %v6027_v49 = vcombine.high %v573_v43, %v581_v44  ;;  %v6283_v50 = vcombine.high %v829_v45, %v837_v46  ;;  %v597_v52 = vld [vmem:[%s7396_s20 + $0x6e8] sm:$0xff]  ;;  %v6282_v58 = vcombine.low %v829_v45, %v837_v46 }
 0x204   : > { %v4121_v12 = vadd.f32 %v3622_v2, %v361_v62  ;;  %3885 = vmatpush1.bf16.msra.mxu0 %v5930_v1  ;;  %v853_v56 = vld [vmem:[%s7396_s20 + $0xee8] sm:$0xff]  ;;  %v6043_v61 = vcombine.high %v589_v51, %v597_v52  ;;  %v6042_v3 = vcombine.low %v589_v51, %v597_v52 }
 0x205   : > { %4136 = vst [vmem:[#allocation2 + $0x10] sm:$0xff] %v4120_v7  ;;  %3886 = vmatprep.subr.bf16.mxu0 %v5947_v6  ;;  %v6299_v62 = vcombine.high %v845_v53, %v853_v56  ;;  %v605_v63 = vld [vmem:[%s7396_s20 + $0x728] sm:$0xff]  ;;  %v6298_v4 = vcombine.low %v845_v53, %v853_v56 }
 0x206   : > { %4137 = vst [vmem:[#allocation2 + $0x18] sm:$0xff] %v4121_v12  ;;  %3926 = vmatpush1.bf16.msra.mxu1 %v6186_v5  ;;  %v613_v0 = vld [vmem:[%s7396_s20 + $0x768] sm:$0xff] }
 0x207   : > { %3927 = vmatprep.subr.bf16.mxu1 %v6203_v9  ;;  %v861_v1 = vld [vmem:[%s7396_s20 + $0xf28] sm:$0xff]  ;;  %v6059_v5 = vcombine.high %v605_v63, %v613_v0  ;;  %v6058_v11 = vcombine.low %v605_v63, %v613_v0 }
 0x208   : > { %3887 = vmatpush1.bf16.msra.mxu0 %v5946_v15  ;;  %v869_v2 = vld [vmem:[%s7396_s20 + $0xf68] sm:$0xff]  ;;  %v382_v15 = vld [vmem:[%s7396_s20 + $0x30] sm:$0xff] }
 0x209   : > { %3888 = vmatprep.subr.bf16.mxu0 %v5963_v18  ;;  %v6315_v6 = vcombine.high %v861_v1, %v869_v2  ;;  %v621_v7 = vld [vmem:[%s7396_s20 + $0x7a8] sm:$0xff]  ;;  %v6314_v12 = vcombine.low %v861_v1, %v869_v2  ;;  %v638_v18 = vld [vmem:[%s7396_s20 + $0x830] sm:$0xff] }
 0x20a   : > { %3928 = vmatpush1.bf16.msra.mxu1 %v6202_v16  ;;  %v629_v8 = vld [vmem:[%s7396_s20 + $0x7e8] sm:$0xff]  ;;  %v390_v16 = vld [vmem:[%s7396_s20 + $0x70] sm:$0xff] }
 0x20b   : > { %3929 = vmatprep.subr.bf16.mxu1 %v6219_v19  ;;  %v877_v9 = vld [vmem:[%s7396_s20 + $0xfa8] sm:$0xff]  ;;  %v6075_v13 = vcombine.high %v621_v7, %v629_v8  ;;  %v646_v19 = vld [vmem:[%s7396_s20 + $0x870] sm:$0xff]  ;;  %v6074_v21 = vcombine.low %v621_v7, %v629_v8  ;;  %v5837_v23 = vcombine.high %v382_v15, %v390_v16  ;;  %v5836_v55 = vcombine.low %v382_v15, %v390_v16 }
 0x20c   : > { %3889 = vmatpush1.bf16.msra.mxu0 %v5962_v25  ;;  %v6331_v14 = vcombine.high %v877_v9, %v885_v10  ;;  %v6330_v22 = vcombine.low %v877_v9, %v885_v10  ;;  %v6093_v24 = vcombine.high %v638_v18, %v646_v19  ;;  %v398_v25 = vld [vmem:[%s7396_s20 + $0xb0] sm:$0xff]  ;;  %v6092_v28 = vcombine.low %v638_v18, %v646_v19 }
 0x20d   : > { %3890 = vmatprep.subr.bf16.mxu0 %v5979_v26  ;;  %v654_v26 = vld [vmem:[%s7396_s20 + $0x8b0] sm:$0xff] }
 0x20e   : > { %3930 = vmatpush1.bf16.msra.mxu1 %v6218_v54  ;;  %v406_v54 = vld [vmem:[%s7396_s20 + $0xf0] sm:$0xff] }
 0x20f   : > { %3931 = vmatprep.subr.bf16.mxu1 %v6235_v27  ;;  %v662_v27 = vld [vmem:[%s7396_s20 + $0x8f0] sm:$0xff]  ;;  %v5853_v29 = vcombine.high %v398_v25, %v406_v54  ;;  %v5852_v35 = vcombine.low %v398_v25, %v406_v54 }
 0x210   : > { %3891 = vmatpush1.bf16.msra.mxu0 %v5978_v31  ;;  %v6109_v30 = vcombine.high %v654_v26, %v662_v27  ;;  %v414_v31 = vld [vmem:[%s7396_s20 + $0x130] sm:$0xff]  ;;  %v6108_v36 = vcombine.low %v654_v26, %v662_v27 }
 0x211   : > { %3892 = vmatprep.subr.bf16.mxu0 %v5995_v33  ;;  %v670_v33 = vld [vmem:[%s7396_s20 + $0x930] sm:$0xff] }
 0x212   : > { %3932 = vmatpush1.bf16.msra.mxu1 %v6234_v32  ;;  %v422_v32 = vld [vmem:[%s7396_s20 + $0x170] sm:$0xff] }
 0x213   : > { %3933 = vmatprep.subr.bf16.mxu1 %v6251_v34  ;;  %v678_v34 = vld [vmem:[%s7396_s20 + $0x970] sm:$0xff]  ;;  %v5869_v37 = vcombine.high %v414_v31, %v422_v32  ;;  %v5868_v43 = vcombine.low %v414_v31, %v422_v32 }
 0x214   : > { %3893 = vmatpush1.bf16.msra.mxu0 %v5994_v39  ;;  %v6125_v38 = vcombine.high %v670_v33, %v678_v34  ;;  %v430_v39 = vld [vmem:[%s7396_s20 + $0x1b0] sm:$0xff]  ;;  %v6124_v44 = vcombine.low %v670_v33, %v678_v34 }
 0x215   : > { %3894 = vmatprep.subr.bf16.mxu0 %v6011_v41  ;;  %v686_v41 = vld [vmem:[%s7396_s20 + $0x9b0] sm:$0xff] }
 0x216   : > { %3934 = vmatpush1.bf16.msra.mxu1 %v6250_v40  ;;  %v438_v40 = vld [vmem:[%s7396_s20 + $0x1f0] sm:$0xff] }
 0x217   : > { %3935 = vmatprep.subr.bf16.mxu1 %v6267_v42  ;;  %v694_v42 = vld [vmem:[%s7396_s20 + $0x9f0] sm:$0xff]  ;;  %v5885_v45 = vcombine.high %v430_v39, %v438_v40  ;;  %v5884_v51 = vcombine.low %v430_v39, %v438_v40 }
 0x218   : > { %3895 = vmatpush1.bf16.msra.mxu0 %v6010_v47  ;;  %v6141_v46 = vcombine.high %v686_v41, %v694_v42  ;;  %v446_v47 = vld [vmem:[%s7396_s20 + $0x230] sm:$0xff]  ;;  %v6140_v52 = vcombine.low %v686_v41, %v694_v42 }
 0x219   : > { %3896 = vmatprep.subr.bf16.mxu0 %v6027_v49  ;;  %v702_v49 = vld [vmem:[%s7396_s20 + $0xa30] sm:$0xff] }
 0x21a   : > { %3936 = vmatpush1.bf16.msra.mxu1 %v6266_v48  ;;  %v454_v48 = vld [vmem:[%s7396_s20 + $0x270] sm:$0xff] }
 0x21b   : > { %3937 = vmatprep.subr.bf16.mxu1 %v6283_v50  ;;  %v710_v50 = vld [vmem:[%s7396_s20 + $0xa70] sm:$0xff]  ;;  %v5901_v53 = vcombine.high %v446_v47, %v454_v48  ;;  %v5900_v63 = vcombine.low %v446_v47, %v454_v48 }
 0x21c   : > { %3897 = vmatpush1.bf16.msra.mxu0 %v6026_v57  ;;  %v6157_v56 = vcombine.high %v702_v49, %v710_v50  ;;  %v462_v57 = vld [vmem:[%s7396_s20 + $0x2b0] sm:$0xff]  ;;  %v6156_v0 = vcombine.low %v702_v49, %v710_v50 }
 0x21d   : > { %3898 = vmatprep.subr.bf16.mxu0 %v6043_v61  ;;  %v718_v61 = vld [vmem:[%s7396_s20 + $0xab0] sm:$0xff] }
 0x21e   : > { %3938 = vmatpush1.bf16.msra.mxu1 %v6282_v58  ;;  %v470_v58 = vld [vmem:[%s7396_s20 + $0x2f0] sm:$0xff] }
 0x21f   : > { %3939 = vmatprep.subr.bf16.mxu1 %v6299_v62  ;;  %v726_v62 = vld [vmem:[%s7396_s20 + $0xaf0] sm:$0xff]  ;;  %v5917_v1 = vcombine.high %v462_v57, %v470_v58  ;;  %v5916_v7 = vcombine.low %v462_v57, %v470_v58 }
 0x220   : > { %3899 = vmatpush1.bf16.msra.mxu0 %v6042_v3  ;;  %v6173_v2 = vcombine.high %v718_v61, %v726_v62  ;;  %v478_v3 = vld [vmem:[%s7396_s20 + $0x330] sm:$0xff]  ;;  %v6172_v8 = vcombine.low %v718_v61, %v726_v62 }
 0x221   : > { %3900 = vmatprep.subr.bf16.mxu0 %v6059_v5  ;;  %v734_v5 = vld [vmem:[%s7396_s20 + $0xb30] sm:$0xff] }
 0x222   : > { %3940 = vmatpush1.bf16.msra.mxu1 %v6298_v4  ;;  %v486_v4 = vld [vmem:[%s7396_s20 + $0x370] sm:$0xff] }
 0x223   : > { %3941 = vmatprep.subr.bf16.mxu1 %v6315_v6  ;;  %v742_v6 = vld [vmem:[%s7396_s20 + $0xb70] sm:$0xff]  ;;  %v5933_v9 = vcombine.high %v478_v3, %v486_v4  ;;  %v5932_v25 = vcombine.low %v478_v3, %v486_v4 }
 0x224   : > { %3901 = vmatpush1.bf16.msra.mxu0 %v6058_v11  ;;  %v6189_v11 = vcombine.high %v734_v5, %v742_v6  ;;  %v750_v18 = vld [vmem:[%s7396_s20 + $0xbb0] sm:$0xff] }
 0x225   : > { %3902 = vmatprep.subr.bf16.mxu0 %v6075_v13  ;;  %v502_v13 = vld [vmem:[%s7396_s20 + $0x3f0] sm:$0xff] }
 0x226   : > { %3942 = vmatpush1.bf16.msra.mxu1 %v6314_v12  ;;  %v494_v12 = vld [vmem:[%s7396_s20 + $0x3b0] sm:$0xff] }
 0x227   : > { %3943 = vmatprep.subr.bf16.mxu1 %v6331_v14  ;;  %v362_v14 = vld [vmem:[#allocation2 + $0x20] sm:$0xff]  ;;  %v758_v19 = vld [vmem:[%s7396_s20 + $0xbf0] sm:$0xff] }
 0x228   : > { %3903 = vmatpush1.bf16.msra.mxu0 %v6074_v21  ;;  %v6205_v31 = vcombine.high %v750_v18, %v758_v19  ;;  %v510_v32 = vld [vmem:[%s7396_s20 + $0x430] sm:$0xff] }
 0x229   : > { %3954 = vmatprep.subr.bf16.mxu0 %v5837_v23  ;;  %v518_v33 = vld [vmem:[%s7396_s20 + $0x470] sm:$0xff] }
 0x22a   : > { %3944 = vmatpush1.bf16.msra.mxu1 %v6330_v22  ;;  %v363_v22 = vld [vmem:[#allocation2 + $0x28] sm:$0xff]  ;;  %v5965_v39 = vcombine.high %v510_v32, %v518_v33  ;;  %v526_v41 = vld [vmem:[%s7396_s20 + $0x4b0] sm:$0xff] }
 0x22b   : > { %3995 = vmatprep.subr.bf16.mxu1 %v6093_v24  ;;  %3905 = vmatmul.mubr.bf16.vlgmr.msra.gmra.mrb[20].mxu0 %v7500_v17  ;;  %v534_v42 = vld [vmem:[%s7396_s20 + $0x4f0] sm:$0xff] }
 0x22c   : > { %3955 = vmatpush1.bf16.msra.mxu0 %v5836_v55  ;;  %3986 = vmatprep.mubr.bf16.mxu0 %v7450_v59  ;;  %v6188_v55 = vcombine.low %v734_v5, %v742_v6  ;;  %v5981_v47 = vcombine.high %v526_v41, %v534_v42  ;;  %v542_v49 = vld [vmem:[%s7396_s20 + $0x530] sm:$0xff] }
 0x22d   : > { %3946 = vmatmul.mubr.bf16.vlgmr.msra.gmra.mrb[20].mxu1 %v7506_v20  ;;  %3956 = vmatprep.subr.bf16.mxu0 %v5853_v29  ;;  %v550_v50 = vld [vmem:[%s7396_s20 + $0x570] sm:$0xff] }
 0x22e   : > { %3996 = vmatpush1.bf16.msra.mxu1 %v6092_v28  ;;  %4027 = vmatprep.mubr.bf16.mxu1 %v7454_v60  ;;  %v5949_v28 = vcombine.high %v494_v12, %v502_v13  ;;  %v5997_v57 = vcombine.high %v542_v49, %v550_v50  ;;  %v558_v61 = vld [vmem:[%s7396_s20 + $0x5b0] sm:$0xff] }
 0x22f   : > { %3997 = vmatprep.subr.bf16.mxu1 %v6109_v30  ;;  %v566_v62 = vld [vmem:[%s7396_s20 + $0x5f0] sm:$0xff] }
 0x230   : > { %3957 = vmatpush1.bf16.msra.mxu0 %v5852_v35  ;;  %v766_v35 = vld [vmem:[%s7396_s20 + $0xc30] sm:$0xff]  ;;  %v6013_v3 = vcombine.high %v558_v61, %v566_v62 }
 0x231   : > { %3958 = vmatprep.subr.bf16.mxu0 %v5869_v37  ;;  %v5948_v37 = vcombine.low %v494_v12, %v502_v13  ;;  %v574_v5 = vld [vmem:[%s7396_s20 + $0x630] sm:$0xff] }
 0x232   : > { %3998 = vmatpush1.bf16.msra.mxu1 %v6108_v36  ;;  %v774_v36 = vld [vmem:[%s7396_s20 + $0xc70] sm:$0xff] }
 0x233   : > { %3999 = vmatprep.subr.bf16.mxu1 %v6125_v38  ;;  %v6204_v38 = vcombine.low %v750_v18, %v758_v19  ;;  %v6221_v40 = vcombine.high %v766_v35, %v774_v36  ;;  %v582_v6 = vld [vmem:[%s7396_s20 + $0x670] sm:$0xff] }
 0x234   : > { %3959 = vmatpush1.bf16.msra.mxu0 %v5868_v43  ;;  %v782_v43 = vld [vmem:[%s7396_s20 + $0xcb0] sm:$0xff]  ;;  %v6028_v18 = vcombine.low %v574_v5, %v582_v6 }
 0x235   : > { %3960 = vmatprep.subr.bf16.mxu0 %v5885_v45  ;;  %v5964_v45 = vcombine.low %v510_v32, %v518_v33  ;;  %v590_v13 = vld [vmem:[%s7396_s20 + $0x6b0] sm:$0xff] }
 0x236   : > { %4000 = vmatpush1.bf16.msra.mxu1 %v6124_v44  ;;  %v790_v44 = vld [vmem:[%s7396_s20 + $0xcf0] sm:$0xff] }
 0x237   : > { %4001 = vmatprep.subr.bf16.mxu1 %v6141_v46  ;;  %v6220_v46 = vcombine.low %v766_v35, %v774_v36  ;;  %v6237_v48 = vcombine.high %v782_v43, %v790_v44  ;;  %v886_v32 = vld [vmem:[%s7396_s20 + $0xff0] sm:$0xff] }
 0x238   : > { %3961 = vmatpush1.bf16.msra.mxu0 %v5884_v51  ;;  %v798_v51 = vld [vmem:[%s7396_s20 + $0xd30] sm:$0xff] }
 0x239   : > { %3962 = vmatprep.subr.bf16.mxu0 %v5901_v53  ;;  %v5980_v53 = vcombine.low %v526_v41, %v534_v42 }
 0x23a   : > { %4002 = vmatpush1.bf16.msra.mxu1 %v6140_v52  ;;  %v806_v52 = vld [vmem:[%s7396_s20 + $0xd70] sm:$0xff] }
 0x23b   : > { %4003 = vmatprep.subr.bf16.mxu1 %v6157_v56  ;;  %v6236_v56 = vcombine.low %v782_v43, %v790_v44  ;;  %v6253_v58 = vcombine.high %v798_v51, %v806_v52 }
 0x23c   : > { %3963 = vmatpush1.bf16.msra.mxu0 %v5900_v63  ;;  %v814_v63 = vld [vmem:[%s7396_s20 + $0xdb0] sm:$0xff] }
 0x23d   : > { %3964 = vmatprep.subr.bf16.mxu0 %v5917_v1  ;;  %v5996_v1 = vcombine.low %v542_v49, %v550_v50 }
 0x23e   : > { %4004 = vmatpush1.bf16.msra.mxu1 %v6156_v0  ;;  %v3660_v10 = vpop.f32.mrb[8].mxu0  ;;  %v822_v0 = vld [vmem:[%s7396_s20 + $0xdf0] sm:$0xff] }
 0x23f   : > { %4005 = vmatprep.subr.bf16.mxu1 %v6173_v2  ;;  %v3662_v16 = vpop.f32.mrb[9].mxu0  ;;  %v6252_v2 = vcombine.low %v798_v51, %v806_v52  ;;  %v6269_v4 = vcombine.high %v814_v63, %v822_v0 }
 0x240   : > { %v3701_v15 = vpop.f32.mrb[8].mxu1  ;;  %v3664_v24 = vpop.f32.mrb[10].mxu0  ;;  %3965 = vmatpush1.bf16.msra.mxu0 %v5916_v7  ;;  %v830_v7 = vld [vmem:[%s7396_s20 + $0xe30] sm:$0xff] }
 0x241   : > { %v3702_v21 = vadd.f32 %v3701_v15, %v3660_v10  ;;  %v3703_v23 = vpop.f32.mrb[9].mxu1  ;;  %v3665_v27 = vpop.f32.mrb[11].mxu0  ;;  %3966 = vmatprep.subr.bf16.mxu0 %v5933_v9  ;;  %v6012_v9 = vcombine.low %v558_v61, %v566_v62  ;;  %v6268_v10 = vcombine.low %v814_v63, %v822_v0  ;;  %v846_v15 = vld [vmem:[%s7396_s20 + $0xeb0] sm:$0xff] }
 0x242   : > { %v3704_v54 = vadd.f32 %v3703_v23, %v3662_v16  ;;  %v3705_v26 = vpop.f32.mrb[10].mxu1  ;;  %4006 = vmatpush1.bf16.msra.mxu1 %v6172_v8  ;;  %v838_v8 = vld [vmem:[%s7396_s20 + $0xe70] sm:$0xff] }
 0x243   : > { %v4122_v29 = vadd.f32 %v3702_v21, %v362_v14  ;;  %v3706_v30 = vpop.f32.mrb[11].mxu1  ;;  %4007 = vmatprep.subr.bf16.mxu1 %v6189_v11  ;;  %v6029_v11 = vcombine.high %v574_v5, %v582_v6  ;;  %v6285_v12 = vcombine.high %v830_v7, %v838_v8  ;;  %v598_v14 = vld [vmem:[%s7396_s20 + $0x6f0] sm:$0xff]  ;;  %v6284_v19 = vcombine.low %v830_v7, %v838_v8 }
 0x244   : > { %v4123_v34 = vadd.f32 %v3704_v54, %v363_v22  ;;  %3967 = vmatpush1.bf16.msra.mxu0 %v5932_v25  ;;  %v854_v16 = vld [vmem:[%s7396_s20 + $0xef0] sm:$0xff]  ;;  %v6045_v21 = vcombine.high %v590_v13, %v598_v14  ;;  %v6044_v26 = vcombine.low %v590_v13, %v598_v14 }
 0x245   : > { %4138 = vst [vmem:[#allocation2 + $0x20] sm:$0xff] %v4122_v29  ;;  %3968 = vmatprep.subr.bf16.mxu0 %v5949_v28  ;;  %v6301_v22 = vcombine.high %v846_v15, %v854_v16  ;;  %v606_v23 = vld [vmem:[%s7396_s20 + $0x730] sm:$0xff]  ;;  %v6300_v27 = vcombine.low %v846_v15, %v854_v16  ;;  %v463_v15 = vld [vmem:[%s7396_s20 + $0x2b8] sm:$0xff] }
 0x246   : > { %4139 = vst [vmem:[#allocation2 + $0x28] sm:$0xff] %v4123_v34  ;;  %4008 = vmatpush1.bf16.msra.mxu1 %v6188_v55  ;;  %v614_v24 = vld [vmem:[%s7396_s20 + $0x770] sm:$0xff]  ;;  %v471_v16 = vld [vmem:[%s7396_s20 + $0x2f8] sm:$0xff] }
 0x247   : > { %4009 = vmatprep.subr.bf16.mxu1 %v6205_v31  ;;  %v862_v25 = vld [vmem:[%s7396_s20 + $0xf30] sm:$0xff]  ;;  %v6061_v55 = vcombine.high %v606_v23, %v614_v24  ;;  %v6060_v33 = vcombine.low %v606_v23, %v614_v24  ;;  %v5919_v23 = vcombine.high %v463_v15, %v471_v16 }
 0x248   : > { %3969 = vmatpush1.bf16.msra.mxu0 %v5948_v37  ;;  %v870_v54 = vld [vmem:[%s7396_s20 + $0xf70] sm:$0xff]  ;;  %v383_v37 = vld [vmem:[%s7396_s20 + $0x38] sm:$0xff] }
 0x249   : > { %3970 = vmatprep.subr.bf16.mxu0 %v5965_v39  ;;  %v6317_v28 = vcombine.high %v862_v25, %v870_v54  ;;  %v622_v29 = vld [vmem:[%s7396_s20 + $0x7b0] sm:$0xff]  ;;  %v6316_v34 = vcombine.low %v862_v25, %v870_v54  ;;  %v639_v39 = vld [vmem:[%s7396_s20 + $0x838] sm:$0xff] }
 0x24a   : > { %4010 = vmatpush1.bf16.msra.mxu1 %v6204_v38  ;;  %v630_v30 = vld [vmem:[%s7396_s20 + $0x7f0] sm:$0xff]  ;;  %v391_v38 = vld [vmem:[%s7396_s20 + $0x78] sm:$0xff] }
 0x24b   : > { %4011 = vmatprep.subr.bf16.mxu1 %v6221_v40  ;;  %v878_v31 = vld [vmem:[%s7396_s20 + $0xfb0] sm:$0xff]  ;;  %v6077_v35 = vcombine.high %v622_v29, %v630_v30  ;;  %v647_v40 = vld [vmem:[%s7396_s20 + $0x878] sm:$0xff]  ;;  %v6076_v41 = vcombine.low %v622_v29, %v630_v30  ;;  %v5839_v43 = vcombine.high %v383_v37, %v391_v38  ;;  %v5838_v49 = vcombine.low %v383_v37, %v391_v38 }
 0x24c   : > { %3971 = vmatpush1.bf16.msra.mxu0 %v5964_v45  ;;  %v6333_v36 = vcombine.high %v878_v31, %v886_v32  ;;  %v6332_v42 = vcombine.low %v878_v31, %v886_v32  ;;  %v6095_v44 = vcombine.high %v639_v39, %v647_v40  ;;  %v399_v45 = vld [vmem:[%s7396_s20 + $0xb8] sm:$0xff]  ;;  %v6094_v50 = vcombine.low %v639_v39, %v647_v40 }
 0x24d   : > { %3972 = vmatprep.subr.bf16.mxu0 %v5981_v47  ;;  %v655_v47 = vld [vmem:[%s7396_s20 + $0x8b8] sm:$0xff] }
 0x24e   : > { %4012 = vmatpush1.bf16.msra.mxu1 %v6220_v46  ;;  %v407_v46 = vld [vmem:[%s7396_s20 + $0xf8] sm:$0xff] }
 0x24f   : > { %4013 = vmatprep.subr.bf16.mxu1 %v6237_v48  ;;  %v663_v48 = vld [vmem:[%s7396_s20 + $0x8f8] sm:$0xff]  ;;  %v5855_v51 = vcombine.high %v399_v45, %v407_v46  ;;  %v5854_v61 = vcombine.low %v399_v45, %v407_v46 }
 0x250   : > { %3973 = vmatpush1.bf16.msra.mxu0 %v5980_v53  ;;  %v6111_v52 = vcombine.high %v655_v47, %v663_v48  ;;  %v415_v53 = vld [vmem:[%s7396_s20 + $0x138] sm:$0xff]  ;;  %v6110_v62 = vcombine.low %v655_v47, %v663_v48 }
 0x251   : > { %3974 = vmatprep.subr.bf16.mxu0 %v5997_v57  ;;  %v671_v57 = vld [vmem:[%s7396_s20 + $0x938] sm:$0xff] }
 0x252   : > { %4014 = vmatpush1.bf16.msra.mxu1 %v6236_v56  ;;  %v423_v56 = vld [vmem:[%s7396_s20 + $0x178] sm:$0xff] }
 0x253   : > { %4015 = vmatprep.subr.bf16.mxu1 %v6253_v58  ;;  %v679_v58 = vld [vmem:[%s7396_s20 + $0x978] sm:$0xff]  ;;  %v5871_v63 = vcombine.high %v415_v53, %v423_v56  ;;  %v5870_v5 = vcombine.low %v415_v53, %v423_v56 }
 0x254   : > { %3975 = vmatpush1.bf16.msra.mxu0 %v5996_v1  ;;  %v6127_v0 = vcombine.high %v671_v57, %v679_v58  ;;  %v431_v1 = vld [vmem:[%s7396_s20 + $0x1b8] sm:$0xff]  ;;  %v6126_v6 = vcombine.low %v671_v57, %v679_v58 }
 0x255   : > { %3976 = vmatprep.subr.bf16.mxu0 %v6013_v3  ;;  %v687_v3 = vld [vmem:[%s7396_s20 + $0x9b8] sm:$0xff] }
 0x256   : > { %4016 = vmatpush1.bf16.msra.mxu1 %v6252_v2  ;;  %v439_v2 = vld [vmem:[%s7396_s20 + $0x1f8] sm:$0xff] }
 0x257   : > { %4017 = vmatprep.subr.bf16.mxu1 %v6269_v4  ;;  %v695_v4 = vld [vmem:[%s7396_s20 + $0x9f8] sm:$0xff]  ;;  %v5887_v7 = vcombine.high %v431_v1, %v439_v2 }
 0x258   : > { %3977 = vmatpush1.bf16.msra.mxu0 %v6012_v9  ;;  %v6143_v8 = vcombine.high %v687_v3, %v695_v4  ;;  %v447_v9 = vld [vmem:[%s7396_s20 + $0x238] sm:$0xff] }
 0x259   : > { %3978 = vmatprep.subr.bf16.mxu0 %v6029_v11  ;;  %v703_v11 = vld [vmem:[%s7396_s20 + $0xa38] sm:$0xff] }
 0x25a   : > { %4018 = vmatpush1.bf16.msra.mxu1 %v6268_v10  ;;  %v455_v10 = vld [vmem:[%s7396_s20 + $0x278] sm:$0xff] }
 0x25b   : > { %4019 = vmatprep.subr.bf16.mxu1 %v6285_v12  ;;  %v5886_v12 = vcombine.low %v431_v1, %v439_v2  ;;  %v5903_v13 = vcombine.high %v447_v9, %v455_v10  ;;  %v479_v25 = vld [vmem:[%s7396_s20 + $0x338] sm:$0xff] }
 0x25c   : > { %3979 = vmatpush1.bf16.msra.mxu0 %v6028_v18  ;;  %v719_v18 = vld [vmem:[%s7396_s20 + $0xab8] sm:$0xff] }
 0x25d   : > { %3980 = vmatprep.subr.bf16.mxu0 %v6045_v21  ;;  %v5902_v21 = vcombine.low %v447_v9, %v455_v10  ;;  %v487_v54 = vld [vmem:[%s7396_s20 + $0x378] sm:$0xff] }
 0x25e   : > { %4020 = vmatpush1.bf16.msra.mxu1 %v6284_v19  ;;  %v727_v19 = vld [vmem:[%s7396_s20 + $0xaf8] sm:$0xff]  ;;  %v5935_v29 = vcombine.high %v479_v25, %v487_v54 }
 0x25f   : > { %4021 = vmatprep.subr.bf16.mxu1 %v6301_v22  ;;  %v6175_v24 = vcombine.high %v719_v18, %v727_v19  ;;  %v495_v32 = vld [vmem:[%s7396_s20 + $0x3b8] sm:$0xff] }
 0x260   : > { %3981 = vmatpush1.bf16.msra.mxu0 %v6044_v26  ;;  %v735_v26 = vld [vmem:[%s7396_s20 + $0xb38] sm:$0xff] }
 0x261   : > { %3982 = vmatprep.subr.bf16.mxu0 %v6061_v55  ;;  %v5918_v55 = vcombine.low %v463_v15, %v471_v16  ;;  %v751_v37 = vld [vmem:[%s7396_s20 + $0xbb8] sm:$0xff] }
 0x262   : > { %4022 = vmatpush1.bf16.msra.mxu1 %v6300_v27  ;;  %v743_v27 = vld [vmem:[%s7396_s20 + $0xb78] sm:$0xff] }
 0x263   : > { %4023 = vmatprep.subr.bf16.mxu1 %v6317_v28  ;;  %v6174_v28 = vcombine.low %v719_v18, %v727_v19  ;;  %v6191_v31 = vcombine.high %v735_v26, %v743_v27  ;;  %v759_v38 = vld [vmem:[%s7396_s20 + $0xbf8] sm:$0xff]  ;;  %v6190_v47 = vcombine.low %v735_v26, %v743_v27 }
 0x264   : > { %3983 = vmatpush1.bf16.msra.mxu0 %v6060_v33  ;;  %v503_v33 = vld [vmem:[%s7396_s20 + $0x3f8] sm:$0xff] }
 0x265   : > { %3984 = vmatprep.subr.bf16.mxu0 %v6077_v35  ;;  %v365_v40 = vld [vmem:[#allocation2 + $0x38] sm:$0xff]  ;;  %v5951_v48 = vcombine.high %v495_v32, %v503_v33 }
 0x266   : > { %4024 = vmatpush1.bf16.msra.mxu1 %v6316_v34  ;;  %v364_v34 = vld [vmem:[#allocation2 + $0x30] sm:$0xff]  ;;  %v519_v53 = vld [vmem:[%s7396_s20 + $0x478] sm:$0xff] }
 0x267   : > { %4025 = vmatprep.subr.bf16.mxu1 %v6333_v36  ;;  %v767_v57 = vld [vmem:[%s7396_s20 + $0xc38] sm:$0xff] }
 0x268   : > { %3985 = vmatpush1.bf16.msra.mxu0 %v6076_v41  ;;  %v775_v58 = vld [vmem:[%s7396_s20 + $0xc78] sm:$0xff] }
 0x269   : > { %4036 = vmatprep.subr.bf16.mxu0 %v5839_v43  ;;  %v5934_v43 = vcombine.low %v479_v25, %v487_v54  ;;  %v527_v1 = vld [vmem:[%s7396_s20 + $0x4b8] sm:$0xff] }
 0x26a   : > { %4026 = vmatpush1.bf16.msra.mxu1 %v6332_v42  ;;  %v535_v2 = vld [vmem:[%s7396_s20 + $0x4f8] sm:$0xff] }
 0x26b   : > { %4077 = vmatprep.subr.bf16.mxu1 %v6095_v44  ;;  %3987 = vmatmul.mubr.bf16.vlgmr.msra.gmra.mrb[24].mxu0 %v7500_v17  ;;  %v543_v9 = vld [vmem:[%s7396_s20 + $0x538] sm:$0xff] }
 0x26c   : > { %4037 = vmatpush1.bf16.msra.mxu0 %v5838_v49  ;;  %4068 = vmatprep.mubr.bf16.mxu0 %v7450_v59  ;;  %v711_v59 = vld [vmem:[%s7396_s20 + $0xa78] sm:$0xff] }
 0x26d   : > { %4028 = vmatmul.mubr.bf16.vlgmr.msra.gmra.mrb[24].mxu1 %v7506_v20  ;;  %4038 = vmatprep.subr.bf16.mxu0 %v5855_v51  ;;  %v6159_v14 = vcombine.high %v703_v11, %v711_v59  ;;  %v6158_v22 = vcombine.low %v703_v11, %v711_v59  ;;  %v6207_v51 = vcombine.high %v751_v37, %v759_v38  ;;  %v551_v10 = vld [vmem:[%s7396_s20 + $0x578] sm:$0xff] }
 0x26e   : > { %4078 = vmatpush1.bf16.msra.mxu1 %v6094_v50  ;;  %4109 = vmatprep.mubr.bf16.mxu1 %v7454_v60  ;;  %v6142_v60 = vcombine.low %v687_v3, %v695_v4  ;;  %v783_v3 = vld [vmem:[%s7396_s20 + $0xcb8] sm:$0xff] }
 0x26f   : > { %4079 = vmatprep.subr.bf16.mxu1 %v6111_v52  ;;  %v511_v52 = vld [vmem:[%s7396_s20 + $0x438] sm:$0xff] }
 0x270   : > { %4039 = vmatpush1.bf16.msra.mxu0 %v5854_v61  ;;  %v5950_v61 = vcombine.low %v495_v32, %v503_v33  ;;  %v791_v4 = vld [vmem:[%s7396_s20 + $0xcf8] sm:$0xff] }
 0x271   : > { %4040 = vmatprep.subr.bf16.mxu0 %v5871_v63  ;;  %v5967_v63 = vcombine.high %v511_v52, %v519_v53  ;;  %v799_v11 = vld [vmem:[%s7396_s20 + $0xd38] sm:$0xff] }
 0x272   : > { %4080 = vmatpush1.bf16.msra.mxu1 %v6110_v62  ;;  %v6206_v62 = vcombine.low %v751_v37, %v759_v38  ;;  %v807_v59 = vld [vmem:[%s7396_s20 + $0xd78] sm:$0xff] }
 0x273   : > { %4081 = vmatprep.subr.bf16.mxu1 %v6127_v0  ;;  %v6223_v0 = vcombine.high %v767_v57, %v775_v58  ;;  %v559_v15 = vld [vmem:[%s7396_s20 + $0x5b8] sm:$0xff] }
 0x274   : > { %4041 = vmatpush1.bf16.msra.mxu0 %v5870_v5  ;;  %v5966_v5 = vcombine.low %v511_v52, %v519_v53  ;;  %v567_v16 = vld [vmem:[%s7396_s20 + $0x5f8] sm:$0xff] }
 0x275   : > { %4042 = vmatprep.subr.bf16.mxu0 %v5887_v7  ;;  %v5983_v7 = vcombine.high %v527_v1, %v535_v2  ;;  %v815_v18 = vld [vmem:[%s7396_s20 + $0xdb8] sm:$0xff] }
 0x276   : > { %4082 = vmatpush1.bf16.msra.mxu1 %v6126_v6  ;;  %v6222_v6 = vcombine.low %v767_v57, %v775_v58  ;;  %v823_v19 = vld [vmem:[%s7396_s20 + $0xdf8] sm:$0xff] }
 0x277   : > { %4083 = vmatprep.subr.bf16.mxu1 %v6143_v8  ;;  %v6239_v8 = vcombine.high %v783_v3, %v791_v4  ;;  %v575_v25 = vld [vmem:[%s7396_s20 + $0x638] sm:$0xff] }
 0x278   : > { %4043 = vmatpush1.bf16.msra.mxu0 %v5886_v12  ;;  %v5982_v12 = vcombine.low %v527_v1, %v535_v2  ;;  %v583_v54 = vld [vmem:[%s7396_s20 + $0x678] sm:$0xff]  ;;  %v367_v2 = vld [vmem:[#allocation2 + $0x48] sm:$0xff] }
 0x279   : > { %4044 = vmatprep.subr.bf16.mxu0 %v5903_v13  ;;  %v5999_v13 = vcombine.high %v543_v9, %v551_v10  ;;  %v831_v26 = vld [vmem:[%s7396_s20 + $0xe38] sm:$0xff] }
 0x27a   : > { %4084 = vmatpush1.bf16.msra.mxu1 %v6142_v60  ;;  %v6238_v60 = vcombine.low %v783_v3, %v791_v4  ;;  %v839_v27 = vld [vmem:[%s7396_s20 + $0xe78] sm:$0xff] }
 0x27b   : > { %4085 = vmatprep.subr.bf16.mxu1 %v6159_v14  ;;  %v6255_v14 = vcombine.high %v799_v11, %v807_v59  ;;  %v599_v32 = vld [vmem:[%s7396_s20 + $0x6f8] sm:$0xff] }
 0x27c   : > { %4045 = vmatpush1.bf16.msra.mxu0 %v5902_v21  ;;  %v5998_v21 = vcombine.low %v543_v9, %v551_v10  ;;  %v847_v33 = vld [vmem:[%s7396_s20 + $0xeb8] sm:$0xff] }
 0x27d   : > { %4046 = vmatprep.subr.bf16.mxu0 %v5919_v23  ;;  %v6015_v23 = vcombine.high %v559_v15, %v567_v16 }
 0x27e   : > { %4086 = vmatpush1.bf16.msra.mxu1 %v6158_v22  ;;  %v3742_v30 = vpop.f32.mrb[12].mxu0  ;;  %v6254_v22 = vcombine.low %v799_v11, %v807_v59 }
 0x27f   : > { %4087 = vmatprep.subr.bf16.mxu1 %v6175_v24  ;;  %v3744_v36 = vpop.f32.mrb[13].mxu0  ;;  %v6271_v24 = vcombine.high %v815_v18, %v823_v19 }
 0x280   : > { %v3783_v35 = vpop.f32.mrb[12].mxu1  ;;  %v3746_v42 = vpop.f32.mrb[14].mxu0  ;;  %4047 = vmatpush1.bf16.msra.mxu0 %v5918_v55  ;;  %v6014_v55 = vcombine.low %v559_v15, %v567_v16 }
 0x281   : > { %v3784_v39 = vadd.f32 %v3783_v35, %v3742_v30  ;;  %v3785_v41 = vpop.f32.mrb[13].mxu1  ;;  %v3747_v46 = vpop.f32.mrb[15].mxu0  ;;  %4048 = vmatprep.subr.bf16.mxu0 %v5935_v29  ;;  %v6031_v29 = vcombine.high %v575_v25, %v583_v54  ;;  %v6287_v30 = vcombine.high %v831_v26, %v839_v27  ;;  %v6030_v35 = vcombine.low %v575_v25, %v583_v54  ;;  %v871_v42 = vld [vmem:[%s7396_s20 + $0xf78] sm:$0xff] }
 0x282   : > { %v3786_v44 = vadd.f32 %v3785_v41, %v3744_v36  ;;  %v3787_v45 = vpop.f32.mrb[14].mxu1  ;;  %4088 = vmatpush1.bf16.msra.mxu1 %v6174_v28  ;;  %v6270_v28 = vcombine.low %v815_v18, %v823_v19  ;;  %v6286_v36 = vcombine.low %v831_v26, %v839_v27  ;;  %v863_v41 = vld [vmem:[%s7396_s20 + $0xf38] sm:$0xff]  ;;  %v371_v27 = vld [vmem:[#allocation2 + $0x68] sm:$0xff] }
 0x283   : > { %v4124_v49 = vadd.f32 %v3784_v39, %v364_v34  ;;  %v3788_v50 = vpop.f32.mrb[15].mxu1  ;;  %4089 = vmatprep.subr.bf16.mxu1 %v6191_v31  ;;  %v591_v31 = vld [vmem:[%s7396_s20 + $0x6b8] sm:$0xff]  ;;  %v6319_v46 = vcombine.high %v863_v41, %v871_v42  ;;  %v6318_v52 = vcombine.low %v863_v41, %v871_v42 }
 0x284   : > { %v4125_v56 = vadd.f32 %v3786_v44, %v365_v40  ;;  %4049 = vmatpush1.bf16.msra.mxu0 %v5934_v43  ;;  %v855_v34 = vld [vmem:[%s7396_s20 + $0xef8] sm:$0xff]  ;;  %v6047_v37 = vcombine.high %v591_v31, %v599_v32  ;;  %v6046_v43 = vcombine.low %v591_v31, %v599_v32 }
 0x285   : > { %4140 = vst [vmem:[#allocation2 + $0x30] sm:$0xff] %v4124_v49  ;;  %4050 = vmatprep.subr.bf16.mxu0 %v5951_v48  ;;  %v6303_v38 = vcombine.high %v847_v33, %v855_v34  ;;  %v607_v39 = vld [vmem:[%s7396_s20 + $0x738] sm:$0xff]  ;;  %v6302_v44 = vcombine.low %v847_v33, %v855_v34 }
 0x286   : > { %4141 = vst [vmem:[#allocation2 + $0x38] sm:$0xff] %v4125_v56  ;;  %4090 = vmatpush1.bf16.msra.mxu1 %v6190_v47  ;;  %v615_v40 = vld [vmem:[%s7396_s20 + $0x778] sm:$0xff] }
 0x287   : > { %4091 = vmatprep.subr.bf16.mxu1 %v6207_v51  ;;  %v6063_v45 = vcombine.high %v607_v39, %v615_v40  ;;  %v623_v47 = vld [vmem:[%s7396_s20 + $0x7b8] sm:$0xff]  ;;  %v6062_v51 = vcombine.low %v607_v39, %v615_v40 }
 0x288   : > { %4051 = vmatpush1.bf16.msra.mxu0 %v5950_v61  ;;  %v631_v48 = vld [vmem:[%s7396_s20 + $0x7f8] sm:$0xff] }
 0x289   : > { %4052 = vmatprep.subr.bf16.mxu0 %v5967_v63  ;;  %v879_v49 = vld [vmem:[%s7396_s20 + $0xfb8] sm:$0xff]  ;;  %v6079_v53 = vcombine.high %v623_v47, %v631_v48  ;;  %v6078_v57 = vcombine.low %v623_v47, %v631_v48 }
 0x28a   : > { %4092 = vmatpush1.bf16.msra.mxu1 %v6206_v62  ;;  %v887_v50 = vld [vmem:[%s7396_s20 + $0xff8] sm:$0xff]  ;;  %v366_v62 = vld [vmem:[#allocation2 + $0x40] sm:$0xff] }
 0x28b   : > { %4093 = vmatprep.subr.bf16.mxu1 %v6223_v0  ;;  %v6335_v56 = vcombine.high %v879_v49, %v887_v50  ;;  %v6334_v58 = vcombine.low %v879_v49, %v887_v50  ;;  %v373_v40 = vld [vmem:[#allocation2 + $0x78] sm:$0xff]  ;;  %v6748_v49 = vld [vmem:[#allocation9 + $0x40] sm:$0xff] (!%p6336_p12)  }
 0x28c   : > { %4053 = vmatpush1.bf16.msra.mxu0 %v5966_v5  ;;  %v6749_v50 = vld [vmem:[#allocation9 + $0xc0] sm:$0xff] (!%p6336_p12)  }
 0x28d   : > { %4054 = vmatprep.subr.bf16.mxu0 %v5983_v7 }
 0x28e   : > { %4094 = vmatpush1.bf16.msra.mxu1 %v6222_v6 }
 0x28f   : > { %4095 = vmatprep.subr.bf16.mxu1 %v6239_v8 }
 0x290   : > { %4055 = vmatpush1.bf16.msra.mxu0 %v5982_v12 }
 0x291   : > { %4056 = vmatprep.subr.bf16.mxu0 %v5999_v13 }
 0x292   : > { %4096 = vmatpush1.bf16.msra.mxu1 %v6238_v60  ;;  %v369_v60 = vld [vmem:[#allocation2 + $0x58] sm:$0xff] }
 0x293   : > { %4097 = vmatprep.subr.bf16.mxu1 %v6255_v14 }
 0x294   : > { %4057 = vmatpush1.bf16.msra.mxu0 %v5998_v21 }
 0x295   : > { %4058 = vmatprep.subr.bf16.mxu0 %v6015_v23 }
 0x296   : > { %4098 = vmatpush1.bf16.msra.mxu1 %v6254_v22 }
 0x297   : > { %4099 = vmatprep.subr.bf16.mxu1 %v6271_v24  ;;  %v370_v24 = vld [vmem:[#allocation2 + $0x60] sm:$0xff] }
 0x298   : > { %4059 = vmatpush1.bf16.msra.mxu0 %v6014_v55 }
 0x299   : > { %4060 = vmatprep.subr.bf16.mxu0 %v6031_v29 }
 0x29a   : > { %4100 = vmatpush1.bf16.msra.mxu1 %v6270_v28 }
 0x29b   : > { %4101 = vmatprep.subr.bf16.mxu1 %v6287_v30 }
 0x29c   : > { %4061 = vmatpush1.bf16.msra.mxu0 %v6030_v35 }
 0x29d   : > { %4062 = vmatprep.subr.bf16.mxu0 %v6047_v37 }
 0x29e   : > { %4102 = vmatpush1.bf16.msra.mxu1 %v6286_v36  ;;  %v372_v36 = vld [vmem:[#allocation2 + $0x70] sm:$0xff] }
 0x29f   : > { %4103 = vmatprep.subr.bf16.mxu1 %v6303_v38 }
 0x2a0   : > { %4063 = vmatpush1.bf16.msra.mxu0 %v6046_v43 }
 0x2a1   : > { %4064 = vmatprep.subr.bf16.mxu0 %v6063_v45 }
 0x2a2   : > { %4104 = vmatpush1.bf16.msra.mxu1 %v6302_v44 }
 0x2a3   : > { %4105 = vmatprep.subr.bf16.mxu1 %v6319_v46 }
 0x2a4   : > { %4065 = vmatpush1.bf16.msra.mxu0 %v6062_v51  ;;  %v6750_v51 = vld [vmem:[#allocation9] sm:$0xff] (!%p6336_p12)  }
 0x2a5   : > { %4066 = vmatprep.subr.bf16.mxu0 %v6079_v53  ;;  %v6752_v53 = vld [vmem:[#allocation9 + $0x48] sm:$0xff] (!%p6336_p12)  }
 0x2a6   : > { %4106 = vmatpush1.bf16.msra.mxu1 %v6318_v52  ;;  %v6751_v52 = vld [vmem:[#allocation9 + $0x80] sm:$0xff] (!%p6336_p12)  }
 0x2a7   : > { %4107 = vmatprep.subr.bf16.mxu1 %v6335_v56  ;;  %v6753_v56 = vld [vmem:[#allocation9 + $0xc8] sm:$0xff] (!%p6336_p12)  }
 0x2a8   : > { %4067 = vmatpush1.bf16.msra.mxu0 %v6078_v57  ;;  %v6754_v57 = vld [vmem:[#allocation9 + $0x8] sm:$0xff] (!%p6336_p12)  }
 0x2a9   : > { %6475 = vmatprep.subr.bf16.mxu0 (!%p6336_p12), %v6748_v49  ;;  %v6785_v49 = vld [vmem:[#allocation9 + $0x1c8] sm:$0xff] (!%p6336_p12)  }
 0x2aa   : > { %4108 = vmatpush1.bf16.msra.mxu1 %v6334_v58  ;;  %v6755_v58 = vld [vmem:[#allocation9 + $0x88] sm:$0xff] (!%p6336_p12)  }
 0x2ab   : > { %4069 = vmatmul.mubr.bf16.vlgmr.msra.gmra.mrb[28].mxu0 %v7500_v17  ;;  %v368_v17 = vld [vmem:[#allocation2 + $0x50] sm:$0xff]  ;;  %6497 = vmatprep.subr.bf16.mxu1 (!%p6336_p12), %v6749_v50  ;;  %v6786_v50 = vld [vmem:[#allocation9 + $0x108] sm:$0xff] (!%p6336_p12)  }
 0x2ac   : > { %6476 = vmatpush3.bf16.msra.mxu0 (!%p6336_p12), %v6750_v51  ;;  %v6787_v51 = vld [vmem:[#allocation9 + $0x188] sm:$0xff] (!%p6336_p12)  }
 0x2ad   : > { %4110 = vmatmul.mubr.bf16.vlgmr.msra.gmra.mrb[28].mxu1 %v7506_v20  ;;  %6477 = vmatprep.subr.bf16.mxu0 (!%p6336_p12), %v6752_v53  ;;  %v6789_v53 = vld [vmem:[#allocation9 + $0x1d0] sm:$0xff] (!%p6336_p12)  }
 0x2ae   : > { %6498 = vmatpush3.bf16.msra.mxu1 (!%p6336_p12), %v6751_v52  ;;  %v6788_v52 = vld [vmem:[#allocation9 + $0x150] sm:$0xff] (!%p6336_p12)  }
 0x2af   : > { %6499 = vmatprep.subr.bf16.mxu1 (!%p6336_p12), %v6753_v56  ;;  %v6790_v56 = vld [vmem:[#allocation9 + $0x110] sm:$0xff] (!%p6336_p12)  }
 0x2b0   : > { %6478 = vmatpush3.bf16.msra.mxu0 (!%p6336_p12), %v6754_v57  ;;  %v6791_v57 = vld [vmem:[#allocation9 + $0x190] sm:$0xff] (!%p6336_p12)  }
 0x2b2   : > { %6500 = vmatpush3.bf16.msra.mxu1 (!%p6336_p12), %v6755_v58  ;;  %v6792_v58 = vld [vmem:[#allocation9 + $0x158] sm:$0xff] (!%p6336_p12)  }
 0x2be   : > { %v3824_v61 = vpop.f32.mrb[16].mxu0 }
 0x2bf   : > { %v3826_v0 = vpop.f32.mrb[17].mxu0 }
 0x2c0   : > { %v3865_v63 = vpop.f32.mrb[16].mxu1  ;;  %v3828_v4 = vpop.f32.mrb[18].mxu0 }
 0x2c1   : > { %v3866_v1 = vadd.f32 %v3865_v63, %v3824_v61  ;;  %v3867_v3 = vpop.f32.mrb[17].mxu1  ;;  %v3829_v7 = vpop.f32.mrb[19].mxu0  ;;  %v6756_v61 = vld [vmem:[#allocation9 + $0x50] sm:$0xff] (!%p6336_p12)   ;;  %v6763_v4 = vld [vmem:[#allocation9 + $0x98] sm:$0xff] (!%p6336_p12)  }
 0x2c2   : > { %v3868_v5 = vadd.f32 %v3867_v3, %v3826_v0  ;;  %v3869_v6 = vpop.f32.mrb[18].mxu1  ;;  %6479 = vmatprep.subr.bf16.mxu0 (!%p6336_p12), %v6756_v61  ;;  %v6758_v63 = vld [vmem:[#allocation9 + $0x10] sm:$0xff] (!%p6336_p12)   ;;  %v6762_v3 = vld [vmem:[#allocation9 + $0x18] sm:$0xff] (!%p6336_p12)   ;;  %v6766_v7 = vld [vmem:[#allocation9 + $0x20] sm:$0xff] (!%p6336_p12)  }
 0x2c3   : > { %v4126_v8 = vadd.f32 %v3866_v1, %v366_v62  ;;  %v3870_v9 = vpop.f32.mrb[19].mxu1  ;;  %v6757_v62 = vld [vmem:[#allocation9 + $0xd0] sm:$0xff] (!%p6336_p12)   ;;  %6480 = vmatpush3.bf16.msra.mxu0 (!%p6336_p12), %v6758_v63  ;;  %v6760_v1 = vld [vmem:[#allocation9 + $0x58] sm:$0xff] (!%p6336_p12)   ;;  %v6765_v6 = vld [vmem:[#allocation9 + $0xe0] sm:$0xff] (!%p6336_p12)  }
 0x2c4   : > { %v4127_v10 = vadd.f32 %v3868_v5, %v367_v2  ;;  %6501 = vmatprep.subr.bf16.mxu1 (!%p6336_p12), %v6757_v62  ;;  %v6759_v0 = vld [vmem:[#allocation9 + $0x90] sm:$0xff] (!%p6336_p12)   ;;  %v6761_v2 = vld [vmem:[#allocation9 + $0xd8] sm:$0xff] (!%p6336_p12)   ;;  %6481 = vmatprep.subr.bf16.mxu0 (!%p6336_p12), %v6760_v1  ;;  %v6764_v5 = vld [vmem:[#allocation9 + $0x60] sm:$0xff] (!%p6336_p12)  }
 0x2c5   : > { %4142 = vst [vmem:[#allocation2 + $0x40] sm:$0xff] %v4126_v8  ;;  %6502 = vmatpush3.bf16.msra.mxu1 (!%p6336_p12), %v6759_v0  ;;  %v4174_v8 = vlaneseq (!%p6336_p12)  ;;  %v6767_v9 = vld [vmem:[#allocation9 + $0xa0] sm:$0xff] (!%p6336_p12)   ;;  %v6793_v61 = vld [vmem:[#allocation9 + $0x1d8] sm:$0xff] (!%p6336_p12)  }
 0x2c6   : > { %4143 = vst [vmem:[#allocation2 + $0x48] sm:$0xff] %v4127_v10  ;;  %6503 = vmatprep.subr.bf16.mxu1 (!%p6336_p12), %v6761_v2  ;;  %v6768_v10 = vld [vmem:[#allocation9 + $0x68] sm:$0xff] (!%p6336_p12)   ;;  %v6794_v62 = vld [vmem:[#allocation9 + $0x118] sm:$0xff] (!%p6336_p12)   ;;  %v6796_v0 = vld [vmem:[#allocation9 + $0x160] sm:$0xff] (!%p6336_p12)  }
 0x2c7   : > { %6482 = vmatpush3.bf16.msra.mxu0 (!%p6336_p12), %v6762_v3  ;;  %v6795_v63 = vld [vmem:[#allocation9 + $0x198] sm:$0xff] (!%p6336_p12)   ;;  %v6797_v1 = vld [vmem:[#allocation9 + $0x1e0] sm:$0xff] (!%p6336_p12)  }
 0x2c8   : > { %6483 = vmatprep.subr.bf16.mxu0 (!%p6336_p12), %v6764_v5  ;;  %v6798_v2 = vld [vmem:[#allocation9 + $0x120] sm:$0xff] (!%p6336_p12)   ;;  %v6801_v5 = vld [vmem:[#allocation9 + $0x1e8] sm:$0xff] (!%p6336_p12)  }
 0x2c9   : > { %6504 = vmatpush3.bf16.msra.mxu1 (!%p6336_p12), %v6763_v4  ;;  %v6799_v3 = vld [vmem:[#allocation9 + $0x1a0] sm:$0xff] (!%p6336_p12)   ;;  %v6800_v4 = vld [vmem:[#allocation9 + $0x168] sm:$0xff] (!%p6336_p12)  }
 0x2ca   : > { %6505 = vmatprep.subr.bf16.mxu1 (!%p6336_p12), %v6765_v6  ;;  %v6802_v6 = vld [vmem:[#allocation9 + $0x128] sm:$0xff] (!%p6336_p12)  }
 0x2cb   : > { %6484 = vmatpush3.bf16.msra.mxu0 (!%p6336_p12), %v6766_v7 }
 0x2cc   : > { %6485 = vmatprep.subr.bf16.mxu0 (!%p6336_p12), %v6768_v10  ;;  %v6804_v10 = vld [vmem:[#allocation9 + $0x170] sm:$0xff] (!%p6336_p12)  }
 0x2cd   : > { %6506 = vmatpush3.bf16.msra.mxu1 (!%p6336_p12), %v6767_v9 }
 0x2fe   : > { %v3906_v11 = vpop.f32.mrb[20].mxu0 }
 0x2ff   : > { %v3908_v20 = vpop.f32.mrb[21].mxu0 }
 0x300   : > { %v3947_v59 = vpop.f32.mrb[20].mxu1  ;;  %v3910_v14 = vpop.f32.mrb[22].mxu0 }
 0x301   : > { %v3948_v12 = vadd.f32 %v3947_v59, %v3906_v11  ;;  %v3949_v13 = vpop.f32.mrb[21].mxu1  ;;  %v3911_v18 = vpop.f32.mrb[23].mxu0  ;;  %v6769_v11 = vld [vmem:[#allocation9 + $0xe8] sm:$0xff] (!%p6336_p12)   ;;  %v7979_v59 = vshrl.u32 (!%p6336_p12), %v4174_v8, 7 }
 0x302   : > { %v3950_v15 = vadd.f32 %v3949_v13, %v3908_v20  ;;  %v3951_v16 = vpop.f32.mrb[22].mxu1  ;;  %6507 = vmatprep.subr.bf16.mxu1 (!%p6336_p12), %v6769_v11  ;;  %v6771_v20 = vld [vmem:[#allocation9 + $0xa8] sm:$0xff] (!%p6336_p12)   ;;  %v6774_v13 = vld [vmem:[#allocation9 + $0x30] sm:$0xff] (!%p6336_p12)   ;;  %v6776_v18 = vld [vmem:[#allocation9 + $0x78] sm:$0xff] (!%p6336_p12)  }
 0x303   : > { %v4128_v19 = vadd.f32 %v3948_v12, %v368_v17  ;;  %v3952_v21 = vpop.f32.mrb[23].mxu1  ;;  %v6770_v17 = vld [vmem:[#allocation9 + $0x28] sm:$0xff] (!%p6336_p12)   ;;  %v6772_v12 = vld [vmem:[#allocation9 + $0x70] sm:$0xff] (!%p6336_p12)   ;;  %6508 = vmatpush3.bf16.msra.mxu1 (!%p6336_p12), %v6771_v20  ;;  %v4180_v14 = vsub.s32 (!%p6336_p12), 1, %v7979_v59  ;;  %v4188_v16 = vsub.s32 (!%p6336_p12), 3, %v7979_v59  ;;  %v4196_v7 = vsub.s32 (!%p6336_p12), 5, %v7979_v59 }
 0x304   : > { %v4129_v22 = vadd.f32 %v3950_v15, %v369_v60  ;;  %6486 = vmatpush3.bf16.msra.mxu0 (!%p6336_p12), %v6770_v17  ;;  %v6773_v60 = vld [vmem:[#allocation9 + $0xf0] sm:$0xff] (!%p6336_p12)   ;;  %v6777_v21 = vld [vmem:[#allocation9 + $0xf8] sm:$0xff] (!%p6336_p12)   ;;  %v6803_v8 = vld [vmem:[#allocation9 + $0x1a8] sm:$0xff] (!%p6336_p12)   ;;  %v4204_v9 = vsub.s32 (!%p6336_p12), 7, %v7979_v59  ;;  %v4192_v11 = vsub.s32 (!%p6336_p12), 4, %v7979_v59  ;;  %v4200_v20 = vsub.s32 (!%p6336_p12), 6, %v7979_v59 }
 0x305   : > { %4144 = vst [vmem:[#allocation2 + $0x50] sm:$0xff] %v4128_v19  ;;  %6487 = vmatprep.subr.bf16.mxu0 (!%p6336_p12), %v6772_v12  ;;  %6509 = vmatprep.subr.bf16.mxu1 (!%p6336_p12), %v6773_v60  ;;  %v6775_v15 = vld [vmem:[#allocation9 + $0xb0] sm:$0xff] (!%p6336_p12)   ;;  %v4176_v19 = vsub.s32 (!%p6336_p12), 0, %v7979_v59 }
 0x306   : > { %4145 = vst [vmem:[#allocation2 + $0x58] sm:$0xff] %v4129_v22  ;;  %v4184_v22 = vsub.s32 (!%p6336_p12), 2, %v7979_v59  ;;  %v6805_v17 = vld [vmem:[#allocation9 + $0x1f0] sm:$0xff] (!%p6336_p12)  }
 0x307   : > { %6510 = vmatpush3.bf16.msra.mxu1 (!%p6336_p12), %v6775_v15  ;;  %v6806_v12 = vld [vmem:[#allocation9 + $0x130] sm:$0xff] (!%p6336_p12)  }
 0x308   : > { %6488 = vmatpush3.bf16.msra.mxu0 (!%p6336_p12), %v6774_v13  ;;  %6511 = vmatprep.subr.bf16.mxu1 (!%p6336_p12), %v6777_v21  ;;  %v6807_v60 = vld [vmem:[#allocation9 + $0x1b0] sm:$0xff] (!%p6336_p12)   ;;  %v6808_v13 = vld [vmem:[#allocation9 + $0x178] sm:$0xff] (!%p6336_p12)  }
 0x309   : > { %6489 = vmatprep.subr.bf16.mxu0 (!%p6336_p12), %v6776_v18  ;;  %v6809_v21 = vld [vmem:[#allocation9 + $0x1f8] sm:$0xff] (!%p6336_p12)  }
 0x33e   : > { %v3988_v23 = vpop.f32.mrb[24].mxu0 }
 0x33f   : > { %v3990_v54 = vpop.f32.mrb[25].mxu0 }
 0x340   : > { %v4029_v25 = vpop.f32.mrb[24].mxu1  ;;  %v3992_v28 = vpop.f32.mrb[26].mxu0 }
 0x341   : > { %v4030_v26 = vadd.f32 %v4029_v25, %v3988_v23  ;;  %v4031_v55 = vpop.f32.mrb[25].mxu1  ;;  %v3993_v31 = vpop.f32.mrb[27].mxu0  ;;  %v6778_v23 = vld [vmem:[#allocation9 + $0x38] sm:$0xff] (!%p6336_p12)   ;;  %v4154_v28 = vld [vmem:[#allocation2] sm:$0xff] (!%p6336_p12) }
 0x342   : > { %v4032_v29 = vadd.f32 %v4031_v55, %v3990_v54  ;;  %v4033_v30 = vpop.f32.mrb[26].mxu1  ;;  %6490 = vmatpush3.bf16.msra.mxu0 (!%p6336_p12), %v6778_v23  ;;  %v4155_v25 = vld [vmem:[#allocation2 + $0x8] sm:$0xff] (!%p6336_p12)  ;;  %v7985_v54 = vld [vmem:[#allocation8] sm:$0xff] (!%p6336_p12) }
 0x343   : > { %v4130_v32 = vadd.f32 %v4030_v26, %v370_v24  ;;  %v4034_v33 = vpop.f32.mrb[27].mxu1  ;;  %v6779_v24 = vld [vmem:[#allocation9 + $0xb8] sm:$0xff] (!%p6336_p12)   ;;  %v4157_v26 = vld [vmem:[#allocation2 + $0x18] sm:$0xff] (!%p6336_p12)  ;;  %v4189_v55 = vrot.slane (!%p6336_p12), %v7985_v54, %v4188_v16  ;;  %v4156_v30 = vld [vmem:[#allocation2 + $0x10] sm:$0xff] (!%p6336_p12)  ;;  %v4185_v31 = vrot.slane (!%p6336_p12), %v7985_v54, %v4184_v22  ;;  %v4197_v15 = vrot.slane (!%p6336_p12), %v7985_v54, %v4196_v7 }
 0x344   : > { %v4131_v34 = vadd.f32 %v4032_v29, %v371_v27  ;;  %6512 = vmatpush3.bf16.msra.mxu1 (!%p6336_p12), %v6779_v24  ;;  %v4181_v27 = vrot.slane (!%p6336_p12), %v7985_v54, %v4180_v14  ;;  %v4177_v29 = vrot.slane (!%p6336_p12), %v7985_v54, %v4176_v19  ;;  %v4205_v18 = vrot.slane (!%p6336_p12), %v7985_v54, %v4204_v9 }
 0x345   : > { %4146 = vst [vmem:[#allocation2 + $0x60] sm:$0xff] %v4130_v32  ;;  %v6780_v32 = vld [vmem:[#allocation9 + $0x140] sm:$0xff] (!%p6336_p12)   ;;  %v4193_v23 = vrot.slane (!%p6336_p12), %v7985_v54, %v4192_v11  ;;  %v4201_v24 = vrot.slane (!%p6336_p12), %v7985_v54, %v4200_v20 }
 0x346   : > { %4147 = vst [vmem:[#allocation2 + $0x68] sm:$0xff] %v4131_v34  ;;  %v4255_v33 = vadd.f32 (!%p6336_p12), %v4181_v27, %v4155_v25  ;;  %v4257_v34 = vadd.f32 (!%p6336_p12), %v4189_v55, %v4157_v26  ;;  %6519 = vmatprep.subr.bf16.mxu0 (!%p6336_p12), %v6780_v32  ;;  %v6810_v25 = vld [vmem:[#allocation9 + $0x138] sm:$0xff] (!%p6336_p12)   ;;  %v4161_v55 = vld [vmem:[#allocation2 + $0x38] sm:$0xff] (!%p6336_p12) }
 0x347   : > { %v6811_v26 = vld [vmem:[#allocation9 + $0x1b8] sm:$0xff] (!%p6336_p12)  }
 0x348   : > { %v4159_v27 = vld [vmem:[#allocation2 + $0x28] sm:$0xff] (!%p6336_p12) }
 0x37e   : > { %v4070_v35 = vpop.f32.mrb[28].mxu0 }
 0x37f   : > { %v4072_v38 = vpop.f32.mrb[29].mxu0 }
 0x380   : > { %v4111_v37 = vpop.f32.mrb[28].mxu1  ;;  %v4074_v42 = vpop.f32.mrb[30].mxu0  ;;  %4153 = sbr.rel (%p6336_p12) target bundleno = 1220 (0x4c4), region = 68 }
 0x381   : > { %v4112_v39 = vadd.f32 %v4111_v37, %v4070_v35  ;;  %v4113_v41 = vpop.f32.mrb[29].mxu1  ;;  %v4075_v45 = vpop.f32.mrb[31].mxu0  ;;  %v4254_v35 = vadd.f32 (!%p6336_p12), %v4177_v29, %v4154_v28  ;;  %v6781_v37 = vld [vmem:[#allocation9 + $0x1c0] sm:$0xff] (!%p6336_p12)   ;;  %v4259_v28 = vadd.f32 (!%p6336_p12), %v4197_v15, %v4159_v27  ;;  %v4261_v29 = vadd.f32 (!%p6336_p12), %v4205_v18, %v4161_v55  ;;  %v4163_v15 = vld [vmem:[#allocation2 + $0x48] sm:$0xff] (!%p6336_p12) }
 0x382   : > { %v4114_v43 = vadd.f32 %v4113_v41, %v4072_v38  ;;  %v4115_v44 = vpop.f32.mrb[30].mxu1  ;;  %v4271_v38 = vmax.f32 (!%p6336_p12), %v4255_v33, 0.0  ;;  %6541 = vmatprep.subr.bf16.mxu1 (!%p6336_p12), %v6781_v37  ;;  %v6782_v42 = vld [vmem:[#allocation9 + $0x100] sm:$0xff] (!%p6336_p12)   ;;  %v8015_v18 = vld [vmem:[#allocation8 + $0x8] sm:$0xff] (!%p6336_p12) }
 0x383   : > { %v4132_v46 = vadd.f32 %v4112_v39, %v372_v36  ;;  %v4116_v47 = vpop.f32.mrb[31].mxu1  ;;  %v4256_v36 = vadd.f32 (!%p6336_p12), %v4185_v31, %v4156_v30  ;;  %v4273_v39 = vmax.f32 (!%p6336_p12), %v4257_v34, 0.0  ;;  %v4158_v30 = vld [vmem:[#allocation2 + $0x20] sm:$0xff] (!%p6336_p12)  ;;  %v4160_v31 = vld [vmem:[#allocation2 + $0x30] sm:$0xff] (!%p6336_p12)  ;;  %v4217_v55 = vrot.slane (!%p6336_p12), %v8015_v18, %v4184_v22 }
 0x384   : > { %v4133_v48 = vadd.f32 %v4114_v43, %v373_v40  ;;  %v4270_v40 = vmax.f32 (!%p6336_p12), %v4254_v35, 0.0  ;;  %v6783_v43 = vld [vmem:[#allocation9 + $0x180] sm:$0xff] (!%p6336_p12)   ;;  %4287 = vst [vmem:[#allocation12 + $0x8] sm:$0xff] (!%p6336_p12), %v4271_v38  ;;  %v4303_v44 = vpack.c.bf16 (!%p6336_p12), %v4271_v38, %v4271_v38  ;;  %v4258_v32 = vadd.f32 (!%p6336_p12), %v4193_v23, %v4158_v30 }
 0x385   : > { %4148 = vst [vmem:[#allocation2 + $0x70] sm:$0xff] %v4132_v46  ;;  %v4272_v41 = vmax.f32 (!%p6336_p12), %v4256_v36, 0.0  ;;  %4289 = vst [vmem:[#allocation12 + $0x18] sm:$0xff] (!%p6336_p12), %v4273_v39  ;;  %v4305_v45 = vpack.c.bf16 (!%p6336_p12), %v4273_v39, %v4273_v39  ;;  %v4260_v33 = vadd.f32 (!%p6336_p12), %v4201_v24, %v4160_v31  ;;  %v6812_v34 = vld [vmem:[#allocation9 + $0x240] sm:$0xff] (!%p6336_p12)   ;;  %v4275_v35 = vmax.f32 (!%p6336_p12), %v4259_v28, 0.0 }
 0x386   : > { %4149 = vst [vmem:[#allocation2 + $0x78] sm:$0xff] %v4133_v48  ;;  %4286 = vst [vmem:[#allocation12] sm:$0xff] (!%p6336_p12), %v4270_v40  ;;  %v4302_v46 = vpack.c.bf16 (!%p6336_p12), %v4270_v40, %v4270_v40  ;;  %v6784_v48 = vld [vmem:[#allocation9 + $0x148] sm:$0xff] (!%p6336_p12)   ;;  %5381 = vmatprep.mubr.bf16.mxu0 (!%p6336_p12), %v4303_v44  ;;  %v4277_v36 = vmax.f32 (!%p6336_p12), %v4261_v29, 0.0  ;;  %v6813_v37 = vld [vmem:[#allocation9 + $0x2c0] sm:$0xff] (!%p6336_p12)   ;;  %v4274_v54 = vmax.f32 (!%p6336_p12), %v4258_v32, 0.0  ;;  %v4213_v23 = vrot.slane (!%p6336_p12), %v8015_v18, %v4180_v14 }
 0x387   : > { %4288 = vst [vmem:[#allocation12 + $0x10] sm:$0xff] %v4272_v41  ;;  %v4304_v47 = vpack.c.bf16 %v4272_v41, %v4272_v41  ;;  %5421 = vmatprep.mubr.bf16.mxu1 %v4305_v45  ;;  %v6814_v38 = vld [vmem:[#allocation9 + $0x200] sm:$0xff]   ;;  %v4276_v39 = vmax.f32 %v4260_v33, 0.0  ;;  %4291 = vst [vmem:[#allocation12 + $0x28] sm:$0xff] %v4275_v35  ;;  %v4307_v40 = vpack.c.bf16 %v4275_v35, %v4275_v35  ;;  %v6816_v45 = vld [vmem:[#allocation9 + $0x248] sm:$0xff]  }
 0x388   : > { %5382 = vmatmul.mubr.bf16.vlgmr.msra.gmra.mrb[0].mxu0 %v4302_v46  ;;  %4293 = vst [vmem:[#allocation12 + $0x38] sm:$0xff] %v4277_v36  ;;  %v4309_v41 = vpack.c.bf16 %v4277_v36, %v4277_v36  ;;  %4290 = vst [vmem:[#allocation12 + $0x20] sm:$0xff] %v4274_v54  ;;  %v6817_v46 = vld [vmem:[#allocation9 + $0x2c8] sm:$0xff]   ;;  %v4221_v24 = vrot.slane %v8015_v18, %v4188_v16  ;;  %v4164_v27 = vld [vmem:[#allocation2 + $0x50] sm:$0xff]  ;;  %v4263_v29 = vadd.f32 %v4213_v23, %v4163_v15 }
 0x389   : > { %5422 = vmatmul.mubr.bf16.vlgmr.msra.gmra.mrb[0].mxu1 %v4304_v47  ;;  %6520 = vmatpush3.bf16.msra.mxu0 %v6782_v42  ;;  %v6815_v42 = vld [vmem:[#allocation9 + $0x280] sm:$0xff]   ;;  %4292 = vst [vmem:[#allocation12 + $0x30] sm:$0xff] %v4276_v39  ;;  %v4308_v44 = vpack.c.bf16 %v4276_v39, %v4276_v39  ;;  %v6818_v47 = vld [vmem:[#allocation9 + $0x208] sm:$0xff]   ;;  %v4264_v32 = vadd.f32 %v4217_v55, %v4164_v27 }
 0x38a   : > { %6542 = vmatpush3.bf16.msra.mxu1 %v6783_v43  ;;  %6521 = vmatprep.subr.bf16.mxu0 %v6784_v48  ;;  %v4306_v43 = vpack.c.bf16 %v4274_v54, %v4274_v54  ;;  %v6819_v48 = vld [vmem:[#allocation9 + $0x288] sm:$0xff]   ;;  %v6844_v28 = vld [vmem:[#allocation9 + $0x340] sm:$0xff]   ;;  %v4279_v16 = vmax.f32 %v4263_v29, 0.0 }
 0x38b   : > { %6543 = vmatprep.subr.bf16.mxu1 %v6785_v49  ;;  %5461 = vmatprep.mubr.bf16.mxu0 %v4307_v40  ;;  %v6820_v49 = vld [vmem:[#allocation9 + $0x250] sm:$0xff]   ;;  %v6845_v31 = vld [vmem:[#allocation9 + $0x3c0] sm:$0xff]   ;;  %v6848_v54 = vld [vmem:[#allocation9 + $0x348] sm:$0xff]  }
 0x38c   : > { %5501 = vmatprep.mubr.bf16.mxu1 %v4309_v41  ;;  %v6846_v35 = vld [vmem:[#allocation9 + $0x300] sm:$0xff]   ;;  %4295 = vst [vmem:[#allocation12 + $0x48] sm:$0xff] %v4279_v16  ;;  %v6849_v40 = vld [vmem:[#allocation9 + $0x3c8] sm:$0xff]  }
 0x38d   : > { %6522 = vmatpush3.bf16.msra.mxu0 %v6786_v50  ;;  %v6821_v50 = vld [vmem:[#allocation9 + $0x2d0] sm:$0xff]   ;;  %v6847_v36 = vld [vmem:[#allocation9 + $0x380] sm:$0xff]   ;;  %v6850_v41 = vld [vmem:[#allocation9 + $0x308] sm:$0xff]  }
 0x38e   : > { %6544 = vmatpush3.bf16.msra.mxu1 %v6787_v51  ;;  %6523 = vmatprep.subr.bf16.mxu0 %v6788_v52  ;;  %v6822_v51 = vld [vmem:[#allocation9 + $0x210] sm:$0xff]   ;;  %v4168_v23 = vld [vmem:[#allocation2 + $0x70] sm:$0xff] }
 0x38f   : > { %6545 = vmatprep.subr.bf16.mxu1 %v6789_v53  ;;  %v6823_v52 = vld [vmem:[#allocation9 + $0x290] sm:$0xff]   ;;  %v6824_v53 = vld [vmem:[#allocation9 + $0x258] sm:$0xff]  }
 0x391   : > { %6524 = vmatpush3.bf16.msra.mxu0 %v6790_v56  ;;  %v6825_v56 = vld [vmem:[#allocation9 + $0x2d8] sm:$0xff]  }
 0x392   : > { %6546 = vmatpush3.bf16.msra.mxu1 %v6791_v57  ;;  %6525 = vmatprep.subr.bf16.mxu0 %v6792_v58  ;;  %v6826_v57 = vld [vmem:[#allocation9 + $0x218] sm:$0xff]  }
 0x393   : > { %6547 = vmatprep.subr.bf16.mxu1 %v6793_v61  ;;  %v6827_v58 = vld [vmem:[#allocation9 + $0x298] sm:$0xff]   ;;  %v6828_v61 = vld [vmem:[#allocation9 + $0x260] sm:$0xff]  }
 0x395   : > { %6526 = vmatpush3.bf16.msra.mxu0 %v6794_v62  ;;  %v6829_v62 = vld [vmem:[#allocation9 + $0x2e0] sm:$0xff]  }
 0x396   : > { %6548 = vmatpush3.bf16.msra.mxu1 %v6795_v63  ;;  %6527 = vmatprep.subr.bf16.mxu0 %v6796_v0  ;;  %v6830_v63 = vld [vmem:[#allocation9 + $0x220] sm:$0xff]  }
 0x397   : > { %6549 = vmatprep.subr.bf16.mxu1 %v6797_v1  ;;  %v6831_v0 = vld [vmem:[#allocation9 + $0x2a0] sm:$0xff]   ;;  %v6832_v1 = vld [vmem:[#allocation9 + $0x268] sm:$0xff]  }
 0x399   : > { %6528 = vmatpush3.bf16.msra.mxu0 %v6798_v2  ;;  %v6833_v2 = vld [vmem:[#allocation9 + $0x2e8] sm:$0xff]  }
 0x39a   : > { %6550 = vmatpush3.bf16.msra.mxu1 %v6799_v3  ;;  %6529 = vmatprep.subr.bf16.mxu0 %v6800_v4  ;;  %v6834_v3 = vld [vmem:[#allocation9 + $0x228] sm:$0xff]  }
 0x39b   : > { %6551 = vmatprep.subr.bf16.mxu1 %v6801_v5  ;;  %v6835_v4 = vld [vmem:[#allocation9 + $0x2a8] sm:$0xff]   ;;  %v6836_v5 = vld [vmem:[#allocation9 + $0x270] sm:$0xff]  }
 0x39d   : > { %6530 = vmatpush3.bf16.msra.mxu0 %v6802_v6  ;;  %v6837_v6 = vld [vmem:[#allocation9 + $0x2f0] sm:$0xff]  }
 0x39e   : > { %6552 = vmatpush3.bf16.msra.mxu1 %v6803_v8  ;;  %6531 = vmatprep.subr.bf16.mxu0 %v6804_v10  ;;  %v6838_v8 = vld [vmem:[#allocation9 + $0x230] sm:$0xff]  }
 0x39f   : > { %6553 = vmatprep.subr.bf16.mxu1 %v6805_v17  ;;  %v6839_v10 = vld [vmem:[#allocation9 + $0x2b0] sm:$0xff]   ;;  %v6840_v17 = vld [vmem:[#allocation9 + $0x278] sm:$0xff]  }
 0x3a1   : > { %6532 = vmatpush3.bf16.msra.mxu0 %v6806_v12  ;;  %v6841_v12 = vld [vmem:[#allocation9 + $0x2f8] sm:$0xff]  }
 0x3a2   : > { %6554 = vmatpush3.bf16.msra.mxu1 %v6807_v60  ;;  %6533 = vmatprep.subr.bf16.mxu0 %v6808_v13  ;;  %v6842_v60 = vld [vmem:[#allocation9 + $0x238] sm:$0xff]  }
 0x3a3   : > { %6555 = vmatprep.subr.bf16.mxu1 %v6809_v21  ;;  %v6843_v13 = vld [vmem:[#allocation9 + $0x2b8] sm:$0xff]   ;;  %v4165_v21 = vld [vmem:[#allocation2 + $0x58] sm:$0xff] }
 0x3a4   : > { %v4265_v30 = vadd.f32 %v4221_v24, %v4165_v21 }
 0x3a5   : > { %6534 = vmatpush3.bf16.msra.mxu0 %v6810_v25  ;;  %v4162_v25 = vld [vmem:[#allocation2 + $0x40] sm:$0xff] }
 0x3a6   : > { %6556 = vmatpush3.bf16.msra.mxu1 %v6811_v26  ;;  %6563 = vmatprep.subr.bf16.mxu0 %v6812_v34  ;;  %v4209_v26 = vrot.slane %v8015_v18, %v4176_v19  ;;  %v4281_v33 = vmax.f32 %v4265_v30, 0.0  ;;  %v4280_v19 = vmax.f32 %v4264_v32, 0.0  ;;  %v6337_v30 = vld [vmem:[#allocation11] ss:$0 sm:$0xff] }
 0x3a7   : > { %6585 = vmatprep.subr.bf16.mxu1 %v6813_v37  ;;  %v4311_v37 = vpack.c.bf16 %v4279_v16, %v4279_v16 }
 0x3a8   : > { %5462 = vmatmul.mubr.bf16.vlgmr.msra.gmra.mrb[4].mxu0 %v4306_v43  ;;  %v4262_v14 = vadd.f32 %v4209_v26, %v4162_v25  ;;  %4297 = vst [vmem:[#allocation12 + $0x58] sm:$0xff] %v4281_v33  ;;  %v4313_v22 = vpack.c.bf16 %v4281_v33, %v4281_v33  ;;  %4296 = vst [vmem:[#allocation12 + $0x50] sm:$0xff] %v4280_v19  ;;  %v4312_v39 = vpack.c.bf16 %v4280_v19, %v4280_v19  ;;  %v6852_v43 = vld [vmem:[#allocation9 + $0x350] sm:$0xff]  }
 0x3a9   : > { %5502 = vmatmul.mubr.bf16.vlgmr.msra.gmra.mrb[4].mxu1 %v4308_v44  ;;  %6564 = vmatpush3.bf16.msra.mxu0 %v6814_v38  ;;  %v6853_v44 = vld [vmem:[#allocation9 + $0x3d0] sm:$0xff]  }
 0x3aa   : > { %6586 = vmatpush3.bf16.msra.mxu1 %v6815_v42  ;;  %6565 = vmatprep.subr.bf16.mxu0 %v6816_v45  ;;  %v4278_v34 = vmax.f32 %v4262_v14, 0.0  ;;  %v6851_v42 = vld [vmem:[#allocation9 + $0x388] sm:$0xff]   ;;  %v6854_v45 = vld [vmem:[#allocation9 + $0x310] sm:$0xff]  }
 0x3ab   : > { %6587 = vmatprep.subr.bf16.mxu1 %v6817_v46  ;;  %5541 = vmatprep.mubr.bf16.mxu0 %v4311_v37  ;;  %v6855_v46 = vld [vmem:[#allocation9 + $0x390] sm:$0xff]  }
 0x3ac   : > { %4294 = vst [vmem:[#allocation12 + $0x40] sm:$0xff] %v4278_v34  ;;  %v4310_v38 = vpack.c.bf16 %v4278_v34, %v4278_v34  ;;  %5581 = vmatprep.mubr.bf16.mxu1 %v4313_v22 }
 0x3ad   : > { %6566 = vmatpush3.bf16.msra.mxu0 %v6818_v47  ;;  %v6856_v47 = vld [vmem:[#allocation9 + $0x358] sm:$0xff]  }
 0x3ae   : > { %6588 = vmatpush3.bf16.msra.mxu1 %v6819_v48  ;;  %6567 = vmatprep.subr.bf16.mxu0 %v6820_v49  ;;  %v6857_v48 = vld [vmem:[#allocation9 + $0x3d8] sm:$0xff]  }
 0x3af   : > { %6589 = vmatprep.subr.bf16.mxu1 %v6821_v50  ;;  %v6858_v49 = vld [vmem:[#allocation9 + $0x318] sm:$0xff]  }
 0x3b0   : > { %v6859_v50 = vld [vmem:[#allocation9 + $0x398] sm:$0xff]  }
 0x3b1   : > { %6568 = vmatpush3.bf16.msra.mxu0 %v6822_v51  ;;  %v6860_v51 = vld [vmem:[#allocation9 + $0x360] sm:$0xff]  }
 0x3b2   : > { %6590 = vmatpush3.bf16.msra.mxu1 %v6823_v52  ;;  %6569 = vmatprep.subr.bf16.mxu0 %v6824_v53  ;;  %v6861_v52 = vld [vmem:[#allocation9 + $0x3e0] sm:$0xff]  }
 0x3b3   : > { %6591 = vmatprep.subr.bf16.mxu1 %v6825_v56  ;;  %v6862_v53 = vld [vmem:[#allocation9 + $0x320] sm:$0xff]  }
 0x3b4   : > { %v6863_v56 = vld [vmem:[#allocation9 + $0x3a0] sm:$0xff]  }
 0x3b5   : > { %6570 = vmatpush3.bf16.msra.mxu0 %v6826_v57  ;;  %v6864_v57 = vld [vmem:[#allocation9 + $0x368] sm:$0xff]  }
 0x3b6   : > { %6592 = vmatpush3.bf16.msra.mxu1 %v6827_v58  ;;  %6571 = vmatprep.subr.bf16.mxu0 %v6828_v61  ;;  %v6865_v58 = vld [vmem:[#allocation9 + $0x3e8] sm:$0xff]  }
 0x3b7   : > { %6593 = vmatprep.subr.bf16.mxu1 %v6829_v62  ;;  %v6866_v61 = vld [vmem:[#allocation9 + $0x328] sm:$0xff]  }
 0x3b8   : > { %v6867_v62 = vld [vmem:[#allocation9 + $0x3a8] sm:$0xff]  }
 0x3b9   : > { %6572 = vmatpush3.bf16.msra.mxu0 %v6830_v63  ;;  %v6868_v63 = vld [vmem:[#allocation9 + $0x370] sm:$0xff]  }
 0x3ba   : > { %6594 = vmatpush3.bf16.msra.mxu1 %v6831_v0  ;;  %6573 = vmatprep.subr.bf16.mxu0 %v6832_v1  ;;  %v6869_v0 = vld [vmem:[#allocation9 + $0x3f0] sm:$0xff]  }
 0x3bb   : > { %6595 = vmatprep.subr.bf16.mxu1 %v6833_v2  ;;  %v6870_v1 = vld [vmem:[#allocation9 + $0x330] sm:$0xff]  }
 0x3bc   : > { %v6871_v2 = vld [vmem:[#allocation9 + $0x3b0] sm:$0xff]  }
 0x3bd   : > { %6574 = vmatpush3.bf16.msra.mxu0 %v6834_v3  ;;  %v6872_v3 = vld [vmem:[#allocation9 + $0x378] sm:$0xff]  }
 0x3be   : > { %6596 = vmatpush3.bf16.msra.mxu1 %v6835_v4  ;;  %6575 = vmatprep.subr.bf16.mxu0 %v6836_v5  ;;  %v4229_v4 = vrot.slane %v8015_v18, %v4196_v7  ;;  %v4237_v5 = vrot.slane %v8015_v18, %v4204_v9  ;;  %v6874_v7 = vld [vmem:[#allocation9 + $0x338] sm:$0xff]  }
 0x3bf   : > { %6597 = vmatprep.subr.bf16.mxu1 %v6837_v6  ;;  %v4225_v6 = vrot.slane %v8015_v18, %v4192_v11 }
 0x3c1   : > { %6576 = vmatpush3.bf16.msra.mxu0 %v6838_v8  ;;  %v6873_v8 = vld [vmem:[#allocation9 + $0x3f8] sm:$0xff]  }
 0x3c2   : > { %6598 = vmatpush3.bf16.msra.mxu1 %v6839_v10  ;;  %6577 = vmatprep.subr.bf16.mxu0 %v6840_v17  ;;  %v4233_v10 = vrot.slane %v8015_v18, %v4200_v20  ;;  %v4167_v17 = vld [vmem:[#allocation2 + $0x68] sm:$0xff] }
 0x3c3   : > { %6599 = vmatprep.subr.bf16.mxu1 %v6841_v12  ;;  %v4169_v12 = vld [vmem:[#allocation2 + $0x78] sm:$0xff]  ;;  %v4267_v15 = vadd.f32 %v4229_v4, %v4167_v17 }
 0x3c4   : > { %v4269_v9 = vadd.f32 %v4237_v5, %v4169_v12  ;;  %v4268_v11 = vadd.f32 %v4233_v10, %v4168_v23 }
 0x3c5   : > { %6578 = vmatpush3.bf16.msra.mxu0 %v6842_v60  ;;  %v4166_v60 = vld [vmem:[#allocation2 + $0x60] sm:$0xff]  ;;  %v4283_v24 = vmax.f32 %v4267_v15, 0.0 }
 0x3c6   : > { %6600 = vmatpush3.bf16.msra.mxu1 %v6843_v13  ;;  %6607 = vmatprep.subr.bf16.mxu0 %v6844_v28  ;;  %v6875_v13 = vld [vmem:[#allocation9 + $0x3b8] sm:$0xff]   ;;  %v4266_v21 = vadd.f32 %v4225_v6, %v4166_v60  ;;  %v4285_v25 = vmax.f32 %v4269_v9, 0.0  ;;  %v4284_v59 = vmax.f32 %v4268_v11, 0.0 }
 0x3c7   : > { %6629 = vmatprep.subr.bf16.mxu1 %v6845_v31  ;;  %4299 = vst [vmem:[#allocation12 + $0x68] sm:$0xff] %v4283_v24  ;;  %v4315_v20 = vpack.c.bf16 %v4283_v24, %v4283_v24 }
 0x3c8   : > { %5542 = vmatmul.mubr.bf16.vlgmr.msra.gmra.mrb[8].mxu0 %v4310_v38  ;;  %v4282_v26 = vmax.f32 %v4266_v21, 0.0  ;;  %4301 = vst [vmem:[#allocation12 + $0x78] sm:$0xff] %v4285_v25  ;;  %v4317_v18 = vpack.c.bf16 %v4285_v25, %v4285_v25  ;;  %4300 = vst [vmem:[#allocation12 + $0x70] sm:$0xff] %v4284_v59  ;;  %v4316_v55 = vpack.c.bf16 %v4284_v59, %v4284_v59 }
 0x3c9   : > { %5582 = vmatmul.mubr.bf16.vlgmr.msra.gmra.mrb[8].mxu1 %v4312_v39  ;;  %6608 = vmatpush3.bf16.msra.mxu0 %v6846_v35 }
 0x3ca   : > { %6630 = vmatpush3.bf16.msra.mxu1 %v6847_v36  ;;  %6609 = vmatprep.subr.bf16.mxu0 %v6848_v54  ;;  %4298 = vst [vmem:[#allocation12 + $0x60] sm:$0xff] %v4282_v26  ;;  %v4314_v27 = vpack.c.bf16 %v4282_v26, %v4282_v26 }
 0x3cb   : > { %6631 = vmatprep.subr.bf16.mxu1 %v6849_v40  ;;  %5621 = vmatprep.mubr.bf16.mxu0 %v4315_v20 }
 0x3cc   : > { %5661 = vmatprep.mubr.bf16.mxu1 %v4317_v18 }
 0x3cd   : > { %6610 = vmatpush3.bf16.msra.mxu0 %v6850_v41 }
 0x3ce   : > { %6632 = vmatpush3.bf16.msra.mxu1 %v6851_v42  ;;  %6611 = vmatprep.subr.bf16.mxu0 %v6852_v43 }
 0x3cf   : > { %6633 = vmatprep.subr.bf16.mxu1 %v6853_v44 }
 0x3d1   : > { %6612 = vmatpush3.bf16.msra.mxu0 %v6854_v45 }
 0x3d2   : > { %6634 = vmatpush3.bf16.msra.mxu1 %v6855_v46  ;;  %6613 = vmatprep.subr.bf16.mxu0 %v6856_v47 }
 0x3d3   : > { %6635 = vmatprep.subr.bf16.mxu1 %v6857_v48 }
 0x3d5   : > { %6614 = vmatpush3.bf16.msra.mxu0 %v6858_v49 }
 0x3d6   : > { %6636 = vmatpush3.bf16.msra.mxu1 %v6859_v50  ;;  %6615 = vmatprep.subr.bf16.mxu0 %v6860_v51 }
 0x3d7   : > { %6637 = vmatprep.subr.bf16.mxu1 %v6861_v52 }
 0x3d9   : > { %6616 = vmatpush3.bf16.msra.mxu0 %v6862_v53 }
 0x3da   : > { %6638 = vmatpush3.bf16.msra.mxu1 %v6863_v56  ;;  %6617 = vmatprep.subr.bf16.mxu0 %v6864_v57 }
 0x3db   : > { %6639 = vmatprep.subr.bf16.mxu1 %v6865_v58 }
 0x3dd   : > { %6618 = vmatpush3.bf16.msra.mxu0 %v6866_v61 }
 0x3de   : > { %6640 = vmatpush3.bf16.msra.mxu1 %v6867_v62  ;;  %6619 = vmatprep.subr.bf16.mxu0 %v6868_v63 }
 0x3df   : > { %6641 = vmatprep.subr.bf16.mxu1 %v6869_v0 }
 0x3e1   : > { %6620 = vmatpush3.bf16.msra.mxu0 %v6870_v1 }
 0x3e2   : > { %6642 = vmatpush3.bf16.msra.mxu1 %v6871_v2  ;;  %6621 = vmatprep.subr.bf16.mxu0 %v6872_v3 }
 0x3e3   : > { %6643 = vmatprep.subr.bf16.mxu1 %v6873_v8 }
 0x3e5   : > { %6622 = vmatpush3.bf16.msra.mxu0 %v6874_v7 }
 0x3e6   : > { %6644 = vmatpush3.bf16.msra.mxu1 %v6875_v13 }
 0x3e8   : > { %5622 = vmatmul.mubr.bf16.vlgmr.msra.gmra.mrb[12].mxu0 %v4314_v27 }
 0x3e9   : > { %5662 = vmatmul.mubr.bf16.vlgmr.msra.gmra.mrb[12].mxu1 %v4316_v55 }
 0x45b   : > { %v6491_v28 = vpop.f32.mrb[0].mxu0 }
 0x45c   : > { %v6513_v29 = vpop.f32.mrb[0].mxu1  ;;  %v6492_v14 = vpop.f32.mrb[1].mxu0 }
 0x45d   : > { %v6514_v31 = vpop.f32.mrb[1].mxu1  ;;  %v6493_v32 = vadd.f32 %v6492_v14, %v6491_v28  ;;  %v6494_v33 = vpop.f32.mrb[2].mxu0 }
 0x45e   : > { %v6515_v16 = vadd.f32 %v6514_v31, %v6513_v29  ;;  %v6516_v34 = vpop.f32.mrb[2].mxu1  ;;  %v6495_v35 = vpop.f32.mrb[3].mxu0 }
 0x45f   : > { %v6517_v19 = vpop.f32.mrb[3].mxu1  ;;  %v5384_v36 = vadd.f32 %v6493_v32, %v6337_v30 }
 0x461   : > { %v5424_v37 = vadd.f32 %v6515_v16, %v5384_v36 }
 0x47b   : > { %v6535_v22 = vpop.f32.mrb[4].mxu0 }
 0x47c   : > { %v6557_v38 = vpop.f32.mrb[4].mxu1  ;;  %v6536_v54 = vpop.f32.mrb[5].mxu0 }
 0x47d   : > { %v6558_v39 = vpop.f32.mrb[5].mxu1  ;;  %v6537_v40 = vadd.f32 %v6536_v54, %v6535_v22  ;;  %v6538_v42 = vpop.f32.mrb[6].mxu0 }
 0x47e   : > { %v6559_v41 = vadd.f32 %v6558_v39, %v6557_v38  ;;  %v6560_v43 = vpop.f32.mrb[6].mxu1  ;;  %v6539_v44 = vpop.f32.mrb[7].mxu0 }
 0x47f   : > { %v6561_v45 = vpop.f32.mrb[7].mxu1  ;;  %v5464_v46 = vadd.f32 %v6537_v40, %v5424_v37 }
 0x481   : > { %v5504_v47 = vadd.f32 %v6559_v41, %v5464_v46 }
 0x49b   : > { %v6579_v48 = vpop.f32.mrb[8].mxu0 }
 0x49c   : > { %v6601_v49 = vpop.f32.mrb[8].mxu1  ;;  %v6580_v50 = vpop.f32.mrb[9].mxu0 }
 0x49d   : > { %v6602_v51 = vpop.f32.mrb[9].mxu1  ;;  %v6581_v52 = vadd.f32 %v6580_v50, %v6579_v48  ;;  %v6582_v56 = vpop.f32.mrb[10].mxu0 }
 0x49e   : > { %v6603_v53 = vadd.f32 %v6602_v51, %v6601_v49  ;;  %v6604_v57 = vpop.f32.mrb[10].mxu1  ;;  %v6583_v58 = vpop.f32.mrb[11].mxu0 }
 0x49f   : > { %v6605_v61 = vpop.f32.mrb[11].mxu1  ;;  %v5544_v62 = vadd.f32 %v6581_v52, %v5504_v47 }
 0x4a1   : > { %v5584_v63 = vadd.f32 %v6603_v53, %v5544_v62 }
 0x4bb   : > { %v6623_v0 = vpop.f32.mrb[12].mxu0 }
 0x4bc   : > { %v6645_v1 = vpop.f32.mrb[12].mxu1  ;;  %v6624_v2 = vpop.f32.mrb[13].mxu0 }
 0x4bd   : > { %v6646_v3 = vpop.f32.mrb[13].mxu1  ;;  %v6625_v4 = vadd.f32 %v6624_v2, %v6623_v0  ;;  %v6626_v6 = vpop.f32.mrb[14].mxu0 }
 0x4be   : > { %v6647_v5 = vadd.f32 %v6646_v3, %v6645_v1  ;;  %v6648_v8 = vpop.f32.mrb[14].mxu1  ;;  %v6627_v10 = vpop.f32.mrb[15].mxu0 }
 0x4bf   : > { %v6649_v17 = vpop.f32.mrb[15].mxu1  ;;  %v5624_v12 = vadd.f32 %v6625_v4, %v5584_v63 }
 0x4c1   : > { %v5664_v60 = vadd.f32 %v6647_v5, %v5624_v12 }
 0x4c3   : > { %5669 = vst [vmem:[#allocation13] sm:$0xff] %v5664_v60 }
 0x4c4 PF: > { %p6699_p0 = scmp.eq.s32.totalorder %s7193_s25, 1  ;;  %s7137_s26 = smov [#allocation12]  }
 0x4c5   : > { %s5677_s27 = sshll.u32 %s7137_s26, 4  ;;  %s7138_s9 = smov [#allocation13]   ;;  %s5678_s27 = int_to_ptr.vmem [resolvable:$true] %s5677_s27 }
 0x4c6   : > { %s5688_s17 = sshll.u32 %s7138_s9, 4  ;;  %s7020_s13 = scalar_lea.vmem %s5678_s27, 2048  ;;  %s5689_s17 = int_to_ptr.vmem [resolvable:$true] %s5688_s17 }
 0x4c7   : > { %p7021_p2 = scmp.ne.s32.totalorder %s5678_s27, %s7020_s13  ;;  %p7027_p10 = scmp.lt.s32.totalorder %s5678_s27, %s5678_s27 }
 0x4c8   : > { %p7028_p9 = scmp.lt.s32.totalorder %s7020_s13, %s7020_s13 }
 0x4c9   : > { %p7022_p13 = pnand %p7021_p2, %p6699_p0 }
 0x4ca   : > { %p7029_p6 = por %p7028_p9, %p7027_p10 }
 0x4cb   : > { %p7023_p3 = pneg %p7022_p13 }
 0x4cd   : > { %p7030_p7 = pnand %p7029_p6, %p7023_p3 }
 0x4cf   : > { %7033 = shalt.err (!%p7030_p7)
}
 0x4d0   : > { %s7034_s7 = scalar_lea.hbm %s8104_s5, 2048 }
 0x4d1   : > { %p7035_p8 = scmp.ne.s32.totalorder %s8104_s5, %s7034_s7  ;;  %p7040_p4 = scmp.lt.u32.totalorder %s7034_s7, %s8104_s5 }
 0x4d3   : > { %p7036_p11 = pnand %p7035_p8, %p6699_p0 }
 0x4d5   : > { %p7037_p1 = pneg %p7036_p11 }
 0x4d7   : > { %p7042_p5 = pnand %p7040_p4, %p7037_p1 }
 0x4d9   : > { %7045 = shalt.err (!%p7042_p5)
}
 0x4da   : > { %6668 = dma.vmem_to_hbm [thread:$0]  (%p6699_p0), %s5678_s27, 2048, %s8104_s5, [#allocation5]  }
 0x4db   : > { %s7046_s30 = scalar_lea.vmem %s5689_s17, 128  ;;  %p7053_p3 = scmp.lt.s32.totalorder %s5689_s17, %s5689_s17 }
 0x4dc   : > { %p7047_p12 = scmp.ne.s32.totalorder %s5689_s17, %s7046_s30  ;;  %p7054_p10 = scmp.lt.s32.totalorder %s7046_s30, %s7046_s30 }
 0x4de   : > { %p7048_p2 = pnand %p7047_p12, %p6699_p0  ;;  %p7055_p9 = por %p7054_p10, %p7053_p3 }
 0x4e0   : > { %p7049_p13 = pneg %p7048_p2 }
 0x4e2   : > { %p7056_p6 = pnand %p7055_p9, %p7049_p13 }
 0x4e4   : > { %7059 = shalt.err (!%p7056_p6)
}
 0x4e5   : > { %s7060_s15 = scalar_lea.hbm %s8105_s6, 128 }
 0x4e6   : > { %p7061_p7 = scmp.ne.s32.totalorder %s8105_s6, %s7060_s15  ;;  %p7066_p1 = scmp.lt.u32.totalorder %s7060_s15, %s8105_s6 }
 0x4e8   : > { %p7062_p8 = pnand %p7061_p7, %p6699_p0 }
 0x4ea   : > { %p7063_p11 = pneg %p7062_p8 }
 0x4ec   : > { %p7068_p4 = pnand %p7066_p1, %p7063_p11 }
 0x4ee   : > { %7071 = shalt.err (!%p7068_p4)
}
 0x4ef   : > { %6670 = dma.vmem_to_hbm [thread:$0]  (%p6699_p0), %s5689_s17, 128, %s8105_s6, [#allocation14]  }
 0x4f0   : > { %7105 = dma.done.wait (%p6699_p0), [#allocation5], 2048  }
 0x4f1   : > { %7107 = vsyncadd (%p6699_p0), [#allocation5], 4294965248 }
 0x4f2   : > { %7109 = dma.done.wait (%p6699_p0), [#allocation14], 128  }
 0x4f3   : > { %7111 = vsyncadd (%p6699_p0), [#allocation14], 4294967168 }
 0x4f4 PF: > { %p23_p5 = scmp.ge.s32.totalorder %s7291_s16, 4   ;;  %s8121_s21 = smov %s7118_s22 }
 0x4f5   : > { %s8122_s22 = smov %s7122_s23  ;;  %s8123_s23 = smov %s7301_s8 }
 0x4f6   : > { %s8124_s24 = smov %s7291_s16  ;;  %25 = sbr.rel (!%p23_p5) target bundleno = 8 (0x8), region = 118 }
 0x4fd   :  { %5705 = vsyncpa [#allocation4], 1 }
 0x4fe   :  { %5707 = vsyncpa [#allocation4 + $0x1], 1 }
 0x4ff   :  { %5708 = vsyncpa [#allocation7], 1 }
 0x500   :  { %5710 = vsyncpa [#allocation7 + $0x1], 1 }
 0x501   :  { %5711 = vsyncpa [#allocation10], 1 }
 0x502   :  { %5712 = vsyncpa [#allocation5], 1 }
 0x503   :  { %5714 = vsyncpa [#allocation5 + $0x1], 1 }
 0x504   :  { %5715 = vsyncpa [#allocation14], 1 }

</bundles_post_ra>
